<compile_context>
chip_gen: v6e
topology: v6e:2x2x1
jax: 0.10.0
libtpu: 0.0.40
codegen_flags: <defaults>
</compile_context>

<pallas_src>
import functools

import jax
import jax.numpy as jnp
from jax import lax
from jax.experimental import pallas as pl
from jax.experimental.pallas import tpu as pltpu

BN_EPS = 1e-5
LANE = 128


def _round_up(n, m):
    return ((n + m - 1) // m) * m


def actor_kernel(x_ref, w1_ref, scale_ref, shift_ref,
                 w2_ref, b2_ref, w3_ref, b3_ref, o_ref):
    """One 256-row batch tile of the MLP.

    BatchNorm (training-mode, whole-batch stats) has been folded into a
    per-feature (scale, shift) pair in the wrapper; fc1's bias is folded into
    `shift`, so fc1 here is bias-free.  All matmul inputs are bf16 with f32
    accumulation; elementwise work stays f32.
    """
    x = x_ref[...]                                                   # (Tb, SP) bf16

    # fc1 -> BN (single FMA) -> ReLU.
    z1 = jnp.dot(x, w1_ref[...], preferred_element_type=jnp.float32)  # (Tb, F1P) f32
    h1 = jnp.maximum(z1 * scale_ref[...] + shift_ref[...], 0.0)

    # fc2 -> ReLU.  Cast to bf16 only right at the MXU boundary.
    h2 = jnp.dot(h1.astype(jnp.bfloat16), w2_ref[...],
                 preferred_element_type=jnp.float32) + b2_ref[...]
    h2 = jnp.maximum(h2, 0.0)

    # fc3 -> Tanh (EUP).
    h3 = jnp.dot(h2.astype(jnp.bfloat16), w3_ref[...],
                 preferred_element_type=jnp.float32) + b3_ref[...]
    o_ref[...] = jnp.tanh(h3)


@functools.partial(jax.jit, static_argnames=("action_size", "tile_b"))
def actor_forward(x, params, kparams, *, action_size, tile_b=256):
    """x: (B, state_size) f32.  params: f32 originals.  kparams: padded bf16.

    tile_b: batch tile (grid) size — 256 fills the v6e/v7x MXU sublane dim;
    use 128 on v5e if desired.
    """
    B, S = x.shape
    f1 = params["w1"].shape[1]

    w1p = kparams["w1"]
    SP, F1P = w1p.shape
    F2P = kparams["w2"].shape[1]
    AP = kparams["w3"].shape[1]

    # ---- BatchNorm1d training-mode stats over the WHOLE batch (f32, exact).
    # Whole-batch coupling is why this lives outside the tiled kernel; the
    # cost is one tiny f32 (B,S)x(S,400) matmul plus a mean/var reduction.
    z = x @ params["w1"]                                   # (B, F1) f32, no bias
    h1_full = z + params["b1"]
    mu = jnp.mean(h1_full, axis=0, keepdims=True)
    var = jnp.mean(jnp.square(h1_full - mu), axis=0, keepdims=True)  # two-pass
    scale = params["gamma"] * lax.rsqrt(var + BN_EPS)                # (1, F1)
    shift = params["beta"] + (params["b1"] - mu) * scale             # folds fc1 bias
    scale = jnp.pad(scale, ((0, 0), (0, F1P - f1)))       # padded cols -> h1 = 0
    shift = jnp.pad(shift, ((0, 0), (0, F1P - f1)))

    # ---- pad batch rows to a tile multiple, state cols to 128 lanes (exact).
    Bp = _round_up(B, tile_b)
    xb = jnp.zeros((Bp, SP), jnp.bfloat16).at[:B, :S].set(x.astype(jnp.bfloat16))

    grid = (Bp // tile_b,)
    flops = 2 * Bp * (SP * F1P + F1P * F2P + F2P * AP)
    weight_bytes = (w1p.size + kparams["w2"].size + kparams["w3"].size) * 2
    small_bytes = (kparams["b2"].size + kparams["b3"].size
                   + scale.size + shift.size) * 4
    bytes_accessed = xb.size * 2 + weight_bytes + small_bytes + Bp * AP * 4

    out = pl.pallas_call(
        actor_kernel,
        out_shape=jax.ShapeDtypeStruct((Bp, AP), jnp.float32),
        grid=grid,
        in_specs=[
            pl.BlockSpec((tile_b, SP), lambda t: (t, 0)),   # x tiles: pipelined
            pl.BlockSpec((SP, F1P), lambda t: (0, 0)),      # weights: resident
            pl.BlockSpec((1, F1P), lambda t: (0, 0)),       # BN scale
            pl.BlockSpec((1, F1P), lambda t: (0, 0)),       # BN shift (+ b1)
            pl.BlockSpec((F1P, F2P), lambda t: (0, 0)),
            pl.BlockSpec((1, F2P), lambda t: (0, 0)),
            pl.BlockSpec((F2P, AP), lambda t: (0, 0)),
            pl.BlockSpec((1, AP), lambda t: (0, 0)),
        ],
        out_specs=pl.BlockSpec((tile_b, AP), lambda t: (t, 0)),
        compiler_params=pltpu.CompilerParams(
            dimension_semantics=("parallel",)),             # v7x: both TCs
        cost_estimate=pl.CostEstimate(flops=flops,
                                      transcendentals=Bp * AP,
                                      bytes_accessed=bytes_accessed),
    )(xb, w1p, scale, shift,
      kparams["w2"], kparams["b2"], kparams["w3"], kparams["b3"])

    return out[:B, :action_size]                            # slice padding off


def init_params(key, state_size, action_size, fc1_dim=400, fc2_dim=300):
    """Deterministic init mirroring Actor.reset_parameters().

    hidden_init() uses weight.size()[0] (= out_features) as fan_in, so that
    exact limit is reproduced.  Biases use the PyTorch Linear default
    U(-1/sqrt(in_features), 1/sqrt(in_features)).  BN gamma=1, beta=0.
    Weights are stored transposed as (in, out) so the kernel computes x @ W.
    """
    ks = jax.random.split(key, 6)

    def u(k, shape, lim):
        return jax.random.uniform(k, shape, jnp.float32, -lim, lim)

    lim1 = 1.0 / jnp.sqrt(jnp.float32(fc1_dim))       # weight.size()[0] of fc1
    lim2 = 1.0 / jnp.sqrt(jnp.float32(fc2_dim))       # weight.size()[0] of fc2
    blim1 = 1.0 / jnp.sqrt(jnp.float32(state_size))
    blim2 = 1.0 / jnp.sqrt(jnp.float32(fc1_dim))
    blim3 = 1.0 / jnp.sqrt(jnp.float32(fc2_dim))

    return {
        "w1": u(ks[0], (state_size, fc1_dim), lim1),
        "b1": u(ks[1], (1, fc1_dim), blim1),
        "gamma": jnp.ones((1, fc1_dim), jnp.float32),
        "beta": jnp.zeros((1, fc1_dim), jnp.float32),
        "w2": u(ks[2], (fc1_dim, fc2_dim), lim2),
        "b2": u(ks[3], (1, fc2_dim), blim2),
        "w3": u(ks[4], (fc2_dim, action_size), 0.003),
        "b3": u(ks[5], (1, action_size), blim3),
    }


def prepare_kernel_params(p):
    """Zero-pad feature dims (and the state dim) to 128-lane multiples; bf16.

    Padding is exact: padded fc1 columns get scale = shift = 0 -> ReLU 0, and
    the corresponding w2 rows are zero; same for fc2/fc3.  Padded output
    columns are tanh(0) = 0 and sliced off in the wrapper.
    """
    s, f1 = p["w1"].shape
    f2 = p["w2"].shape[1]
    a = p["w3"].shape[1]
    sp = _round_up(s, LANE)
    f1p = _round_up(f1, LANE)
    f2p = _round_up(f2, LANE)
    ap = _round_up(a, LANE)

    def pad(arr, rows, cols, dtype):
        out = jnp.zeros((rows, cols), dtype)
        return out.at[:arr.shape[0], :arr.shape[1]].set(arr.astype(dtype))

    return {
        "w1": pad(p["w1"], sp, f1p, jnp.bfloat16),
        "w2": pad(p["w2"], f1p, f2p, jnp.bfloat16),
        "b2": pad(p["b2"], 1, f2p, jnp.float32),
        "w3": pad(p["w3"], f2p, ap, jnp.bfloat16),
        "b3": pad(p["b3"], 1, ap, jnp.float32),
    }


def actor_reference(x, p):
    """Pure-JAX f32 reference matching the PyTorch module exactly (incl. b1)."""
    h1 = x @ p["w1"] + p["b1"]
    mu = jnp.mean(h1, axis=0, keepdims=True)
    var = jnp.mean((h1 - mu) ** 2, axis=0, keepdims=True)
    h1 = (h1 - mu) / jnp.sqrt(var + BN_EPS) * p["gamma"] + p["beta"]
    h1 = jnp.maximum(h1, 0.0)
    h2 = jnp.maximum(h1 @ p["w2"] + p["b2"], 0.0)
    return jnp.tanh(h2 @ p["w3"] + p["b3"])


if __name__ == "__main__":
    key = jax.random.PRNGKey(0)
    kx, kp = jax.random.split(key)

    # Shapes consistent with Actor(state_size, action_size); hidden dims are
    # the module defaults.  B = 512 = 2 batch tiles of 256: amortizes call
    # overhead / weight DMA, fills the 256-wide MXU, and exercises the grid.
    B, state_size, action_size = 512, 16, 4
    fc1_dim, fc2_dim = 400, 300

    x = jax.random.normal(kx, (B, state_size), jnp.float32)
    params = init_params(kp, state_size, action_size, fc1_dim, fc2_dim)
    kparams = prepare_kernel_params(params)

    out = actor_forward(x, params, kparams, action_size=action_size)
    out = jax.block_until_ready(out)

    ref = actor_reference(x, params)
    assert out.shape == (B, action_size)
    # bf16 matmul inputs (f32 accumulation) -> looser tolerance than pure f32.
    assert jnp.max(jnp.abs(out - ref)) < 5e-2, "mismatch vs reference"

    print("KERNEL_OK")
</pallas_src>

<mosaic_0001>
module attributes {stable_mosaic.version = 11 : i64} {
  func.func @actor_kernel(%arg0: i32, %arg1: memref<256x128xbf16, #tpu.memory_space<vmem>>, %arg2: memref<128x512xbf16, #tpu.memory_space<vmem>>, %arg3: memref<1x512xf32, #tpu.memory_space<vmem>>, %arg4: memref<1x512xf32, #tpu.memory_space<vmem>>, %arg5: memref<512x384xbf16, #tpu.memory_space<vmem>>, %arg6: memref<1x384xf32, #tpu.memory_space<vmem>>, %arg7: memref<384x128xbf16, #tpu.memory_space<vmem>>, %arg8: memref<1x128xf32, #tpu.memory_space<vmem>>, %arg9: memref<256x128xf32, #tpu.memory_space<vmem>>) attributes {dimension_semantics = [#tpu.dimension_semantics<parallel>], iteration_bounds = array<i64: 2>, scalar_prefetch = 0 : i64, scratch_operands = 0 : i64, tpu.core_type = #tpu.core_type<tc>, window_params = [{transform_indices = @transform_0, window_bounds = array<i64: 256, 128>}, {pipeline_mode = #tpu.pipeline_mode<synchronous>, transform_indices = @transform_1, window_bounds = array<i64: 128, 512>}, {pipeline_mode = #tpu.pipeline_mode<synchronous>, transform_indices = @transform_2, window_bounds = array<i64: 1, 512>}, {pipeline_mode = #tpu.pipeline_mode<synchronous>, transform_indices = @transform_3, window_bounds = array<i64: 1, 512>}, {pipeline_mode = #tpu.pipeline_mode<synchronous>, transform_indices = @transform_4, window_bounds = array<i64: 512, 384>}, {pipeline_mode = #tpu.pipeline_mode<synchronous>, transform_indices = @transform_5, window_bounds = array<i64: 1, 384>}, {pipeline_mode = #tpu.pipeline_mode<synchronous>, transform_indices = @transform_6, window_bounds = array<i64: 384, 128>}, {pipeline_mode = #tpu.pipeline_mode<synchronous>, transform_indices = @transform_7, window_bounds = array<i64: 1, 128>}, {transform_indices = @transform_8, window_bounds = array<i64: 256, 128>}]} {
    %c0 = arith.constant 0 : index
    %c0_0 = arith.constant 0 : index
    %0 = vector.load %arg1[%c0, %c0_0] : memref<256x128xbf16, #tpu.memory_space<vmem>>, vector<256x128xbf16>
    %c0_1 = arith.constant 0 : index
    %c0_2 = arith.constant 0 : index
    %1 = vector.load %arg2[%c0_1, %c0_2] : memref<128x512xbf16, #tpu.memory_space<vmem>>, vector<128x512xbf16>
    %cst = arith.constant dense<0.000000e+00> : vector<256x512xf32>
    %2 = tpu.matmul %0, %1, %cst {dimension_numbers = #tpu.dot_dimension_numbers<[1], [0], [0], [1], [0, 0, 1, 1], [], []>} : vector<256x128xbf16>, vector<128x512xbf16>, vector<256x512xf32> -> vector<256x512xf32>
    %c0_3 = arith.constant 0 : index
    %c0_4 = arith.constant 0 : index
    %3 = vector.load %arg3[%c0_3, %c0_4] : memref<1x512xf32, #tpu.memory_space<vmem>>, vector<1x512xf32>
    %4 = vector.broadcast %3 : vector<1x512xf32> to vector<256x512xf32>
    %5 = arith.mulf %2, %4 : vector<256x512xf32>
    %c0_5 = arith.constant 0 : index
    %c0_6 = arith.constant 0 : index
    %6 = vector.load %arg4[%c0_5, %c0_6] : memref<1x512xf32, #tpu.memory_space<vmem>>, vector<1x512xf32>
    %7 = vector.broadcast %6 : vector<1x512xf32> to vector<256x512xf32>
    %8 = arith.addf %5, %7 : vector<256x512xf32>
    %cst_7 = arith.constant 0.000000e+00 : f32
    %9 = vector.broadcast %cst_7 : f32 to vector<256x512xf32>
    %10 = arith.maximumf %8, %9 : vector<256x512xf32>
    %11 = arith.truncf %10 : vector<256x512xf32> to vector<256x512xbf16>
    %c0_8 = arith.constant 0 : index
    %c0_9 = arith.constant 0 : index
    %12 = vector.load %arg5[%c0_8, %c0_9] : memref<512x384xbf16, #tpu.memory_space<vmem>>, vector<512x384xbf16>
    %cst_10 = arith.constant dense<0.000000e+00> : vector<256x384xf32>
    %13 = tpu.matmul %11, %12, %cst_10 {dimension_numbers = #tpu.dot_dimension_numbers<[1], [0], [0], [1], [0, 0, 1, 1], [], []>} : vector<256x512xbf16>, vector<512x384xbf16>, vector<256x384xf32> -> vector<256x384xf32>
    %c0_11 = arith.constant 0 : index
    %c0_12 = arith.constant 0 : index
    %14 = vector.load %arg6[%c0_11, %c0_12] : memref<1x384xf32, #tpu.memory_space<vmem>>, vector<1x384xf32>
    %15 = vector.broadcast %14 : vector<1x384xf32> to vector<256x384xf32>
    %16 = arith.addf %13, %15 : vector<256x384xf32>
    %cst_13 = arith.constant 0.000000e+00 : f32
    %17 = vector.broadcast %cst_13 : f32 to vector<256x384xf32>
    %18 = arith.maximumf %16, %17 : vector<256x384xf32>
    %19 = arith.truncf %18 : vector<256x384xf32> to vector<256x384xbf16>
    %c0_14 = arith.constant 0 : index
    %c0_15 = arith.constant 0 : index
    %20 = vector.load %arg7[%c0_14, %c0_15] : memref<384x128xbf16, #tpu.memory_space<vmem>>, vector<384x128xbf16>
    %cst_16 = arith.constant dense<0.000000e+00> : vector<256x128xf32>
    %21 = tpu.matmul %19, %20, %cst_16 {dimension_numbers = #tpu.dot_dimension_numbers<[1], [0], [0], [1], [0, 0, 1, 1], [], []>} : vector<256x384xbf16>, vector<384x128xbf16>, vector<256x128xf32> -> vector<256x128xf32>
    %c0_17 = arith.constant 0 : index
    %c0_18 = arith.constant 0 : index
    %22 = vector.load %arg8[%c0_17, %c0_18] : memref<1x128xf32, #tpu.memory_space<vmem>>, vector<1x128xf32>
    %23 = vector.broadcast %22 : vector<1x128xf32> to vector<256x128xf32>
    %24 = arith.addf %21, %23 : vector<256x128xf32>
    %25 = math.tanh %24 : vector<256x128xf32>
    %c0_19 = arith.constant 0 : index
    %c0_20 = arith.constant 0 : index
    %26 = vector.load %arg9[%c0_19, %c0_20] : memref<256x128xf32, #tpu.memory_space<vmem>>, vector<256x128xf32>
    tpu.vector_store %arg9[%c0_19, %c0_20], %25 {strides = array<i32>} : memref<256x128xf32, #tpu.memory_space<vmem>>, vector<256x128xf32>,
    return
  }
  func.func @transform_0(%arg0: i32) -> (i32, i32) {
    %c0_i32 = arith.constant 0 : i32
    %c0_i32_0 = arith.constant 0 : i32
    return %arg0, %c0_i32 : i32, i32
  }
  func.func @transform_1(%arg0: i32) -> (i32, i32) {
    %c0_i32 = arith.constant 0 : i32
    %c0_i32_0 = arith.constant 0 : i32
    %c0_i32_1 = arith.constant 0 : i32
    return %c0_i32, %c0_i32_0 : i32, i32
  }
  func.func @transform_2(%arg0: i32) -> (i32, i32) {
    %c0_i32 = arith.constant 0 : i32
    %c0_i32_0 = arith.constant 0 : i32
    %c0_i32_1 = arith.constant 0 : i32
    return %c0_i32, %c0_i32_0 : i32, i32
  }
  func.func @transform_3(%arg0: i32) -> (i32, i32) {
    %c0_i32 = arith.constant 0 : i32
    %c0_i32_0 = arith.constant 0 : i32
    %c0_i32_1 = arith.constant 0 : i32
    return %c0_i32, %c0_i32_0 : i32, i32
  }
  func.func @transform_4(%arg0: i32) -> (i32, i32) {
    %c0_i32 = arith.constant 0 : i32
    %c0_i32_0 = arith.constant 0 : i32
    %c0_i32_1 = arith.constant 0 : i32
    return %c0_i32, %c0_i32_0 : i32, i32
  }
  func.func @transform_5(%arg0: i32) -> (i32, i32) {
    %c0_i32 = arith.constant 0 : i32
    %c0_i32_0 = arith.constant 0 : i32
    %c0_i32_1 = arith.constant 0 : i32
    return %c0_i32, %c0_i32_0 : i32, i32
  }
  func.func @transform_6(%arg0: i32) -> (i32, i32) {
    %c0_i32 = arith.constant 0 : i32
    %c0_i32_0 = arith.constant 0 : i32
    %c0_i32_1 = arith.constant 0 : i32
    return %c0_i32, %c0_i32_0 : i32, i32
  }
  func.func @transform_7(%arg0: i32) -> (i32, i32) {
    %c0_i32 = arith.constant 0 : i32
    %c0_i32_0 = arith.constant 0 : i32
    %c0_i32_1 = arith.constant 0 : i32
    return %c0_i32, %c0_i32_0 : i32, i32
  }
  func.func @transform_8(%arg0: i32) -> (i32, i32) {
    %c0_i32 = arith.constant 0 : i32
    %c0_i32_0 = arith.constant 0 : i32
    return %arg0, %c0_i32 : i32, i32
  }
}

</mosaic_0001>

<bundles_post_ra>
// kernel: actor_forward.1
= control target key start
LH: loop header
LB: loop body
LE: loop exit
PB: predicated region body
PF: predicated region fallthrough
CT: control target
= control target key end

     0   :  { %s4605_s27 = smov 0   ;;  %s6535_s0 = inlined_call_operand.vmem [shape: bf16[512,128], index: 0, kind: input, shape index: {}]   ;;  %s6536_s1 = inlined_call_operand.vmem [shape: bf16[128,512], index: 1, kind: input, shape index: {}]   ;;  %s6537_s2 = inlined_call_operand.vmem [shape: f32[1,512], index: 2, kind: input, shape index: {}]   ;;  %s6538_s3 = inlined_call_operand.vmem [shape: f32[1,512], index: 3, kind: input, shape index: {}]   ;;  %s6539_s4 = inlined_call_operand.vmem [shape: bf16[512,384], index: 4, kind: input, shape index: {}]   ;;  %s6540_s5 = inlined_call_operand.vmem [shape: f32[1,384], index: 5, kind: input, shape index: {}]   ;;  %s6541_s6 = inlined_call_operand.vmem [shape: bf16[384,128], index: 6, kind: input, shape index: {}]   ;;  %s6542_s7 = inlined_call_operand.vmem [shape: f32[1,128], index: 7, kind: input, shape index: {}]   ;;  %s6543_s8 = inlined_call_operand.vmem [shape: f32[512,128], index: 8, kind: output, shape index: {}]  }
   0x1 LB: > { %s3658_s28 = sadd.s32 4294967295, %s4557_s27   ;;  %p3662_p0 = scmp.ge.s32.totalorder %s4557_s27, 1  ;;  %s4557_s27 = sphi %s4605_s27, %s18_s27  }
   0x2   : > { %p263_p1 = scmp.lt.s32.totalorder %s4557_s27, 3 }
   0x4   : > { %p264_p2 = pnand %p3662_p0, %p263_p1 }
   0x6   : > { %267 = sbr.rel (%p264_p2) target bundleno = 957 (0x3bd), region = 52 }
   0xb   : > { %v4271_v0 = vld [vmem:[%s6536_s1 + $0xe4] ss:$16 sps:$4 sm:$0xff]   ;;  %s3663_s9 = sshll.u32 %s3658_s28, 5  ;;  %v4273_v1 = vld [vmem:[%s6536_s1 + $0xe0] ss:$16 sps:$4 sm:$0xff]   ;;  %v4559_v2 = vmov 0  }
   0xc   : > { %662 = vmatprep.mubr.bf16.mxu0 %v4559_v2  ;;  %782 = vmatprep.mubr.bf16.mxu1 %v4559_v2  ;;  %p298_p3 = scmp.lt.s32.totalorder %s3663_s9, 63  ;;  %v4274_v3 = vld [vmem:[%s6536_s1 + $0xc4] ss:$16 sps:$4 sm:$0xff]   ;;  %v4276_v4 = vld [vmem:[%s6536_s1 + $0xc0] ss:$16 sps:$4 sm:$0xff]  }
   0xd   : > { %630 = vmatprep.subr.bf16.mxu0 %v4271_v0  ;;  %4246 = vmatprep.subr.bf16.mxu1 %v4271_v0  ;;  %v4277_v5 = vld [vmem:[%s6536_s1 + $0xa4] ss:$16 sps:$4 sm:$0xff]   ;;  %v4279_v6 = vld [vmem:[%s6536_s1 + $0xa0] ss:$16 sps:$4 sm:$0xff]   ;;  %v4299_v17 = vld [vmem:[%s6536_s1 + $0xec] ss:$16 sps:$4 sm:$0xff]  }
   0xe   : > { %631 = vmatpush1.bf16.msra.mxu0 %v4273_v1  ;;  %4254 = vmatpush1.bf16.msra.mxu1 %v4273_v1  ;;  %s6596_s9 = smov (!%p298_p3, %s3663_s9), 63  ;;  %v4280_v7 = vld [vmem:[%s6536_s1 + $0x84] ss:$16 sps:$4 sm:$0xff]   ;;  %v4282_v8 = vld [vmem:[%s6536_s1 + $0x80] ss:$16 sps:$4 sm:$0xff]  }
   0xf   : > { %632 = vmatprep.subr.bf16.mxu0 %v4274_v3  ;;  %4247 = vmatprep.subr.bf16.mxu1 %v4274_v3  ;;  %s3664_s18 = sshll.u32 %s6596_s9, 2  ;;  %v4283_v9 = vld [vmem:[%s6536_s1 + $0x64] ss:$16 sps:$4 sm:$0xff]   ;;  %v4285_v10 = vld [vmem:[%s6536_s1 + $0x60] ss:$16 sps:$4 sm:$0xff]   ;;  %s3666_s12 = sshll.u32 %s6596_s9, 3 }
  0x10   : > { %s4642_s25 = scalar_lea.vmem %s6535_s0, %s3664_s18  ;;  %v4286_v11 = vld [vmem:[%s6536_s1 + $0x44] ss:$16 sps:$4 sm:$0xff]   ;;  %v4288_v12 = vld [vmem:[%s6536_s1 + $0x40] ss:$16 sps:$4 sm:$0xff]   ;;  %v4297_v20 = vld [vmem:[%s6536_s1 + $0xe8] ss:$16 sps:$4 sm:$0xff]   ;;  %s6408_s15 = scalar_lea.vmem %s6543_s8, %s3666_s12 }
  0x11   : > { %v4289_v13 = vld [vmem:[%s6536_s1 + $0x24] ss:$16 sps:$4 sm:$0xff]   ;;  %v4291_v14 = vld [vmem:[%s6536_s1 + $0x20] ss:$16 sps:$4 sm:$0xff]   ;;  %v4302_v21 = vld [vmem:[%s6536_s1 + $0xcc] ss:$16 sps:$4 sm:$0xff]  }
  0x12   : > { %633 = vmatpush1.bf16.msra.mxu0 %v4276_v4  ;;  %4255 = vmatpush1.bf16.msra.mxu1 %v4276_v4  ;;  %v4292_v15 = vld [vmem:[%s6536_s1 + $0x4] ss:$16 sps:$4 sm:$0xff]   ;;  %v4294_v16 = vld [vmem:[%s6536_s1] ss:$16 sps:$4 sm:$0xff]   ;;  %v4300_v22 = vld [vmem:[%s6536_s1 + $0xc8] ss:$16 sps:$4 sm:$0xff]  }
  0x13   : > { %634 = vmatprep.subr.bf16.mxu0 %v4277_v5  ;;  %4248 = vmatprep.subr.bf16.mxu1 %v4277_v5  ;;  %v4675_v18 = vld [vmem:[%s4642_s25] sm:$0xff]   ;;  %v4307_v23 = vld [vmem:[%s6536_s1 + $0xac] ss:$16 sps:$4 sm:$0xff]   ;;  %v4305_v26 = vld [vmem:[%s6536_s1 + $0xa8] ss:$16 sps:$4 sm:$0xff]  }
  0x14   : > { %v4678_v19 = vld [vmem:[%s4642_s25 + $0x60] sm:$0xff]   ;;  %v4697_v24 = vld [vmem:[%s4642_s25 + $0x8] sm:$0xff]   ;;  %v4725_v32 = vld [vmem:[%s4642_s25 + $0x10] sm:$0xff]  }
  0x15   : > { %v4700_v25 = vld [vmem:[%s4642_s25 + $0x68] sm:$0xff]   ;;  %v4728_v33 = vld [vmem:[%s4642_s25 + $0x70] sm:$0xff]   ;;  %v4753_v40 = vld [vmem:[%s4642_s25 + $0x18] sm:$0xff]  }
  0x16   : > { %635 = vmatpush1.bf16.msra.mxu0 %v4279_v6  ;;  %4256 = vmatpush1.bf16.msra.mxu1 %v4279_v6  ;;  %v4310_v27 = vld [vmem:[%s6536_s1 + $0x8c] ss:$16 sps:$4 sm:$0xff]   ;;  %v4308_v28 = vld [vmem:[%s6536_s1 + $0x88] ss:$16 sps:$4 sm:$0xff]   ;;  %v4355_v39 = vld [vmem:[%s6539_s4 + $0x94] ss:$12 sps:$4 sm:$0xff]  }
  0x17   : > { %636 = vmatprep.subr.bf16.mxu0 %v4280_v7  ;;  %4249 = vmatprep.subr.bf16.mxu1 %v4280_v7  ;;  %v4315_v29 = vld [vmem:[%s6536_s1 + $0x6c] ss:$16 sps:$4 sm:$0xff]   ;;  %v4347_v30 = vld [vmem:[%s6539_s4 + $0xa8] ss:$12 sps:$4 sm:$0xff]   ;;  %v4356_v45 = vld [vmem:[%s6539_s4 + $0x78] ss:$12 sps:$4 sm:$0xff]  }
  0x18   : > { %v4349_v31 = vld [vmem:[%s6539_s4 + $0xac] ss:$12 sps:$4 sm:$0xff]   ;;  %v4353_v38 = vld [vmem:[%s6539_s4 + $0x90] ss:$12 sps:$4 sm:$0xff]   ;;  %v4784_v49 = vld [vmem:[%s4642_s25 + $0x20] sm:$0xff]  }
  0x19   : > { %v4313_v34 = vld [vmem:[%s6536_s1 + $0x68] ss:$16 sps:$4 sm:$0xff]   ;;  %v4318_v35 = vld [vmem:[%s6536_s1 + $0x4c] ss:$16 sps:$4 sm:$0xff]   ;;  %v4364_v47 = vld [vmem:[%s6539_s4 + $0x64] ss:$12 sps:$4 sm:$0xff]  }
  0x1a   : > { %637 = vmatpush1.bf16.msra.mxu0 %v4282_v8  ;;  %4257 = vmatpush1.bf16.msra.mxu1 %v4282_v8  ;;  %v4316_v36 = vld [vmem:[%s6536_s1 + $0x48] ss:$16 sps:$4 sm:$0xff]   ;;  %v4323_v37 = vld [vmem:[%s6536_s1 + $0x2c] ss:$16 sps:$4 sm:$0xff]   ;;  %v4340_v52 = vld [vmem:[%s6539_s4 + $0x214] ss:$12 sps:$4 sm:$0xff]  }
  0x1b   : > { %638 = vmatprep.subr.bf16.mxu0 %v4283_v9  ;;  %4250 = vmatprep.subr.bf16.mxu1 %v4283_v9  ;;  %v4756_v41 = vld [vmem:[%s4642_s25 + $0x78] sm:$0xff]   ;;  %v4335_v50 = vld [vmem:[%s6539_s4 + $0x228] ss:$12 sps:$4 sm:$0xff]   ;;  %v4362_v51 = vld [vmem:[%s6539_s4 + $0x60] ss:$12 sps:$4 sm:$0xff]  }
  0x1c   : > { %v4321_v42 = vld [vmem:[%s6536_s1 + $0x28] ss:$16 sps:$4 sm:$0xff]   ;;  %v4326_v43 = vld [vmem:[%s6536_s1 + $0xc] ss:$16 sps:$4 sm:$0xff]   ;;  %v4373_v57 = vld [vmem:[%s6539_s4 + $0x34] ss:$12 sps:$4 sm:$0xff]  }
  0x1d   : > { %v4358_v44 = vld [vmem:[%s6539_s4 + $0x7c] ss:$12 sps:$4 sm:$0xff]   ;;  %v4337_v48 = vld [vmem:[%s6539_s4 + $0x22c] ss:$12 sps:$4 sm:$0xff]   ;;  %v4346_v61 = vld [vmem:[%s6539_s4 + $0x1e4] ss:$12 sps:$4 sm:$0xff]  }
  0x1e   : > { %639 = vmatpush1.bf16.msra.mxu0 %v4285_v10  ;;  %4258 = vmatpush1.bf16.msra.mxu1 %v4285_v10  ;;  %v4324_v46 = vld [vmem:[%s6536_s1 + $0x8] ss:$16 sps:$4 sm:$0xff]   ;;  %v4338_v54 = vld [vmem:[%s6539_s4 + $0x210] ss:$12 sps:$4 sm:$0xff]   ;;  %v4344_v63 = vld [vmem:[%s6539_s4 + $0x1e0] ss:$12 sps:$4 sm:$0xff]  }
  0x1f   : > { %640 = vmatprep.subr.bf16.mxu0 %v4286_v11  ;;  %4251 = vmatprep.subr.bf16.mxu1 %v4286_v11  ;;  %v4367_v53 = vld [vmem:[%s6539_s4 + $0x4c] ss:$12 sps:$4 sm:$0xff]   ;;  %v4365_v55 = vld [vmem:[%s6539_s4 + $0x48] ss:$12 sps:$4 sm:$0xff]   ;;  %v4371_v60 = vld [vmem:[%s6539_s4 + $0x30] ss:$12 sps:$4 sm:$0xff]  }
  0x20   : > { %v4343_v56 = vld [vmem:[%s6539_s4 + $0x1fc] ss:$12 sps:$4 sm:$0xff]   ;;  %v4341_v59 = vld [vmem:[%s6539_s4 + $0x1f8] ss:$12 sps:$4 sm:$0xff]   ;;  %v4846_v4 = vld [vmem:[%s4642_s25 + $0x30] sm:$0xff]  }
  0x21   : > { %v4815_v58 = vld [vmem:[%s4642_s25 + $0x28] sm:$0xff]   ;;  %v4374_v0 = vld [vmem:[%s6539_s4 + $0x18] ss:$12 sps:$4 sm:$0xff]   ;;  %v4361_v7 = vld [vmem:[%s6539_s4 + $0x1b4] ss:$12 sps:$4 sm:$0xff]  }
  0x22   : > { %641 = vmatpush1.bf16.msra.mxu0 %v4288_v12  ;;  %4259 = vmatpush1.bf16.msra.mxu1 %v4288_v12  ;;  %v4376_v62 = vld [vmem:[%s6539_s4 + $0x1c] ss:$12 sps:$4 sm:$0xff]   ;;  %v4352_v1 = vld [vmem:[%s6539_s4 + $0x1cc] ss:$12 sps:$4 sm:$0xff]   ;;  %v4382_v3 = vld [vmem:[%s6539_s4 + $0x4] ss:$12 sps:$4 sm:$0xff]  }
  0x23   : > { %642 = vmatprep.subr.bf16.mxu0 %v4289_v13  ;;  %4252 = vmatprep.subr.bf16.mxu1 %v4289_v13  ;;  %v4350_v5 = vld [vmem:[%s6539_s4 + $0x1c8] ss:$12 sps:$4 sm:$0xff]   ;;  %v4380_v6 = vld [vmem:[%s6539_s4] ss:$12 sps:$4 sm:$0xff]   ;;  %v4359_v9 = vld [vmem:[%s6539_s4 + $0x1b0] ss:$12 sps:$4 sm:$0xff]  }
  0x24   : > { %v4385_v8 = vld [vmem:[%s6539_s4 + $0x16c] ss:$12 sps:$4 sm:$0xff]   ;;  %v4383_v10 = vld [vmem:[%s6539_s4 + $0x168] ss:$12 sps:$4 sm:$0xff]  }
  0x25   : > { %v4370_v11 = vld [vmem:[%s6539_s4 + $0x19c] ss:$12 sps:$4 sm:$0xff]   ;;  %v4391_v12 = vld [vmem:[%s6539_s4 + $0x154] ss:$12 sps:$4 sm:$0xff]  }
  0x26   : > { %643 = vmatpush1.bf16.msra.mxu0 %v4291_v14  ;;  %4260 = vmatpush1.bf16.msra.mxu1 %v4291_v14  ;;  %v4877_v13 = vld [vmem:[%s4642_s25 + $0x38] sm:$0xff]  }
  0x27   : > { %644 = vmatprep.subr.bf16.mxu0 %v4292_v15  ;;  %4253 = vmatprep.subr.bf16.mxu1 %v4292_v15  ;;  %v4368_v14 = vld [vmem:[%s6539_s4 + $0x198] ss:$12 sps:$4 sm:$0xff]   ;;  %v4389_v15 = vld [vmem:[%s6539_s4 + $0x150] ss:$12 sps:$4 sm:$0xff]  }
  0x2a   : > { %645 = vmatpush1.bf16.msra.mxu0 %v4294_v16  ;;  %4261 = vmatpush1.bf16.msra.mxu1 %v4294_v16  ;;  %v4379_v16 = vld [vmem:[%s6539_s4 + $0x184] ss:$12 sps:$4 sm:$0xff]  }
  0x2b   : > { %823 = vmatprep.subr.bf16.mxu1 %v4299_v17  ;;  %2165 = vmatprep.subr.bf16.mxu0 %v4349_v31  ;;  %v4394_v17 = vld [vmem:[%s6539_s4 + $0x13c] ss:$12 sps:$4 sm:$0xff]  }
  0x2c   : > { %v4332_v31 = vld [vmem:[%s4642_s25 + $0x48] sm:$0xff]  }
  0x2d   : > { %663 = vmatmul.mubr.bf16.vlgmr.msra.gmra.mxu0 %v4675_v18  ;;  %783 = vmatmul.mubr.bf16.vlgmr.msra.gmra.mxu1 %v4678_v19 }
  0x2e   : > { %824 = vmatpush1.bf16.msra.mxu1 %v4297_v20  ;;  %672 = vmatprep.mubr.bf16.mxu0 %v4559_v2  ;;  %v4392_v20 = vld [vmem:[%s6539_s4 + $0x138] ss:$12 sps:$4 sm:$0xff]  }
  0x2f   : > { %825 = vmatprep.subr.bf16.mxu1 %v4302_v21  ;;  %792 = vmatprep.mubr.bf16.mxu1 %v4559_v2  ;;  %v4388_v21 = vld [vmem:[%s6539_s4 + $0x2ec] ss:$12 sps:$4 sm:$0xff]  }
  0x30   : > { %2166 = vmatpush1.bf16.msra.mxu0 %v4347_v30  ;;  %v4401_v30 = vld [vmem:[%s6539_s4 + $0x108] ss:$12 sps:$4 sm:$0xff]  }
  0x31   : > { %2167 = vmatprep.subr.bf16.mxu0 %v4355_v39  ;;  %v4333_v39 = vld [vmem:[%s4642_s25 + $0x50] sm:$0xff]  }
  0x32   : > { %826 = vmatpush1.bf16.msra.mxu1 %v4300_v22  ;;  %v4905_v22 = vld [vmem:[%s4642_s25 + $0x40] sm:$0xff]  }
  0x33   : > { %827 = vmatprep.subr.bf16.mxu1 %v4307_v23  ;;  %v4400_v23 = vld [vmem:[%s6539_s4 + $0x124] ss:$12 sps:$4 sm:$0xff]  }
  0x34   : > { %2168 = vmatpush1.bf16.msra.mxu0 %v4353_v38  ;;  %v4410_v38 = vld [vmem:[%s6539_s4 + $0xd8] ss:$12 sps:$4 sm:$0xff]  }
  0x35   : > { %673 = vmatmul.mubr.bf16.gmra.mxu0 %v4697_v24  ;;  %793 = vmatmul.mubr.bf16.gmra.mxu1 %v4700_v25 }
  0x36   : > { %828 = vmatpush1.bf16.msra.mxu1 %v4305_v26  ;;  %682 = vmatprep.mubr.bf16.mxu0 %v4559_v2  ;;  %v4398_v26 = vld [vmem:[%s6539_s4 + $0x120] ss:$12 sps:$4 sm:$0xff]  }
  0x37   : > { %829 = vmatprep.subr.bf16.mxu1 %v4310_v27  ;;  %802 = vmatprep.mubr.bf16.mxu1 %v4559_v2  ;;  %v4397_v27 = vld [vmem:[%s6539_s4 + $0x2d4] ss:$12 sps:$4 sm:$0xff]  }
  0x38   : > { %2169 = vmatprep.subr.bf16.mxu0 %v4358_v44  ;;  %v4415_v44 = vld [vmem:[%s6539_s4 + $0x2a4] ss:$12 sps:$4 sm:$0xff]  }
  0x39   : > { %2170 = vmatpush1.bf16.msra.mxu0 %v4356_v45  ;;  %v4334_v45 = vld [vmem:[%s4642_s25 + $0x58] sm:$0xff]  }
  0x3a   : > { %830 = vmatpush1.bf16.msra.mxu1 %v4308_v28  ;;  %2171 = vmatprep.subr.bf16.mxu0 %v4364_v47  ;;  %v4403_v28 = vld [vmem:[%s6539_s4 + $0x10c] ss:$12 sps:$4 sm:$0xff]  }
  0x3b   : > { %831 = vmatprep.subr.bf16.mxu1 %v4315_v29  ;;  %v4395_v29 = vld [vmem:[%s6539_s4 + $0x2d0] ss:$12 sps:$4 sm:$0xff]   ;;  %v4421_v47 = vld [vmem:[%s6539_s4 + $0x28c] ss:$12 sps:$4 sm:$0xff]  }
  0x3d   : > { %683 = vmatmul.mubr.bf16.gmra.mxu0 %v4725_v32  ;;  %803 = vmatmul.mubr.bf16.gmra.mxu1 %v4728_v33 }
  0x3e   : > { %832 = vmatpush1.bf16.msra.mxu1 %v4313_v34  ;;  %692 = vmatprep.mubr.bf16.mxu0 %v4559_v2  ;;  %v4407_v34 = vld [vmem:[%s6539_s4 + $0xf0] ss:$12 sps:$4 sm:$0xff]  }
  0x3f   : > { %833 = vmatprep.subr.bf16.mxu1 %v4318_v35  ;;  %812 = vmatprep.mubr.bf16.mxu1 %v4559_v2  ;;  %v4404_v35 = vld [vmem:[%s6539_s4 + $0x2b8] ss:$12 sps:$4 sm:$0xff]  }
  0x40   : > { %2172 = vmatpush1.bf16.msra.mxu0 %v4362_v51  ;;  %v4427_v51 = vld [vmem:[%s6539_s4 + $0x25c] ss:$12 sps:$4 sm:$0xff]  }
  0x41   : > { %2173 = vmatprep.subr.bf16.mxu0 %v4367_v53  ;;  %v4428_v53 = vld [vmem:[%s6539_s4 + $0x240] ss:$12 sps:$4 sm:$0xff]  }
  0x42   : > { %834 = vmatpush1.bf16.msra.mxu1 %v4316_v36  ;;  %v4406_v36 = vld [vmem:[%s6539_s4 + $0x2bc] ss:$12 sps:$4 sm:$0xff]  }
  0x43   : > { %835 = vmatprep.subr.bf16.mxu1 %v4323_v37  ;;  %v4412_v37 = vld [vmem:[%s6539_s4 + $0xdc] ss:$12 sps:$4 sm:$0xff]  }
  0x44   : > { %2174 = vmatpush1.bf16.msra.mxu0 %v4365_v55  ;;  %v4433_v55 = vld [vmem:[%s6539_s4 + $0x2f0] ss:$12 sps:$4 sm:$0xff]  }
  0x45   : > { %693 = vmatmul.mubr.bf16.gmra.mxu0 %v4753_v40  ;;  %813 = vmatmul.mubr.bf16.gmra.mxu1 %v4756_v41 }
  0x46   : > { %836 = vmatpush1.bf16.msra.mxu1 %v4321_v42  ;;  %702 = vmatprep.mubr.bf16.mxu0 %v4559_v2  ;;  %v4416_v42 = vld [vmem:[%s6539_s4 + $0xc0] ss:$12 sps:$4 sm:$0xff]  }
  0x47   : > { %837 = vmatprep.subr.bf16.mxu1 %v4326_v43  ;;  %855 = vmatprep.mubr.bf16.mxu1 %v4559_v2  ;;  %v4413_v43 = vld [vmem:[%s6539_s4 + $0x2a0] ss:$12 sps:$4 sm:$0xff]  }
  0x48   : > { %2175 = vmatprep.subr.bf16.mxu0 %v4373_v57 }
  0x49   : > { %2176 = vmatpush1.bf16.msra.mxu0 %v4371_v60 }
  0x4a   : > { %838 = vmatpush1.bf16.msra.mxu1 %v4324_v46  ;;  %2177 = vmatprep.subr.bf16.mxu0 %v4376_v62  ;;  %v4419_v46 = vld [vmem:[%s6539_s4 + $0x288] ss:$12 sps:$4 sm:$0xff]  }
  0x4b   : > { %2358 = vmatprep.subr.bf16.mxu1 %v4337_v48  ;;  %v4422_v48 = vld [vmem:[%s6539_s4 + $0x270] ss:$12 sps:$4 sm:$0xff]  }
  0x4d   : > { %703 = vmatmul.mubr.bf16.gmra.mxu0 %v4784_v49  ;;  %856 = vmatmul.mubr.bf16.vlgmr.msra.gmra.mxu1 %v4675_v18  ;;  %v4377_v18 = vld [vmem:[%s6539_s4 + $0x180] ss:$12 sps:$4 sm:$0xff]  }
  0x4e   : > { %712 = vmatprep.mubr.bf16.mxu0 %v4559_v2  ;;  %865 = vmatprep.mubr.bf16.mxu1 %v4559_v2 }
  0x4f   : > { %2359 = vmatpush1.bf16.msra.mxu1 %v4335_v50  ;;  %2178 = vmatpush1.bf16.msra.mxu0 %v4374_v0  ;;  %v4425_v50 = vld [vmem:[%s6539_s4 + $0x258] ss:$12 sps:$4 sm:$0xff]  }
  0x50   : > { %2360 = vmatprep.subr.bf16.mxu1 %v4340_v52  ;;  %2179 = vmatprep.subr.bf16.mxu0 %v4382_v3  ;;  %v4430_v52 = vld [vmem:[%s6539_s4 + $0x244] ss:$12 sps:$4 sm:$0xff]  }
  0x53   : > { %2361 = vmatpush1.bf16.msra.mxu1 %v4338_v54  ;;  %2180 = vmatpush1.bf16.msra.mxu0 %v4380_v6  ;;  %v4431_v54 = vld [vmem:[%s6539_s4 + $0x170] ss:$12 sps:$4 sm:$0xff]  }
  0x54   : > { %2362 = vmatprep.subr.bf16.mxu1 %v4343_v56  ;;  %2181 = vmatprep.subr.bf16.mxu0 %v4385_v8  ;;  %v1018_v56 = vlaneseq }
  0x55   : > { %713 = vmatmul.mubr.bf16.gmra.mxu0 %v4815_v58  ;;  %866 = vmatmul.mubr.bf16.gmra.mxu1 %v4697_v24  ;;  %v4386_v24 = vld [vmem:[%s6539_s4 + $0x2e8] ss:$12 sps:$4 sm:$0xff]  }
  0x56   : > { %722 = vmatprep.mubr.bf16.mxu0 %v4559_v2  ;;  %875 = vmatprep.mubr.bf16.mxu1 %v4559_v2  ;;  %v5015_v57 = vshrl.u32 %v1018_v56, 7 }
  0x57   : > { %2363 = vmatpush1.bf16.msra.mxu1 %v4341_v59  ;;  %2182 = vmatpush2.bf16.msra.mxu0 %v4383_v10 }
  0x58   : > { %2364 = vmatprep.subr.bf16.mxu1 %v4346_v61  ;;  %2183 = vmatprep.subr.bf16.mxu0 %v4391_v12 }
  0x5b   : > { %2365 = vmatpush1.bf16.msra.mxu1 %v4344_v63  ;;  %2184 = vmatpush2.bf16.msra.mxu0 %v4389_v15 }
  0x5c   : > { %2366 = vmatprep.subr.bf16.mxu1 %v4352_v1  ;;  %2185 = vmatprep.subr.bf16.mxu0 %v4394_v17 }
  0x5d   : > { %723 = vmatmul.mubr.bf16.gmra.mxu0 %v4846_v4  ;;  %876 = vmatmul.mubr.bf16.gmra.mxu1 %v4725_v32  ;;  %v4409_v32 = vld [vmem:[%s6539_s4 + $0xf4] ss:$12 sps:$4 sm:$0xff]  }
  0x5e   : > { %732 = vmatprep.mubr.bf16.mxu0 %v4559_v2  ;;  %885 = vmatprep.mubr.bf16.mxu1 %v4559_v2 }
  0x5f   : > { %2367 = vmatpush1.bf16.msra.mxu1 %v4350_v5  ;;  %2186 = vmatpush2.bf16.msra.mxu0 %v4392_v20 }
  0x60   : > { %2368 = vmatprep.subr.bf16.mxu1 %v4361_v7  ;;  %2187 = vmatprep.subr.bf16.mxu0 %v4400_v23 }
  0x63   : > { %2369 = vmatpush1.bf16.msra.mxu1 %v4359_v9  ;;  %2188 = vmatpush2.bf16.msra.mxu0 %v4398_v26 }
  0x64   : > { %2370 = vmatprep.subr.bf16.mxu1 %v4370_v11  ;;  %2189 = vmatprep.subr.bf16.mxu0 %v4403_v28 }
  0x65   : > { %733 = vmatmul.mubr.bf16.gmra.mxu0 %v4877_v13  ;;  %886 = vmatmul.mubr.bf16.gmra.mxu1 %v4753_v40  ;;  %v4418_v40 = vld [vmem:[%s6539_s4 + $0xc4] ss:$12 sps:$4 sm:$0xff]  }
  0x66   : > { %742 = vmatprep.mubr.bf16.mxu0 %v4559_v2  ;;  %895 = vmatprep.mubr.bf16.mxu1 %v4559_v2 }
  0x67   : > { %2371 = vmatpush1.bf16.msra.mxu1 %v4368_v14  ;;  %2190 = vmatpush2.bf16.msra.mxu0 %v4401_v30 }
  0x68   : > { %2372 = vmatprep.subr.bf16.mxu1 %v4379_v16  ;;  %2191 = vmatprep.subr.bf16.mxu0 %v4409_v32 }
  0x6b   : > { %2373 = vmatpush1.bf16.msra.mxu1 %v4377_v18  ;;  %2192 = vmatpush2.bf16.msra.mxu0 %v4407_v34 }
  0x6c   : > { %2374 = vmatprep.subr.bf16.mxu1 %v4388_v21  ;;  %2193 = vmatprep.subr.bf16.mxu0 %v4412_v37 }
  0x6d   : > { %743 = vmatmul.mubr.bf16.gmra.mxu0 %v4905_v22  ;;  %896 = vmatmul.mubr.bf16.gmra.mxu1 %v4784_v49  ;;  %v4424_v49 = vld [vmem:[%s6539_s4 + $0x274] ss:$12 sps:$4 sm:$0xff]  }
  0x6e   : > { %752 = vmatprep.mubr.bf16.mxu0 %v4559_v2  ;;  %905 = vmatprep.mubr.bf16.mxu1 %v4559_v2 }
  0x6f   : > { %2375 = vmatpush2.bf16.msra.mxu1 %v4386_v24  ;;  %2194 = vmatpush2.bf16.msra.mxu0 %v4410_v38 }
  0x70   : > { %2376 = vmatprep.subr.bf16.mxu1 %v4397_v27  ;;  %2195 = vmatprep.subr.bf16.mxu0 %v4418_v40 }
  0x73   : > { %2377 = vmatpush2.bf16.msra.mxu1 %v4395_v29  ;;  %2196 = vmatpush2.bf16.msra.mxu0 %v4416_v42 }
  0x74   : > { %2378 = vmatprep.subr.bf16.mxu1 %v4406_v36  ;;  %3838 = vmatprep.subr.bf16.mxu0 %v4431_v54 }
  0x75   : > { %753 = vmatmul.mubr.bf16.gmra.mxu0 %v4332_v31  ;;  %906 = vmatmul.mubr.bf16.gmra.mxu1 %v4815_v58  ;;  %v5018_v58 = vsub.s32 0, %v5015_v57 }
  0x76   : > { %762 = vmatprep.mubr.bf16.mxu0 %v4559_v2  ;;  %915 = vmatprep.mubr.bf16.mxu1 %v4559_v2 }
  0x77   : > { %2379 = vmatpush2.bf16.msra.mxu1 %v4404_v35  ;;  %6561 = vst [vmem:[#allocation2_spill] sm:$0xff] %v5018_v58 }
  0x78   : > { %2380 = vmatprep.subr.bf16.mxu1 %v4415_v44 }
  0x7b   : > { %2381 = vmatpush2.bf16.msra.mxu1 %v4413_v43 }
  0x7c   : > { %2382 = vmatprep.subr.bf16.mxu1 %v4421_v47  ;;  %v4432_v47 = vld [vmem:[%s6539_s4 + $0xb0] ss:$12 sps:$4 sm:$0xff]  }
  0x7d   : > { %763 = vmatmul.mubr.bf16.gmra.mxu0 %v4333_v39  ;;  %916 = vmatmul.mubr.bf16.gmra.mxu1 %v4846_v4 }
  0x7e   : > { %772 = vmatprep.mubr.bf16.mxu0 %v4559_v2  ;;  %925 = vmatprep.mubr.bf16.mxu1 %v4559_v2 }
  0x7f   : > { %2383 = vmatpush2.bf16.msra.mxu1 %v4419_v46 }
  0x80   : > { %2384 = vmatprep.subr.bf16.mxu1 %v4424_v49 }
  0x83   : > { %2385 = vmatpush2.bf16.msra.mxu1 %v4422_v48 }
  0x84   : > { %2386 = vmatprep.subr.bf16.mxu1 %v4427_v51  ;;  %v4435_v51 = vld [vmem:[%s6539_s4 + $0x158] ss:$12 sps:$4 sm:$0xff]  }
  0x85   : > { %773 = vmatmul.mubr.bf16.gmra.mxu0 %v4334_v45  ;;  %926 = vmatmul.mubr.bf16.gmra.mxu1 %v4877_v13 }
  0x86   : > { %935 = vmatprep.mubr.bf16.mxu1 %v4559_v2 }
  0x87   : > { %2387 = vmatpush2.bf16.msra.mxu1 %v4425_v50 }
  0x88   : > { %2388 = vmatprep.subr.bf16.mxu1 %v4430_v52 }
  0x8b   : > { %2389 = vmatpush2.bf16.msra.mxu1 %v4428_v53 }
  0x8c   : > { %3950 = vmatprep.subr.bf16.mxu1 %v4433_v55 }
  0x8d   : > { %936 = vmatmul.mubr.bf16.gmra.mxu1 %v4905_v22 }
  0x8e   : > { %945 = vmatprep.mubr.bf16.mxu1 %v4559_v2 }
  0x95   : > { %946 = vmatmul.mubr.bf16.gmra.mxu1 %v4332_v31 }
  0x96   : > { %955 = vmatprep.mubr.bf16.mxu1 %v4559_v2 }
  0x9d   : > { %956 = vmatmul.mubr.bf16.gmra.mxu1 %v4333_v39 }
  0x9e   : > { %965 = vmatprep.mubr.bf16.mxu1 %v4559_v2 }
  0xa5   : > { %966 = vmatmul.mubr.bf16.gmra.mxu1 %v4334_v45 }
  0xa6   : > { %975 = vmatprep.mubr.bf16.mxu1 %v4559_v2 }
  0xad   : > { %976 = vmatmul.mubr.bf16.gmra.mxu1 %v4678_v19  ;;  %v5023_v19 = vld [vmem:[%s6537_s2] sm:$0xf] }
  0xae   : > { %985 = vmatprep.mubr.bf16.mxu1 %v4559_v2 }
  0xb5   : > { %986 = vmatmul.mubr.bf16.gmra.mxu1 %v4700_v25  ;;  %v5027_v25 = vrot.slane %v5023_v19, %v5018_v58 }
  0xb6   : > { %995 = vmatprep.mubr.bf16.mxu1 %v4559_v2 }
  0xbd   : > { %996 = vmatmul.mubr.bf16.gmra.mxu1 %v4728_v33  ;;  %v5030_v33 = vsub.s32 1, %v5015_v57 }
  0xbe   : > { %1005 = vmatprep.mubr.bf16.mxu1 %v4559_v2  ;;  %v5035_v2 = vld [vmem:[%s6538_s3] sm:$0xf] }
  0xbf   : > { %6562 = vst [vmem:[#allocation3_spill] sm:$0xff] %v5030_v33  ;;  %v5040_v61 = vrot.slane %v5035_v2, %v5018_v58  ;;  %v5045_v63 = vrot.slane %v5023_v19, %v5030_v33  ;;  %v5052_v4 = vrot.slane %v5035_v2, %v5030_v33 }
  0xc5   : > { %1006 = vmatmul.mubr.bf16.gmra.mxu1 %v4756_v41 }
  0xed   : > { %v664_v41 = vpop.f32.mrf.mxu0  ;;  %v784_v59 = vpop.f32.mrf.mxu1 }
  0xee   : > { %v1038_v60 = vmul.f32 %v5027_v25, %v664_v41  ;;  %v1134_v62 = vmul.f32 %v5027_v25, %v784_v59 }
  0xef   : > { %v666_v0 = vpop.f32.mrf.mxu0  ;;  %v5047_v1 = vpop.f32.mrf.mxu1 }
  0xf0   : > { %v1039_v3 = vmul.f32 %v5045_v63, %v666_v0  ;;  %v1188_v7 = vadd.f32 %v5040_v61, %v1038_v60  ;;  %v1284_v8 = vadd.f32 %v5040_v61, %v1134_v62 }
  0xf1   : > { %v668_v5 = vpop.f32.mrf.mxu0  ;;  %v788_v6 = vpop.f32.mrf.mxu1 }
  0xf2   : > { %v1189_v9 = vadd.f32 %v5052_v4, %v1039_v3  ;;  %v1042_v10 = vmul.f32 %v5027_v25, %v668_v5  ;;  %v1138_v11 = vmul.f32 %v5027_v25, %v788_v6  ;;  %v1316_v20 = vmax.f32 %v1188_v7, 0.0  ;;  %v4436_v6 = vld [vmem:[%s6539_s4 + $0x98] ss:$12 sps:$4 sm:$0xff]  }
  0xf3   : > { %v670_v12 = vpop.f32.mrf.mxu0  ;;  %v5059_v13 = vpop.f32.mrf.mxu1  ;;  %v1412_v21 = vmax.f32 %v1284_v8, 0.0 }
  0xf4   : > { %v1043_v14 = vmul.f32 %v5045_v63, %v670_v12  ;;  %v1192_v15 = vadd.f32 %v5040_v61, %v1042_v10  ;;  %v1288_v16 = vadd.f32 %v5040_v61, %v1138_v11  ;;  %v1317_v24 = vmax.f32 %v1189_v9, 0.0  ;;  %v4439_v9 = vld [vmem:[%s6539_s4 + $0x140] ss:$12 sps:$4 sm:$0xff]  }
  0xf5   : > { %v674_v17 = vpop.f32.mrf.mxu0  ;;  %v794_v18 = vpop.f32.mrf.mxu1 }
  0xf6   : > { %v1193_v22 = vadd.f32 %v5052_v4, %v1043_v14  ;;  %v1046_v23 = vmul.f32 %v5027_v25, %v674_v17  ;;  %v1320_v26 = vmax.f32 %v1192_v15, 0.0  ;;  %v1416_v27 = vmax.f32 %v1288_v16, 0.0 }
  0xf7   : > { %v1142_v28 = vmul.f32 %v5027_v25, %v794_v18  ;;  %v676_v29 = vpop.f32.mrf.mxu0  ;;  %v5067_v30 = vpop.f32.mrf.mxu1 }
  0xf8   : > { %v1321_v31 = vmax.f32 %v1193_v22, 0.0  ;;  %v1047_v32 = vmul.f32 %v5045_v63, %v676_v29  ;;  %v5070_v36 = vpack.c.bf16 %v1416_v27, %v1412_v21  ;;  %v5072_v37 = vpack.c.bf16 %v1320_v26, %v1316_v20 }
  0xf9   : > { %v678_v34 = vpop.f32.mrf.mxu0  ;;  %v798_v35 = vpop.f32.mrf.mxu1  ;;  %v1196_v38 = vadd.f32 %v5040_v61, %v1046_v23  ;;  %v1292_v42 = vadd.f32 %v5040_v61, %v1142_v28  ;;  %v4443_v28 = vld [vmem:[%s6539_s4 + $0x128] ss:$12 sps:$4 sm:$0xff]  }
  0xfa   : > { %v1050_v39 = vmul.f32 %v5027_v25, %v678_v34  ;;  %v1146_v40 = vmul.f32 %v5027_v25, %v798_v35  ;;  %v1197_v43 = vadd.f32 %v5052_v4, %v1047_v32  ;;  %v5081_v46 = vpack.c.bf16 %v1321_v31, %v1317_v24  ;;  %v4440_v24 = vld [vmem:[%s6539_s4 + $0x80] ss:$12 sps:$4 sm:$0xff]  }
  0xfb   : > { %v680_v44 = vpop.f32.mrf.mxu0  ;;  %v5079_v45 = vpop.f32.mrf.mxu1  ;;  %v1324_v54 = vmax.f32 %v1196_v38, 0.0  ;;  %v1420_v59 = vmax.f32 %v1292_v42, 0.0  ;;  %v5130_v35 = vsub.s32 2, %v5015_v57 }
  0xfc   : > { %v1200_v48 = vadd.f32 %v5040_v61, %v1050_v39  ;;  %v1296_v49 = vadd.f32 %v5040_v61, %v1146_v40  ;;  %v1051_v50 = vmul.f32 %v5045_v63, %v680_v44  ;;  %2197 = vmatprep.mubr.bf16.mxu0 %v5081_v46  ;;  %v1325_v60 = vmax.f32 %v1197_v43, 0.0 }
  0xfd   : > { %v684_v52 = vpop.f32.mrf.mxu0  ;;  %v804_v53 = vpop.f32.mrf.mxu1  ;;  %2198 = vmatmul.mubr.bf16.vlgmr.msra.gmra.mxu0 %v5072_v37  ;;  %6563 = vst [vmem:[#allocation4_spill] sm:$0xff] %v5130_v35 }
  0xfe   : > { %v1328_v55 = vmax.f32 %v1200_v48, 0.0  ;;  %v1424_v56 = vmax.f32 %v1296_v49, 0.0  ;;  %v1201_v41 = vadd.f32 %v5052_v4, %v1051_v50  ;;  %v1054_v62 = vmul.f32 %v5027_v25, %v684_v52  ;;  %3839 = vmatpush3.bf16.msra.mxu0 %v4432_v47  ;;  %v4444_v50 = vld [vmem:[%s6539_s4 + $0x68] ss:$12 sps:$4 sm:$0xff]   ;;  %v4447_v52 = vld [vmem:[%s6539_s4 + $0x110] ss:$12 sps:$4 sm:$0xff]  }
  0xff   : > { %v1150_v0 = vmul.f32 %v5027_v25, %v804_v53  ;;  %v686_v3 = vpop.f32.mrf.mxu0  ;;  %v5097_v5 = vpop.f32.mrf.mxu1  ;;  %3840 = vmatprep.subr.bf16.mxu0 %v4435_v51 }
 0x100   : > { %v1329_v7 = vmax.f32 %v1201_v41, 0.0  ;;  %v1055_v8 = vmul.f32 %v5045_v63, %v686_v3  ;;  %v1204_v10 = vadd.f32 %v5040_v61, %v1054_v62  ;;  %v5107_v14 = vpack.c.bf16 %v1424_v56, %v1420_v59 }
 0x101   : > { %v688_v11 = vpop.f32.mrf.mxu0  ;;  %v808_v12 = vpop.f32.mrf.mxu1  ;;  %v5111_v17 = vpack.c.bf16 %v1328_v55, %v1324_v54  ;;  %v1300_v18 = vadd.f32 %v5040_v61, %v1150_v0  ;;  %v1032_v56 = vsub.s32 3, %v5015_v57  ;;  %v5152_v62 = vrot.slane %v5023_v19, %v5130_v35 }
 0x102   : > { %v1058_v15 = vmul.f32 %v5027_v25, %v688_v11  ;;  %v1154_v16 = vmul.f32 %v5027_v25, %v808_v12  ;;  %v1205_v20 = vadd.f32 %v5052_v4, %v1055_v8  ;;  %v5117_v23 = vpack.c.bf16 %v1329_v7, %v1325_v60  ;;  %3841 = vmatpush3.bf16.msra.mxu0 %v4436_v6  ;;  %v4451_v12 = vld [vmem:[%s6539_s4 + $0xf8] ss:$12 sps:$4 sm:$0xff]  }
 0x103   : > { %v690_v21 = vpop.f32.mrf.mxu0  ;;  %v5115_v22 = vpop.f32.mrf.mxu1  ;;  %3842 = vmatprep.subr.bf16.mxu0 %v4439_v9  ;;  %v1332_v29 = vmax.f32 %v1204_v10, 0.0  ;;  %v1428_v43 = vmax.f32 %v1300_v18, 0.0  ;;  %v4448_v10 = vld [vmem:[%s6539_s4 + $0x50] ss:$12 sps:$4 sm:$0xff]  }
 0x104   : > { %v1208_v26 = vadd.f32 %v5040_v61, %v1058_v15  ;;  %v1304_v27 = vadd.f32 %v5040_v61, %v1154_v16  ;;  %v1059_v31 = vmul.f32 %v5045_v63, %v690_v21  ;;  %2207 = vmatprep.mubr.bf16.mxu0 %v5117_v23  ;;  %v1333_v44 = vmax.f32 %v1205_v20, 0.0 }
 0x105   : > { %v694_v32 = vpop.f32.mrf.mxu0  ;;  %v814_v34 = vpop.f32.mrf.mxu1  ;;  %2208 = vmatmul.mubr.bf16.gmra.mxu0 %v5111_v17  ;;  %v5175_v21 = vrot.slane %v5035_v2, %v5130_v35 }
 0x106   : > { %v1336_v38 = vmax.f32 %v1208_v26, 0.0  ;;  %v1432_v39 = vmax.f32 %v1304_v27, 0.0  ;;  %v1062_v40 = vmul.f32 %v5027_v25, %v694_v32  ;;  %v1158_v42 = vmul.f32 %v5027_v25, %v814_v34  ;;  %3843 = vmatpush3.bf16.msra.mxu0 %v4440_v24 }
 0x107   : > { %v1209_v47 = vadd.f32 %v5052_v4, %v1059_v31  ;;  %v696_v48 = vpop.f32.mrf.mxu0  ;;  %v5136_v49 = vpop.f32.mrf.mxu1  ;;  %3844 = vmatprep.subr.bf16.mxu0 %v4443_v28  ;;  %v5178_v24 = vrot.slane %v5023_v19, %v1032_v56  ;;  %v4452_v19 = vld [vmem:[%s6539_s4 + $0x38] ss:$12 sps:$4 sm:$0xff]  }
 0x108   : > { %v1063_v51 = vmul.f32 %v5045_v63, %v696_v48  ;;  %v5146_v41 = vpack.c.bf16 %v1432_v39, %v1428_v43  ;;  %v1212_v59 = vadd.f32 %v5040_v61, %v1062_v40  ;;  %v1308_v60 = vadd.f32 %v5040_v61, %v1158_v42 }
 0x109   : > { %v1337_v53 = vmax.f32 %v1209_v47, 0.0  ;;  %v698_v54 = vpop.f32.mrf.mxu0  ;;  %v818_v55 = vpop.f32.mrf.mxu1  ;;  %v5154_v0 = vpack.c.bf16 %v1336_v38, %v1332_v29  ;;  %v5188_v43 = vrot.slane %v5035_v2, %v1032_v56 }
 0x10a   : > { %v1213_v3 = vadd.f32 %v5052_v4, %v1063_v51  ;;  %v1066_v6 = vmul.f32 %v5027_v25, %v698_v54  ;;  %v1162_v7 = vmul.f32 %v5027_v25, %v818_v55  ;;  %3845 = vmatpush3.bf16.msra.mxu0 %v4444_v50  ;;  %v1340_v26 = vmax.f32 %v1212_v59, 0.0 }
 0x10b   : > { %v700_v8 = vpop.f32.mrf.mxu0  ;;  %v5159_v57 = vpop.f32.mrf.mxu1  ;;  %v5161_v9 = vpack.c.bf16 %v1337_v53, %v1333_v44  ;;  %3846 = vmatprep.subr.bf16.mxu0 %v4447_v52  ;;  %v1436_v27 = vmax.f32 %v1308_v60, 0.0  ;;  %v4455_v44 = vld [vmem:[%s6539_s4 + $0xe0] ss:$12 sps:$4 sm:$0xff]  }
 0x10c   : > { %v1067_v11 = vmul.f32 %v5045_v63, %v700_v8  ;;  %v1216_v15 = vadd.f32 %v5040_v61, %v1066_v6  ;;  %v1312_v16 = vadd.f32 %v5040_v61, %v1162_v7  ;;  %v1341_v31 = vmax.f32 %v1213_v3, 0.0  ;;  %v4456_v7 = vld [vmem:[%s6539_s4 + $0x20] ss:$12 sps:$4 sm:$0xff]  }
 0x10d   : > { %2217 = vmatprep.mubr.bf16.mxu0 %v5161_v9  ;;  %v704_v18 = vpop.f32.mrf.mxu0  ;;  %v857_v20 = vpop.f32.mrf.mxu1 }
 0x10e   : > { %v1217_v28 = vadd.f32 %v5052_v4, %v1067_v11  ;;  %v1070_v29 = vmul.f32 %v5027_v25, %v704_v18  ;;  %2218 = vmatmul.mubr.bf16.gmra.mxu0 %v5154_v0  ;;  %v1344_v32 = vmax.f32 %v1216_v15, 0.0  ;;  %v1440_v34 = vmax.f32 %v1312_v16, 0.0  ;;  %v4457_v15 = vld [vmem:[%s6539_s4 + $0xc8] ss:$12 sps:$4 sm:$0xff]  }
 0x10f   : > { %v1040_v38 = vmul.f32 %v5152_v62, %v857_v20  ;;  %v706_v39 = vpop.f32.mrf.mxu0  ;;  %v859_v40 = vpop.f32.mrf.mxu1  ;;  %3847 = vmatpush3.bf16.msra.mxu0 %v4448_v10 }
 0x110   : > { %v1345_v42 = vmax.f32 %v1217_v28, 0.0  ;;  %3848 = vmatprep.subr.bf16.mxu0 %v4451_v12  ;;  %v1220_v47 = vadd.f32 %v5040_v61, %v1070_v29  ;;  %v1071_v48 = vmul.f32 %v5045_v63, %v706_v39  ;;  %v1041_v50 = vmul.f32 %v5178_v24, %v859_v40  ;;  %v4458_v40 = vld [vmem:[%s6539_s4 + $0x8] ss:$12 sps:$4 sm:$0xff]  }
 0x111   : > { %v708_v51 = vpop.f32.mrf.mxu0  ;;  %v861_v52 = vpop.f32.mrf.mxu1  ;;  %v5196_v53 = vpack.c.bf16 %v1440_v34, %v1436_v27  ;;  %v5200_v55 = vpack.c.bf16 %v1344_v32, %v1340_v26  ;;  %v1190_v56 = vadd.f32 %v5175_v21, %v1040_v38 }
 0x112   : > { %v1074_v54 = vmul.f32 %v5027_v25, %v708_v51  ;;  %v1044_v2 = vmul.f32 %v5152_v62, %v861_v52  ;;  %v1221_v59 = vadd.f32 %v5052_v4, %v1071_v48  ;;  %v5204_v6 = vpack.c.bf16 %v1345_v42, %v1341_v31 }
 0x113   : > { %v710_v60 = vpop.f32.mrf.mxu0  ;;  %v863_v3 = vpop.f32.mrf.mxu1  ;;  %3849 = vmatpush3.bf16.msra.mxu0 %v4452_v19  ;;  %v1348_v16 = vmax.f32 %v1220_v47, 0.0  ;;  %v1191_v18 = vadd.f32 %v5188_v43, %v1041_v50  ;;  %v1318_v32 = vmax.f32 %v1190_v56, 0.0 }
 0x114   : > { %v1224_v8 = vadd.f32 %v5040_v61, %v1074_v54  ;;  %v1194_v10 = vadd.f32 %v5175_v21, %v1044_v2  ;;  %v1075_v11 = vmul.f32 %v5045_v63, %v710_v60  ;;  %v1045_v12 = vmul.f32 %v5178_v24, %v863_v3  ;;  %3850 = vmatprep.subr.bf16.mxu0 %v4455_v44 }
 0x115   : > { %2227 = vmatprep.mubr.bf16.mxu0 %v5204_v6  ;;  %v714_v20 = vpop.f32.mrf.mxu0  ;;  %v867_v26 = vpop.f32.mrf.mxu1  ;;  %v1349_v27 = vmax.f32 %v1221_v59, 0.0  ;;  %v1319_v48 = vmax.f32 %v1191_v18, 0.0 }
 0x116   : > { %v1352_v28 = vmax.f32 %v1224_v8, 0.0  ;;  %v1225_v29 = vadd.f32 %v5052_v4, %v1075_v11  ;;  %v1195_v31 = vadd.f32 %v5188_v43, %v1045_v12  ;;  %2228 = vmatmul.mubr.bf16.gmra.mxu0 %v5200_v55  ;;  %v1078_v34 = vmul.f32 %v5027_v25, %v714_v20  ;;  %v4434_v12 = vld [vmem:[%s6539_s4 + $0x230] ss:$12 sps:$4 sm:$0xff]  }
 0x117   : > { %v716_v38 = vpop.f32.mrf.mxu0  ;;  %v869_v39 = vpop.f32.mrf.mxu1  ;;  %3851 = vmatpush3.bf16.msra.mxu0 %v4456_v7  ;;  %v1322_v19 = vmax.f32 %v1194_v10, 0.0  ;;  %v1048_v51 = vmul.f32 %v5152_v62, %v867_v26  ;;  %v4437_v26 = vld [vmem:[%s6539_s4 + $0x2d8] ss:$12 sps:$4 sm:$0xff]  }
 0x118   : > { %v1353_v42 = vmax.f32 %v1225_v29, 0.0  ;;  %v1323_v44 = vmax.f32 %v1195_v31, 0.0  ;;  %v1079_v47 = vmul.f32 %v5045_v63, %v716_v38  ;;  %3852 = vmatprep.subr.bf16.mxu0 %v4457_v15  ;;  %v1228_v50 = vadd.f32 %v5040_v61, %v1078_v34 }
 0x119   : > { %v1049_v52 = vmul.f32 %v5178_v24, %v869_v39  ;;  %v718_v54 = vpop.f32.mrf.mxu0  ;;  %v871_v2 = vpop.f32.mrf.mxu1  ;;  %v5233_v3 = vpack.c.bf16 %v1352_v28, %v1348_v16  ;;  %v5241_v15 = vpack.c.bf16 %v1322_v19, %v1318_v32 }
 0x11a   : > { %v1082_v56 = vmul.f32 %v5027_v25, %v718_v54  ;;  %v1052_v59 = vmul.f32 %v5152_v62, %v871_v2  ;;  %v5231_v60 = vpack.c.bf16 %v1353_v42, %v1349_v27  ;;  %v1229_v7 = vadd.f32 %v5052_v4, %v1079_v47  ;;  %v4441_v2 = vld [vmem:[%s6539_s4 + $0x2c0] ss:$12 sps:$4 sm:$0xff]  }
 0x11b   : > { %v720_v8 = vpop.f32.mrf.mxu0  ;;  %v873_v10 = vpop.f32.mrf.mxu1  ;;  %v5236_v11 = vpack.c.bf16 %v1323_v44, %v1319_v48  ;;  %3853 = vmatpush3.bf16.msra.mxu0 %v4458_v40  ;;  %v1198_v27 = vadd.f32 %v5175_v21, %v1048_v51  ;;  %v1199_v28 = vadd.f32 %v5188_v43, %v1049_v52  ;;  %v1356_v34 = vmax.f32 %v1228_v50, 0.0  ;;  %v4438_v48 = vld [vmem:[%s6539_s4 + $0x218] ss:$12 sps:$4 sm:$0xff]  }
 0x11c   : > { %v1232_v18 = vadd.f32 %v5040_v61, %v1082_v56  ;;  %v1202_v20 = vadd.f32 %v5175_v21, %v1052_v59  ;;  %v1083_v16 = vmul.f32 %v5045_v63, %v720_v8  ;;  %2237 = vmatprep.mubr.bf16.mxu0 %v5231_v60  ;;  %v1053_v29 = vmul.f32 %v5178_v24, %v873_v10 }
 0x11d   : > { %2390 = vmatprep.mubr.bf16.mxu1 %v5236_v11  ;;  %v724_v31 = vpop.f32.mrf.mxu0  ;;  %v877_v32 = vpop.f32.mrf.mxu1  ;;  %v1357_v19 = vmax.f32 %v1229_v7, 0.0  ;;  %v1327_v56 = vmax.f32 %v1199_v28, 0.0 }
 0x11e   : > { %v1360_v38 = vmax.f32 %v1232_v18, 0.0  ;;  %v1233_v39 = vadd.f32 %v5052_v4, %v1083_v16  ;;  %v1086_v40 = vmul.f32 %v5027_v25, %v724_v31  ;;  %2238 = vmatmul.mubr.bf16.gmra.mxu0 %v5233_v3  ;;  %2391 = vmatmul.mubr.bf16.vlgmr.msra.gmra.mxu1 %v5241_v15  ;;  %v1203_v42 = vadd.f32 %v5188_v43, %v1053_v29 }
 0x11f   : > { %3951 = vmatpush3.bf16.msra.mxu1 %v4434_v12  ;;  %v726_v44 = vpop.f32.mrf.mxu0  ;;  %v879_v47 = vpop.f32.mrf.mxu1  ;;  %v1330_v50 = vmax.f32 %v1202_v20, 0.0  ;;  %v1056_v7 = vmul.f32 %v5152_v62, %v877_v32  ;;  %v1326_v12 = vmax.f32 %v1198_v27, 0.0  ;;  %v4442_v27 = vld [vmem:[%s6539_s4 + $0x200] ss:$12 sps:$4 sm:$0xff]  }
 0x120   : > { %v1361_v51 = vmax.f32 %v1233_v39, 0.0  ;;  %v1087_v52 = vmul.f32 %v5045_v63, %v726_v44  ;;  %v1057_v54 = vmul.f32 %v5178_v24, %v879_v47  ;;  %3952 = vmatprep.subr.bf16.mxu1 %v4437_v26  ;;  %v1331_v59 = vmax.f32 %v1203_v42, 0.0 }
 0x121   : > { %v728_v8 = vpop.f32.mrf.mxu0  ;;  %v881_v10 = vpop.f32.mrf.mxu1  ;;  %v1236_v18 = vadd.f32 %v5040_v61, %v1086_v40  ;;  %v5270_v16 = vpack.c.bf16 %v1360_v38, %v1356_v34  ;;  %v5284_v40 = vpack.c.bf16 %v1330_v50, %v1326_v12  ;;  %v1206_v42 = vadd.f32 %v5175_v21, %v1056_v7  ;;  %v4446_v12 = vld [vmem:[%s6539_s4 + $0x1e8] ss:$12 sps:$4 sm:$0xff]  }
 0x122   : > { %v1090_v20 = vmul.f32 %v5027_v25, %v728_v8  ;;  %v1237_v29 = vadd.f32 %v5052_v4, %v1087_v52  ;;  %v1060_v26 = vmul.f32 %v5152_v62, %v881_v10  ;;  %v5274_v44 = vpack.c.bf16 %v1361_v51, %v1357_v19  ;;  %v4445_v19 = vld [vmem:[%s6539_s4 + $0x2a8] ss:$12 sps:$4 sm:$0xff]  }
 0x123   : > { %v730_v31 = vpop.f32.mrf.mxu0  ;;  %v883_v39 = vpop.f32.mrf.mxu1  ;;  %v5276_v28 = vpack.c.bf16 %v1331_v59, %v1327_v56  ;;  %3953 = vmatpush3.bf16.msra.mxu1 %v4438_v48  ;;  %v1207_v32 = vadd.f32 %v5188_v43, %v1057_v54  ;;  %v1364_v54 = vmax.f32 %v1236_v18, 0.0  ;;  %v1334_v35 = vmax.f32 %v1206_v42, 0.0 }
 0x124   : > { %v1240_v34 = vadd.f32 %v5040_v61, %v1090_v20  ;;  %v1091_v38 = vmul.f32 %v5045_v63, %v730_v31  ;;  %3954 = vmatprep.subr.bf16.mxu1 %v4441_v2  ;;  %v1210_v47 = vadd.f32 %v5175_v21, %v1060_v26  ;;  %v1061_v48 = vmul.f32 %v5178_v24, %v883_v39  ;;  %v4449_v39 = vld [vmem:[%s6539_s4 + $0x290] ss:$12 sps:$4 sm:$0xff]  }
 0x125   : > { %2247 = vmatprep.mubr.bf16.mxu0 %v5274_v44  ;;  %2400 = vmatprep.mubr.bf16.mxu1 %v5276_v28  ;;  %v734_v51 = vpop.f32.mrf.mxu0  ;;  %v887_v52 = vpop.f32.mrf.mxu1  ;;  %v1365_v59 = vmax.f32 %v1237_v29, 0.0  ;;  %v1335_v18 = vmax.f32 %v1207_v32, 0.0 }
 0x126   : > { %v1368_v50 = vmax.f32 %v1240_v34, 0.0  ;;  %v1241_v2 = vadd.f32 %v5052_v4, %v1091_v38  ;;  %v1094_v56 = vmul.f32 %v5027_v25, %v734_v51  ;;  %2248 = vmatmul.mubr.bf16.gmra.mxu0 %v5270_v16  ;;  %2401 = vmatmul.mubr.bf16.gmra.mxu1 %v5284_v40  ;;  %v1211_v7 = vadd.f32 %v5188_v43, %v1061_v48 }
 0x127   : > { %v736_v8 = vpop.f32.mrf.mxu0  ;;  %v889_v10 = vpop.f32.mrf.mxu1  ;;  %3955 = vmatpush3.bf16.msra.mxu1 %v4442_v27  ;;  %v1338_v20 = vmax.f32 %v1210_v47, 0.0  ;;  %v1064_v38 = vmul.f32 %v5152_v62, %v887_v52  ;;  %v4450_v52 = vld [vmem:[%s6539_s4 + $0x1d0] ss:$12 sps:$4 sm:$0xff]  }
 0x128   : > { %v1369_v26 = vmax.f32 %v1241_v2, 0.0  ;;  %v1095_v31 = vmul.f32 %v5045_v63, %v736_v8  ;;  %3956 = vmatprep.subr.bf16.mxu1 %v4445_v19  ;;  %v1339_v29 = vmax.f32 %v1211_v7, 0.0  ;;  %v1244_v34 = vadd.f32 %v5040_v61, %v1094_v56 }
 0x129   : > { %v1065_v27 = vmul.f32 %v5178_v24, %v889_v10  ;;  %v738_v48 = vpop.f32.mrf.mxu0  ;;  %v891_v51 = vpop.f32.mrf.mxu1  ;;  %v5310_v47 = vpack.c.bf16 %v1368_v50, %v1364_v54  ;;  %v5324_v10 = vpack.c.bf16 %v1338_v20, %v1334_v35 }
 0x12a   : > { %v1098_v32 = vmul.f32 %v5027_v25, %v738_v48  ;;  %v1245_v19 = vadd.f32 %v5052_v4, %v1095_v31  ;;  %v1068_v2 = vmul.f32 %v5152_v62, %v891_v51  ;;  %v5314_v7 = vpack.c.bf16 %v1369_v26, %v1365_v59  ;;  %v4453_v59 = vld [vmem:[%s6539_s4 + $0x278] ss:$12 sps:$4 sm:$0xff]  }
 0x12b   : > { %6564 = vst [vmem:[#allocation5_spill] sm:$0xff] %v5310_v47  ;;  %v740_v8 = vpop.f32.mrf.mxu0  ;;  %v893_v58 = vpop.f32.mrf.mxu1  ;;  %v5316_v56 = vpack.c.bf16 %v1339_v29, %v1335_v18  ;;  %3957 = vmatpush3.bf16.msra.mxu1 %v4446_v12  ;;  %6566 = vst [vmem:[#allocation7_spill] sm:$0xff] %v5324_v10  ;;  %v1372_v18 = vmax.f32 %v1244_v34, 0.0  ;;  %v1214_v12 = vadd.f32 %v5175_v21, %v1064_v38  ;;  %v4454_v51 = vld [vmem:[%s6539_s4 + $0x1b8] ss:$12 sps:$4 sm:$0xff]  }
 0x12c   : > { %v1248_v42 = vadd.f32 %v5040_v61, %v1098_v32  ;;  %v1099_v54 = vmul.f32 %v5045_v63, %v740_v8  ;;  %v1069_v50 = vmul.f32 %v5178_v24, %v893_v58  ;;  %3958 = vmatprep.subr.bf16.mxu1 %v4449_v39  ;;  %v1215_v26 = vadd.f32 %v5188_v43, %v1065_v27 }
 0x12d   : > { %6565 = vst [vmem:[#allocation6_spill] sm:$0xff] %v5316_v56  ;;  %v1218_v31 = vadd.f32 %v5175_v21, %v1068_v2  ;;  %2257 = vmatprep.mubr.bf16.mxu0 %v5314_v7  ;;  %2410 = vmatprep.mubr.bf16.mxu1 %v5316_v56  ;;  %v744_v29 = vpop.f32.mrf.mxu0  ;;  %v897_v58 = vpop.f32.mrf.mxu1  ;;  %v1373_v34 = vmax.f32 %v1245_v19, 0.0 }
 0x12e   : > { %v1376_v35 = vmax.f32 %v1248_v42, 0.0  ;;  %v1249_v20 = vadd.f32 %v5052_v4, %v1099_v54  ;;  %v1219_v39 = vadd.f32 %v5188_v43, %v1069_v50  ;;  %v1102_v48 = vmul.f32 %v5027_v25, %v744_v29  ;;  %2258 = vmatmul.mubr.bf16.gmra.mxu0 %v5310_v47  ;;  %2411 = vmatmul.mubr.bf16.gmra.mxu1 %v5324_v10  ;;  %v4459_v54 = vld [vmem:[%s6539_s4 + $0x260] ss:$12 sps:$4 sm:$0xff]  }
 0x12f   : > { %v746_v38 = vpop.f32.mrf.mxu0  ;;  %v899_v27 = vpop.f32.mrf.mxu1  ;;  %3959 = vmatpush3.bf16.msra.mxu1 %v4450_v52  ;;  %v1346_v32 = vmax.f32 %v1218_v31, 0.0  ;;  %v1342_v50 = vmax.f32 %v1214_v12, 0.0  ;;  %v1343_v29 = vmax.f32 %v1215_v26, 0.0  ;;  %v1072_v19 = vmul.f32 %v5152_v62, %v897_v58  ;;  %v4460_v58 = vld [vmem:[%s6539_s4 + $0x1a0] ss:$12 sps:$4 sm:$0xff]  }
 0x130   : > { %v1377_v2 = vmax.f32 %v1249_v20, 0.0  ;;  %v1347_v8 = vmax.f32 %v1219_v39, 0.0  ;;  %v1103_v42 = vmul.f32 %v5045_v63, %v746_v38  ;;  %3960 = vmatprep.subr.bf16.mxu1 %v4453_v59  ;;  %v1073_v52 = vmul.f32 %v5178_v24, %v899_v27 }
 0x131   : > { %v748_v33 = vpop.f32.mrf.mxu0  ;;  %v901_v10 = vpop.f32.mrf.mxu1  ;;  %v1252_v47 = vadd.f32 %v5040_v61, %v1102_v48  ;;  %v5351_v39 = vpack.c.bf16 %v1376_v35, %v1372_v18  ;;  %v5364_v18 = vpack.c.bf16 %v1346_v32, %v1342_v50  ;;  %v4461_v35 = vld [vmem:[%s6539_s4 + $0x248] ss:$12 sps:$4 sm:$0xff]  }
 0x132   : > { %v1106_v31 = vmul.f32 %v5027_v25, %v748_v33  ;;  %v1076_v20 = vmul.f32 %v5152_v62, %v901_v10  ;;  %v1253_v59 = vadd.f32 %v5052_v4, %v1103_v42  ;;  %v5354_v12 = vpack.c.bf16 %v1377_v2, %v1373_v34 }
 0x133   : > { %6567 = vst [vmem:[#allocation8_spill] sm:$0xff] %v5351_v39  ;;  %v750_v38 = vpop.f32.mrf.mxu0  ;;  %v903_v56 = vpop.f32.mrf.mxu1  ;;  %v5356_v26 = vpack.c.bf16 %v1347_v8, %v1343_v29  ;;  %3961 = vmatpush3.bf16.msra.mxu1 %v4454_v51  ;;  %6570 = vst [vmem:[#allocation11_spill] sm:$0xff] %v5364_v18  ;;  %v1222_v34 = vadd.f32 %v5175_v21, %v1072_v19  ;;  %v1223_v27 = vadd.f32 %v5188_v43, %v1073_v52 }
 0x134   : > { %6568 = vst [vmem:[#allocation9_spill] sm:$0xff] %v5354_v12  ;;  %v1256_v48 = vadd.f32 %v5040_v61, %v1106_v31  ;;  %v1226_v33 = vadd.f32 %v5175_v21, %v1076_v20  ;;  %v1107_v10 = vmul.f32 %v5045_v63, %v750_v38  ;;  %3962 = vmatprep.subr.bf16.mxu1 %v4459_v54  ;;  %v1380_v42 = vmax.f32 %v1252_v47, 0.0  ;;  %v4462_v31 = vld [vmem:[%s6539_s4 + $0x188] ss:$12 sps:$4 sm:$0xff]  }
 0x135   : > { %6569 = vst [vmem:[#allocation10_spill] sm:$0xff] %v5356_v26  ;;  %v1077_v51 = vmul.f32 %v5178_v24, %v903_v56  ;;  %2267 = vmatprep.mubr.bf16.mxu0 %v5354_v12  ;;  %2420 = vmatprep.mubr.bf16.mxu1 %v5356_v26  ;;  %v754_v2 = vpop.f32.mrf.mxu0  ;;  %v907_v8 = vpop.f32.mrf.mxu1  ;;  %v1381_v29 = vmax.f32 %v1253_v59, 0.0 }
 0x136   : > { %v1384_v32 = vmax.f32 %v1256_v48, 0.0  ;;  %v1257_v54 = vadd.f32 %v5052_v4, %v1107_v10  ;;  %v1110_v50 = vmul.f32 %v5027_v25, %v754_v2  ;;  %2268 = vmatmul.mubr.bf16.gmra.mxu0 %v5351_v39  ;;  %2421 = vmatmul.mubr.bf16.gmra.mxu1 %v5364_v18  ;;  %v1354_v47 = vmax.f32 %v1226_v33, 0.0 }
 0x137   : > { %v1227_v19 = vadd.f32 %v5188_v43, %v1077_v51  ;;  %v756_v56 = vpop.f32.mrf.mxu0  ;;  %v909_v52 = vpop.f32.mrf.mxu1  ;;  %3963 = vmatpush3.bf16.msra.mxu1 %v4460_v58  ;;  %v1080_v38 = vmul.f32 %v5152_v62, %v907_v8  ;;  %v1351_v10 = vmax.f32 %v1223_v27, 0.0  ;;  %v1350_v58 = vmax.f32 %v1222_v34, 0.0 }
 0x138   : > { %v1385_v20 = vmax.f32 %v1257_v54, 0.0  ;;  %v1111_v48 = vmul.f32 %v5045_v63, %v756_v56  ;;  %3964 = vmatprep.subr.bf16.mxu1 %v4461_v35  ;;  %v1260_v59 = vadd.f32 %v5040_v61, %v1110_v50  ;;  %v1081_v51 = vmul.f32 %v5178_v24, %v909_v52 }
 0x139   : > { %v1355_v2 = vmax.f32 %v1227_v19, 0.0  ;;  %v758_v18 = vpop.f32.mrf.mxu0  ;;  %v911_v39 = vpop.f32.mrf.mxu1  ;;  %v5387_v12 = vpack.c.bf16 %v1384_v32, %v1380_v42  ;;  %v1230_v50 = vadd.f32 %v5175_v21, %v1080_v38 }
 0x13a   : > { %v1114_v26 = vmul.f32 %v5027_v25, %v758_v18  ;;  %v1261_v33 = vadd.f32 %v5052_v4, %v1111_v48  ;;  %v1084_v8 = vmul.f32 %v5152_v62, %v911_v39  ;;  %v5391_v35 = vpack.c.bf16 %v1385_v20, %v1381_v29 }
 0x13b   : > { %6571 = vst [vmem:[#allocation12_spill] sm:$0xff] %v5387_v12  ;;  %v760_v54 = vpop.f32.mrf.mxu0  ;;  %v913_v56 = vpop.f32.mrf.mxu1  ;;  %v5393_v27 = vpack.c.bf16 %v1355_v2, %v1351_v10  ;;  %3965 = vmatpush3.bf16.msra.mxu1 %v4462_v31  ;;  %v5398_v18 = vpack.c.bf16 %v1354_v47, %v1350_v58  ;;  %v1388_v42 = vmax.f32 %v1260_v59, 0.0  ;;  %v1231_v32 = vadd.f32 %v5188_v43, %v1081_v51 }
 0x13c   : > { %v1264_v19 = vadd.f32 %v5040_v61, %v1114_v26  ;;  %v1115_v34 = vmul.f32 %v5045_v63, %v760_v54  ;;  %v1234_v39 = vadd.f32 %v5175_v21, %v1084_v8  ;;  %v1085_v52 = vmul.f32 %v5178_v24, %v913_v56  ;;  %2277 = vmatprep.mubr.bf16.mxu0 %v5391_v35 }
 0x13d   : > { %6572 = vst [vmem:[#allocation13_spill] sm:$0xff] %v5393_v27  ;;  %6573 = vst [vmem:[#allocation14_spill] sm:$0xff] %v5398_v18  ;;  %2430 = vmatprep.mubr.bf16.mxu1 %v5393_v27  ;;  %v764_v29 = vpop.f32.mrf.mxu0  ;;  %v917_v31 = vpop.f32.mrf.mxu1  ;;  %v1389_v48 = vmax.f32 %v1261_v33, 0.0  ;;  %v1359_v54 = vmax.f32 %v1231_v32, 0.0 }
 0x13e   : > { %v1392_v20 = vmax.f32 %v1264_v19, 0.0  ;;  %v1265_v26 = vadd.f32 %v5052_v4, %v1115_v34  ;;  %v1118_v38 = vmul.f32 %v5027_v25, %v764_v29  ;;  %v1088_v47 = vmul.f32 %v5152_v62, %v917_v31  ;;  %2278 = vmatmul.mubr.bf16.gmra.mxu0 %v5387_v12  ;;  %2431 = vmatmul.mubr.bf16.gmra.mxu1 %v5398_v18 }
 0x13f   : > { %v1235_v10 = vadd.f32 %v5188_v43, %v1085_v52  ;;  %v766_v2 = vpop.f32.mrf.mxu0  ;;  %v919_v59 = vpop.f32.mrf.mxu1  ;;  %v1362_v51 = vmax.f32 %v1234_v39, 0.0  ;;  %v1358_v12 = vmax.f32 %v1230_v50, 0.0 }
 0x140   : > { %v1393_v58 = vmax.f32 %v1265_v26, 0.0  ;;  %v1119_v8 = vmul.f32 %v5045_v63, %v766_v2  ;;  %v1268_v19 = vadd.f32 %v5040_v61, %v1118_v38  ;;  %v1089_v34 = vmul.f32 %v5178_v24, %v919_v59 }
 0x141   : > { %v1363_v56 = vmax.f32 %v1235_v10, 0.0  ;;  %v768_v29 = vpop.f32.mrf.mxu0  ;;  %v921_v31 = vpop.f32.mrf.mxu1  ;;  %v1238_v18 = vadd.f32 %v5175_v21, %v1088_v47  ;;  %v5416_v52 = vpack.c.bf16 %v1392_v20, %v1388_v42  ;;  %v5427_v27 = vpack.c.bf16 %v1362_v51, %v1358_v12 }
 0x142   : > { %v1122_v33 = vmul.f32 %v5027_v25, %v768_v29  ;;  %v1269_v39 = vadd.f32 %v5052_v4, %v1119_v8  ;;  %v1092_v26 = vmul.f32 %v5152_v62, %v921_v31  ;;  %v5420_v10 = vpack.c.bf16 %v1393_v58, %v1389_v48 }
 0x143   : > { %6574 = vst [vmem:[#allocation15_spill] sm:$0xff] %v5416_v52  ;;  %v770_v2 = vpop.f32.mrf.mxu0  ;;  %v923_v32 = vpop.f32.mrf.mxu1  ;;  %v5422_v38 = vpack.c.bf16 %v1363_v56, %v1359_v54  ;;  %6576 = vst [vmem:[#allocation17_spill] sm:$0xff] %v5427_v27  ;;  %v1396_v42 = vmax.f32 %v1268_v19, 0.0  ;;  %v1239_v20 = vadd.f32 %v5188_v43, %v1089_v34  ;;  %v1139_v12 = vmul.f32 %v5045_v63, %v5059_v13 }
 0x144   : > { %v1272_v59 = vadd.f32 %v5040_v61, %v1122_v33  ;;  %v1123_v50 = vmul.f32 %v5045_v63, %v770_v2  ;;  %v1093_v47 = vmul.f32 %v5178_v24, %v923_v32  ;;  %v1242_v8 = vadd.f32 %v5175_v21, %v1092_v26  ;;  %2287 = vmatprep.mubr.bf16.mxu0 %v5420_v10 }
 0x145   : > { %6575 = vst [vmem:[#allocation16_spill] sm:$0xff] %v5422_v38  ;;  %2440 = vmatprep.mubr.bf16.mxu1 %v5422_v38  ;;  %v774_v48 = vpop.f32.mrf.mxu0  ;;  %v927_v58 = vpop.f32.mrf.mxu1  ;;  %v1366_v51 = vmax.f32 %v1238_v18, 0.0  ;;  %v1397_v19 = vmax.f32 %v1269_v39, 0.0 }
 0x146   : > { %v1400_v54 = vmax.f32 %v1272_v59, 0.0  ;;  %v1273_v56 = vadd.f32 %v5052_v4, %v1123_v50  ;;  %v1243_v29 = vadd.f32 %v5188_v43, %v1093_v47  ;;  %v1126_v31 = vmul.f32 %v5027_v25, %v774_v48  ;;  %2288 = vmatmul.mubr.bf16.gmra.mxu0 %v5416_v52  ;;  %2441 = vmatmul.mubr.bf16.gmra.mxu1 %v5427_v27 }
 0x147   : > { %v776_v34 = vpop.f32.mrf.mxu0  ;;  %v929_v33 = vpop.f32.mrf.mxu1  ;;  %v1370_v26 = vmax.f32 %v1242_v8, 0.0  ;;  %v1367_v50 = vmax.f32 %v1239_v20, 0.0  ;;  %v1096_v48 = vmul.f32 %v5152_v62, %v927_v58  ;;  %v1289_v20 = vadd.f32 %v5052_v4, %v1139_v12 }
 0x148   : > { %v1401_v2 = vmax.f32 %v1273_v56, 0.0  ;;  %v1371_v32 = vmax.f32 %v1243_v29, 0.0  ;;  %v1127_v59 = vmul.f32 %v5045_v63, %v776_v34  ;;  %v1276_v47 = vadd.f32 %v5040_v61, %v1126_v31 }
 0x149   : > { %v1097_v52 = vmul.f32 %v5178_v24, %v929_v33  ;;  %v778_v27 = vpop.f32.mrf.mxu0  ;;  %v931_v38 = vpop.f32.mrf.mxu1  ;;  %v5447_v8 = vpack.c.bf16 %v1400_v54, %v1396_v42  ;;  %v1135_v56 = vmul.f32 %v5045_v63, %v5047_v1 }
 0x14a   : > { %v1277_v13 = vadd.f32 %v5052_v4, %v1127_v59  ;;  %v1130_v18 = vmul.f32 %v5027_v25, %v778_v27  ;;  %v1100_v39 = vmul.f32 %v5152_v62, %v931_v38  ;;  %v5452_v58 = vpack.c.bf16 %v1401_v2, %v1397_v19 }
 0x14b   : > { %v780_v29 = vpop.f32.mrf.mxu0  ;;  %v933_v31 = vpop.f32.mrf.mxu1  ;;  %v5454_v34 = vpack.c.bf16 %v1371_v32, %v1367_v50  ;;  %v5459_v27 = vpack.c.bf16 %v1370_v26, %v1366_v51  ;;  %v1246_v38 = vadd.f32 %v5175_v21, %v1096_v48  ;;  %v1247_v1 = vadd.f32 %v5188_v43, %v1097_v52 }
 0x14c   : > { %v1280_v33 = vadd.f32 %v5040_v61, %v1130_v18  ;;  %v1250_v59 = vadd.f32 %v5175_v21, %v1100_v39  ;;  %v1131_v25 = vmul.f32 %v5045_v63, %v780_v29  ;;  %v1101_v42 = vmul.f32 %v5178_v24, %v933_v31  ;;  %2297 = vmatprep.mubr.bf16.mxu0 %v5452_v58 }
 0x14d   : > { %2450 = vmatprep.mubr.bf16.mxu1 %v5454_v34  ;;  %v937_v54 = vpop.f32.mrf.mxu1  ;;  %v1404_v12 = vmax.f32 %v1276_v47, 0.0  ;;  %v1405_v19 = vmax.f32 %v1277_v13, 0.0  ;;  %v1285_v51 = vadd.f32 %v5052_v4, %v1135_v56  ;;  %v1417_v32 = vmax.f32 %v1289_v20, 0.0 }
 0x14e   : > { %v1408_v61 = vmax.f32 %v1280_v33, 0.0  ;;  %v1281_v2 = vadd.f32 %v5052_v4, %v1131_v25  ;;  %2298 = vmatmul.mubr.bf16.gmra.mxu0 %v5447_v8  ;;  %2451 = vmatmul.mubr.bf16.gmra.mxu1 %v5459_v27  ;;  %v1251_v52 = vadd.f32 %v5188_v43, %v1101_v42  ;;  %v1378_v50 = vmax.f32 %v1250_v59, 0.0 }
 0x14f   : > { %v939_v26 = vpop.f32.mrf.mxu1  ;;  %v1147_v47 = vmul.f32 %v5045_v63, %v5079_v45  ;;  %v1374_v13 = vmax.f32 %v1246_v38, 0.0  ;;  %v1375_v39 = vmax.f32 %v1247_v1, 0.0  ;;  %v1104_v33 = vmul.f32 %v5152_v62, %v937_v54 }
 0x150   : > { %v1409_v48 = vmax.f32 %v1281_v2, 0.0  ;;  %v1105_v18 = vmul.f32 %v5178_v24, %v939_v26  ;;  %v1379_v29 = vmax.f32 %v1251_v52, 0.0  ;;  %v5478_v42 = vpack.c.bf16 %v1408_v61, %v1404_v12 }
 0x151   : > { %v941_v31 = vpop.f32.mrf.mxu1  ;;  %v1413_v20 = vmax.f32 %v1285_v51, 0.0  ;;  %v1143_v59 = vmul.f32 %v5045_v63, %v5067_v30  ;;  %v5488_v54 = vpack.c.bf16 %v1378_v50, %v1374_v13  ;;  %v1297_v12 = vadd.f32 %v5052_v4, %v1147_v47 }
 0x152   : > { %v1108_v25 = vmul.f32 %v5152_v62, %v941_v31  ;;  %v5476_v56 = vpack.c.bf16 %v1409_v48, %v1405_v19  ;;  %v5482_v26 = vpack.c.bf16 %v1379_v29, %v1375_v39  ;;  %v1255_v45 = vadd.f32 %v5188_v43, %v1105_v18 }
 0x153   : > { %v943_v2 = vpop.f32.mrf.mxu1  ;;  %v5492_v61 = vpack.c.bf16 %v1417_v32, %v1413_v20  ;;  %v1254_v30 = vadd.f32 %v5175_v21, %v1104_v33  ;;  %v1293_v52 = vadd.f32 %v5052_v4, %v1143_v59  ;;  %v1425_v32 = vmax.f32 %v1297_v12, 0.0 }
 0x154   : > { %v1258_v38 = vadd.f32 %v5175_v21, %v1108_v25  ;;  %v1109_v1 = vmul.f32 %v5178_v24, %v943_v2  ;;  %2307 = vmatprep.mubr.bf16.mxu0 %v5476_v56  ;;  %2460 = vmatprep.mubr.bf16.mxu1 %v5482_v26  ;;  %v1383_v48 = vmax.f32 %v1255_v45, 0.0  ;;  %v1155_v39 = vmul.f32 %v5045_v63, %v5115_v22 }
 0x155   : > { %v947_v19 = vpop.f32.mrf.mxu1  ;;  %v1382_v31 = vmax.f32 %v1254_v30, 0.0  ;;  %v1421_v59 = vmax.f32 %v1293_v52, 0.0  ;;  %v1151_v2 = vmul.f32 %v5045_v63, %v5097_v5 }
 0x156   : > { %v1259_v51 = vadd.f32 %v5188_v43, %v1109_v1  ;;  %2308 = vmatmul.mubr.bf16.gmra.mxu0 %v5478_v42  ;;  %2461 = vmatmul.mubr.bf16.gmra.mxu1 %v5488_v54  ;;  %v1386_v18 = vmax.f32 %v1258_v38, 0.0  ;;  %v1112_v33 = vmul.f32 %v5152_v62, %v947_v19  ;;  %v4463_v19 = vld [vmem:[%s6541_s6 + $0x78] sm:$0xff]   ;;  %v1305_v30 = vadd.f32 %v5052_v4, %v1155_v39 }
 0x157   : > { %2317 = vmatprep.mubr.bf16.mxu0 %v5492_v61  ;;  %v949_v50 = vpop.f32.mrf.mxu1  ;;  %v5519_v52 = vpack.c.bf16 %v1425_v32, %v1421_v59  ;;  %4062 = vmatprep.subr.bf16.mxu0 %v4463_v19 }
 0x158   : > { %v1387_v47 = vmax.f32 %v1259_v51, 0.0  ;;  %v1113_v13 = vmul.f32 %v5178_v24, %v949_v50  ;;  %v5509_v38 = vpack.c.bf16 %v1386_v18, %v1382_v31  ;;  %v1262_v5 = vadd.f32 %v5175_v21, %v1112_v33 }
 0x159   : > { %v951_v29 = vpop.f32.mrf.mxu1  ;;  %v1163_v31 = vmul.f32 %v5045_v63, %v5159_v57 }
 0x15a   : > { %v1116_v25 = vmul.f32 %v5152_v62, %v951_v29  ;;  %v5505_v20 = vpack.c.bf16 %v1387_v47, %v1383_v48  ;;  %v1263_v1 = vadd.f32 %v5188_v43, %v1113_v13  ;;  %v1301_v48 = vadd.f32 %v5052_v4, %v1151_v2 }
 0x15b   : > { %v953_v45 = vpop.f32.mrf.mxu1  ;;  %v1433_v29 = vmax.f32 %v1305_v30, 0.0 }
 0x15c   : > { %v1266_v12 = vadd.f32 %v5175_v21, %v1116_v25  ;;  %v1117_v22 = vmul.f32 %v5178_v24, %v953_v45  ;;  %2470 = vmatprep.mubr.bf16.mxu1 %v5505_v20  ;;  %v1391_v47 = vmax.f32 %v1263_v1, 0.0  ;;  %v1390_v25 = vmax.f32 %v1262_v5, 0.0 }
 0x15d   : > { %v957_v51 = vpop.f32.mrf.mxu1  ;;  %v1159_v1 = vmul.f32 %v5045_v63, %v5136_v49 }
 0x15e   : > { %v1267_v50 = vadd.f32 %v5188_v43, %v1117_v22  ;;  %2318 = vmatmul.mubr.bf16.gmra.mxu0 %v5070_v36  ;;  %2471 = vmatmul.mubr.bf16.gmra.mxu1 %v5509_v38  ;;  %v1394_v13 = vmax.f32 %v1266_v12, 0.0  ;;  %v1120_v59 = vmul.f32 %v5152_v62, %v957_v51  ;;  %v1429_v22 = vmax.f32 %v1301_v48, 0.0 }
 0x15f   : > { %2327 = vmatprep.mubr.bf16.mxu0 %v5519_v52  ;;  %v959_v18 = vpop.f32.mrf.mxu1  ;;  %v1313_v51 = vadd.f32 %v5052_v4, %v1163_v31  ;;  %v1309_v49 = vadd.f32 %v5052_v4, %v1159_v1 }
 0x160   : > { %v1395_v39 = vmax.f32 %v1267_v50, 0.0  ;;  %v1121_v32 = vmul.f32 %v5178_v24, %v959_v18  ;;  %v5536_v19 = vpack.c.bf16 %v1394_v13, %v1390_v25  ;;  %v5543_v18 = vpack.c.bf16 %v1433_v29, %v1429_v22 }
 0x161   : > { %v961_v33 = vpop.f32.mrf.mxu1  ;;  %v1270_v48 = vadd.f32 %v5175_v21, %v1120_v59  ;;  %v1441_v29 = vmax.f32 %v1313_v51, 0.0 }
 0x162   : > { %v1124_v45 = vmul.f32 %v5152_v62, %v961_v33  ;;  %v5532_v2 = vpack.c.bf16 %v1395_v39, %v1391_v47  ;;  %v1271_v30 = vadd.f32 %v5188_v43, %v1121_v32 }
 0x163   : > { %v963_v12 = vpop.f32.mrf.mxu1  ;;  %v1398_v25 = vmax.f32 %v1270_v48, 0.0 }
 0x164   : > { %v1274_v50 = vadd.f32 %v5175_v21, %v1124_v45  ;;  %v1125_v57 = vmul.f32 %v5178_v24, %v963_v12  ;;  %2480 = vmatprep.mubr.bf16.mxu1 %v5532_v2  ;;  %v1399_v13 = vmax.f32 %v1271_v30, 0.0  ;;  %v1437_v12 = vmax.f32 %v1309_v49, 0.0 }
 0x165   : > { %v967_v5 = vpop.f32.mrf.mxu1 }
 0x166   : > { %v1275_v63 = vadd.f32 %v5188_v43, %v1125_v57  ;;  %2328 = vmatmul.mubr.bf16.gmra.mxu0 %v5107_v14  ;;  %2481 = vmatmul.mubr.bf16.gmra.mxu1 %v5536_v19  ;;  %v1402_v39 = vmax.f32 %v1274_v50, 0.0  ;;  %v1128_v59 = vmul.f32 %v5152_v62, %v967_v5  ;;  %v5562_v48 = vpack.c.bf16 %v1441_v29, %v1437_v12 }
 0x167   : > { %2337 = vmatprep.mubr.bf16.mxu0 %v5543_v18  ;;  %v969_v47 = vpop.f32.mrf.mxu1 }
 0x168   : > { %v1403_v32 = vmax.f32 %v1275_v63, 0.0  ;;  %v1129_v31 = vmul.f32 %v5178_v24, %v969_v47  ;;  %v5556_v4 = vpack.c.bf16 %v1402_v39, %v1398_v25  ;;  %v1278_v5 = vadd.f32 %v5175_v21, %v1128_v59 }
 0x169   : > { %v971_v33 = vpop.f32.mrf.mxu1 }
 0x16a   : > { %v1132_v45 = vmul.f32 %v5152_v62, %v971_v33  ;;  %v5554_v22 = vpack.c.bf16 %v1403_v32, %v1399_v13  ;;  %v1279_v1 = vadd.f32 %v5188_v43, %v1129_v31  ;;  %v1406_v33 = vmax.f32 %v1278_v5, 0.0 }
 0x16b   : > { %v973_v57 = vpop.f32.mrf.mxu1 }
 0x16c   : > { %v1282_v30 = vadd.f32 %v5175_v21, %v1132_v45  ;;  %v1133_v50 = vmul.f32 %v5178_v24, %v973_v57  ;;  %2490 = vmatprep.mubr.bf16.mxu1 %v5554_v22  ;;  %v1407_v47 = vmax.f32 %v1279_v1, 0.0 }
 0x16d   : > { %v977_v51 = vpop.f32.mrf.mxu1 }
 0x16e   : > { %v1283_v63 = vadd.f32 %v5188_v43, %v1133_v50  ;;  %2338 = vmatmul.mubr.bf16.gmra.mxu0 %v5146_v41  ;;  %2491 = vmatmul.mubr.bf16.gmra.mxu1 %v5556_v4  ;;  %v1410_v13 = vmax.f32 %v1282_v30, 0.0  ;;  %v1136_v29 = vmul.f32 %v5152_v62, %v977_v51 }
 0x16f   : > { %2347 = vmatprep.mubr.bf16.mxu0 %v5562_v48  ;;  %v979_v49 = vpop.f32.mrf.mxu1 }
 0x170   : > { %v1411_v39 = vmax.f32 %v1283_v63, 0.0  ;;  %v1137_v32 = vmul.f32 %v5178_v24, %v979_v49  ;;  %v5574_v12 = vpack.c.bf16 %v1410_v13, %v1406_v33  ;;  %v1286_v5 = vadd.f32 %v5175_v21, %v1136_v29 }
 0x171   : > { %v981_v31 = vpop.f32.mrf.mxu1 }
 0x172   : > { %v1140_v25 = vmul.f32 %v5152_v62, %v981_v31  ;;  %v5572_v59 = vpack.c.bf16 %v1411_v39, %v1407_v47  ;;  %v1287_v57 = vadd.f32 %v5188_v43, %v1137_v32  ;;  %v1414_v33 = vmax.f32 %v1286_v5, 0.0 }
 0x173   : > { %v983_v45 = vpop.f32.mrf.mxu1 }
 0x174   : > { %v1290_v50 = vadd.f32 %v5175_v21, %v1140_v25  ;;  %v1141_v1 = vmul.f32 %v5178_v24, %v983_v45  ;;  %2500 = vmatprep.mubr.bf16.mxu1 %v5572_v59  ;;  %v1415_v49 = vmax.f32 %v1287_v57, 0.0 }
 0x175   : > { %v987_v30 = vpop.f32.mrf.mxu1 }
 0x176   : > { %v1291_v51 = vadd.f32 %v5188_v43, %v1141_v1  ;;  %2348 = vmatmul.mubr.bf16.gmra.mxu0 %v5196_v53  ;;  %2501 = vmatmul.mubr.bf16.gmra.mxu1 %v5574_v12  ;;  %v1418_v47 = vmax.f32 %v1290_v50, 0.0  ;;  %v1144_v32 = vmul.f32 %v5152_v62, %v987_v30  ;;  %v4464_v1 = vld [vmem:[%s6541_s6 + $0x38] sm:$0xff]   ;;  %v4465_v30 = vld [vmem:[%s6541_s6 + $0x70] sm:$0xff]  }
 0x177   : > { %2583 = vmatprep.mubr.bf16.mxu0 %v5081_v46  ;;  %v989_v63 = vpop.f32.mrf.mxu1 }
 0x178   : > { %v1419_v13 = vmax.f32 %v1291_v51, 0.0  ;;  %v1145_v39 = vmul.f32 %v5178_v24, %v989_v63  ;;  %v5593_v46 = vpack.c.bf16 %v1418_v47, %v1414_v33  ;;  %v1294_v5 = vadd.f32 %v5175_v21, %v1144_v32 }
 0x179   : > { %v991_v31 = vpop.f32.mrf.mxu1 }
 0x17a   : > { %v1148_v29 = vmul.f32 %v5152_v62, %v991_v31  ;;  %v5588_v25 = vpack.c.bf16 %v1419_v13, %v1415_v49  ;;  %6577 = vst [vmem:[#allocation18_spill] sm:$0xff] %v5593_v46  ;;  %v1295_v57 = vadd.f32 %v5188_v43, %v1145_v39  ;;  %v4466_v39 = vld [vmem:[%s6541_s6 + $0x30] sm:$0xff]  }
 0x17b   : > { %v993_v45 = vpop.f32.mrf.mxu1 }
 0x17c   : > { %v1298_v50 = vadd.f32 %v5175_v21, %v1148_v29  ;;  %v1149_v51 = vmul.f32 %v5178_v24, %v993_v45  ;;  %2510 = vmatprep.mubr.bf16.mxu1 %v5588_v25  ;;  %v1423_v31 = vmax.f32 %v1295_v57, 0.0  ;;  %v4467_v29 = vld [vmem:[%s6541_s6 + $0x68] sm:$0xff]   ;;  %v1422_v45 = vmax.f32 %v1294_v5, 0.0 }
 0x17d   : > { %v997_v63 = vpop.f32.mrf.mxu1  ;;  %v4468_v57 = vld [vmem:[%s6541_s6 + $0x28] sm:$0xff]  }
 0x17e   : > { %v1299_v49 = vadd.f32 %v5188_v43, %v1149_v51  ;;  %2511 = vmatmul.mubr.bf16.gmra.mxu1 %v5593_v46  ;;  %2584 = vmatmul.mubr.bf16.vlgmr.msra.gmra.mxu0 %v5072_v37  ;;  %v1426_v47 = vmax.f32 %v1298_v50, 0.0  ;;  %v1152_v37 = vmul.f32 %v5152_v62, %v997_v63  ;;  %v4469_v63 = vld [vmem:[%s6541_s6 + $0x60] sm:$0xff]  }
 0x17f   : > { %2591 = vmatprep.mubr.bf16.mxu0 %v5117_v23  ;;  %v999_v13 = vpop.f32.mrf.mxu1  ;;  %4063 = vmatpush3.bf16.msra.mxu0 %v4464_v1 }
 0x180   : > { %v1427_v33 = vmax.f32 %v1299_v49, 0.0  ;;  %v1153_v32 = vmul.f32 %v5178_v24, %v999_v13  ;;  %4064 = vmatprep.subr.bf16.mxu0 %v4465_v30  ;;  %v5618_v51 = vpack.c.bf16 %v1426_v47, %v1422_v45  ;;  %v1302_v47 = vadd.f32 %v5175_v21, %v1152_v37  ;;  %v4471_v37 = vld [vmem:[%s6541_s6 + $0x58] sm:$0xff]  }
 0x181   : > { %v1001_v50 = vpop.f32.mrf.mxu1 }
 0x182   : > { %v1156_v23 = vmul.f32 %v5152_v62, %v1001_v50  ;;  %v5616_v1 = vpack.c.bf16 %v1427_v33, %v1423_v31  ;;  %v1303_v30 = vadd.f32 %v5188_v43, %v1153_v32  ;;  %v4470_v33 = vld [vmem:[%s6541_s6 + $0x20] sm:$0xff]   ;;  %v1430_v50 = vmax.f32 %v1302_v47, 0.0 }
 0x183   : > { %v1003_v46 = vpop.f32.mrf.mxu1  ;;  %4065 = vmatpush3.bf16.msra.mxu0 %v4466_v39 }
 0x184   : > { %v1306_v49 = vadd.f32 %v5175_v21, %v1156_v23  ;;  %v1157_v5 = vmul.f32 %v5178_v24, %v1003_v46  ;;  %2520 = vmatprep.mubr.bf16.mxu1 %v5616_v1  ;;  %4066 = vmatprep.subr.bf16.mxu0 %v4467_v29  ;;  %v1431_v32 = vmax.f32 %v1303_v30, 0.0  ;;  %v4472_v30 = vld [vmem:[%s6541_s6 + $0x18] sm:$0xff]  }
 0x185   : > { %v1007_v13 = vpop.f32.mrf.mxu1 }
 0x186   : > { %v1307_v39 = vadd.f32 %v5188_v43, %v1157_v5  ;;  %2521 = vmatmul.mubr.bf16.gmra.mxu1 %v5618_v51  ;;  %2592 = vmatmul.mubr.bf16.gmra.mxu0 %v5111_v17  ;;  %v1434_v31 = vmax.f32 %v1306_v49, 0.0  ;;  %v1160_v23 = vmul.f32 %v5152_v62, %v1007_v13 }
 0x187   : > { %2599 = vmatprep.mubr.bf16.mxu0 %v5161_v9  ;;  %v1009_v46 = vpop.f32.mrf.mxu1  ;;  %4067 = vmatpush3.bf16.msra.mxu0 %v4468_v57 }
 0x188   : > { %v1435_v29 = vmax.f32 %v1307_v39, 0.0  ;;  %v1161_v45 = vmul.f32 %v5178_v24, %v1009_v46  ;;  %4068 = vmatprep.subr.bf16.mxu0 %v4469_v63  ;;  %v5646_v49 = vpack.c.bf16 %v1434_v31, %v1430_v50  ;;  %v1310_v13 = vadd.f32 %v5175_v21, %v1160_v23  ;;  %v6581_v50 = vld [vmem:[#allocation9_spill] sm:$0xff]  ;;  %v6588_v23 = vld [vmem:[#allocation16_spill] sm:$0xff] }
 0x189   : > { %v1011_v17 = vpop.f32.mrf.mxu1 }
 0x18a   : > { %v1164_v9 = vmul.f32 %v5152_v62, %v1011_v17  ;;  %v5644_v57 = vpack.c.bf16 %v1435_v29, %v1431_v32  ;;  %v1311_v63 = vadd.f32 %v5188_v43, %v1161_v45  ;;  %v4473_v62 = vld [vmem:[%s6541_s6 + $0x50] sm:$0xff]   ;;  %v4477_v45 = vld [vmem:[%s6541_s6 + $0x40] sm:$0xff]  }
 0x18b   : > { %v1013_v5 = vpop.f32.mrf.mxu1  ;;  %4069 = vmatpush3.bf16.msra.mxu0 %v4470_v33  ;;  %v6587_v17 = vld [vmem:[#allocation14_spill] sm:$0xff] }
 0x18c   : > { %v1314_v39 = vadd.f32 %v5175_v21, %v1164_v9  ;;  %v1165_v47 = vmul.f32 %v5178_v24, %v1013_v5  ;;  %2530 = vmatprep.mubr.bf16.mxu1 %v5644_v57  ;;  %4070 = vmatprep.subr.bf16.mxu0 %v4471_v37  ;;  %v4474_v24 = vld [vmem:[%s6541_s6 + $0x10] sm:$0xff]   ;;  %v1439_v46 = vmax.f32 %v1311_v63, 0.0  ;;  %v4475_v21 = vld [vmem:[%s6541_s6 + $0x48] sm:$0xff]   ;;  %v4478_v37 = vld [vmem:[%s6541_s6] sm:$0xff]  }
 0x18d   : > { %v4480_v9 = vld [vmem:[%s6541_s6 + $0xb0] sm:$0xff]  }
 0x18e   : > { %v1315_v31 = vadd.f32 %v5188_v43, %v1165_v47  ;;  %2531 = vmatmul.mubr.bf16.gmra.mxu1 %v5646_v49  ;;  %2600 = vmatmul.mubr.bf16.gmra.mxu0 %v5154_v0  ;;  %v1442_v33 = vmax.f32 %v1314_v39, 0.0  ;;  %v1438_v43 = vmax.f32 %v1310_v13, 0.0  ;;  %v6589_v39 = vld [vmem:[#allocation15_spill] sm:$0xff]  ;;  %v6590_v47 = vld [vmem:[#allocation17_spill] sm:$0xff] }
 0x18f   : > { %2607 = vmatprep.mubr.bf16.mxu0 %v5204_v6  ;;  %4071 = vmatpush3.bf16.msra.mxu0 %v4472_v30  ;;  %v4476_v6 = vld [vmem:[%s6541_s6 + $0x8] sm:$0xff]  }
 0x190   : > { %v1443_v32 = vmax.f32 %v1315_v31, 0.0  ;;  %4072 = vmatprep.subr.bf16.mxu0 %v4473_v62  ;;  %v5671_v0 = vpack.c.bf16 %v1442_v33, %v1438_v43 }
 0x192   : > { %v5669_v29 = vpack.c.bf16 %v1443_v32, %v1439_v46 }
 0x193   : > { %4073 = vmatpush3.bf16.msra.mxu0 %v4474_v24 }
 0x194   : > { %2540 = vmatprep.mubr.bf16.mxu1 %v5669_v29  ;;  %4074 = vmatprep.subr.bf16.mxu0 %v4475_v21 }
 0x196   : > { %2541 = vmatmul.mubr.bf16.gmra.mxu1 %v5671_v0  ;;  %2608 = vmatmul.mubr.bf16.gmra.mxu0 %v5200_v55  ;;  %v6578_v55 = vld [vmem:[#allocation6_spill] sm:$0xff] }
 0x197   : > { %2615 = vmatprep.mubr.bf16.mxu0 %v5231_v60  ;;  %2744 = vmatprep.mubr.bf16.mxu1 %v5236_v11  ;;  %v6579_v60 = vld [vmem:[#allocation5_spill] sm:$0xff]  ;;  %v6580_v11 = vld [vmem:[#allocation7_spill] sm:$0xff] }
 0x198   : > { %4075 = vmatpush3.bf16.msra.mxu0 %v4476_v6 }
 0x199   : > { %4076 = vmatprep.subr.bf16.mxu0 %v4477_v45  ;;  %v6591_v45 = vld [vmem:[#allocation3_spill] sm:$0xff] }
 0x19c   : > { %4077 = vmatpush3.bf16.msra.mxu0 %v4478_v37 }
 0x19e   : > { %2616 = vmatmul.mubr.bf16.gmra.mxu0 %v5233_v3  ;;  %2745 = vmatmul.mubr.bf16.vlgmr.msra.gmra.mxu1 %v5241_v15  ;;  %v6582_v3 = vld [vmem:[#allocation10_spill] sm:$0xff]  ;;  %v4479_v15 = vld [vmem:[%s6541_s6 + $0xb8] sm:$0xff]  }
 0x19f   : > { %2623 = vmatprep.mubr.bf16.mxu0 %v5274_v44  ;;  %2752 = vmatprep.mubr.bf16.mxu1 %v5276_v28  ;;  %v6584_v44 = vld [vmem:[#allocation11_spill] sm:$0xff]  ;;  %v6585_v28 = vld [vmem:[#allocation13_spill] sm:$0xff] }
 0x1a0   : > { %4198 = vmatprep.subr.bf16.mxu1 %v4479_v15 }
 0x1a1   : > { %4199 = vmatpush3.bf16.msra.mxu1 %v4479_v15 }
 0x1a2   : > { %4200 = vmatprep.subr.bf16.mxu1 %v4480_v9 }
 0x1a5   : > { %4201 = vmatpush3.bf16.msra.mxu1 %v4480_v9  ;;  %v4486_v9 = vld [vmem:[%s6541_s6 + $0x80] sm:$0xff]  }
 0x1a6   : > { %2624 = vmatmul.mubr.bf16.gmra.mxu0 %v5270_v16  ;;  %2753 = vmatmul.mubr.bf16.gmra.mxu1 %v5284_v40  ;;  %v6583_v16 = vld [vmem:[#allocation8_spill] sm:$0xff] }
 0x1a7   : > { %2631 = vmatprep.mubr.bf16.mxu0 %v5314_v7  ;;  %2760 = vmatprep.mubr.bf16.mxu1 %v6578_v55  ;;  %v6586_v7 = vld [vmem:[#allocation12_spill] sm:$0xff] }
 0x1a8   : > { %v4484_v55 = vld [vmem:[%s6541_s6 + $0x90] sm:$0xff]  }
 0x1ae   : > { %2632 = vmatmul.mubr.bf16.gmra.mxu0 %v6579_v60  ;;  %2761 = vmatmul.mubr.bf16.gmra.mxu1 %v6580_v11 }
 0x1af   : > { %2639 = vmatprep.mubr.bf16.mxu0 %v6581_v50  ;;  %2768 = vmatprep.mubr.bf16.mxu1 %v6582_v3 }
 0x1b6   : > { %2640 = vmatmul.mubr.bf16.gmra.mxu0 %v6583_v16  ;;  %2769 = vmatmul.mubr.bf16.gmra.mxu1 %v6584_v44  ;;  %v6592_v44 = vld [vmem:[#allocation2_spill] sm:$0xff] }
 0x1b7   : > { %2647 = vmatprep.mubr.bf16.mxu0 %v5391_v35  ;;  %2776 = vmatprep.mubr.bf16.mxu1 %v6585_v28 }
 0x1bd   : > { %v5706_v40 = vpop.f32.mrf.mxu0 }
 0x1be   : > { %2648 = vmatmul.mubr.bf16.gmra.mxu0 %v6586_v7  ;;  %2777 = vmatmul.mubr.bf16.gmra.mxu1 %v6587_v17 }
 0x1bf   : > { %2655 = vmatprep.mubr.bf16.mxu0 %v5420_v10  ;;  %2784 = vmatprep.mubr.bf16.mxu1 %v6588_v23  ;;  %v5715_v5 = vpop.f32.mrf.mxu0 }
 0x1c1   : > { %v5717_v35 = vpop.f32.mrf.mxu0 }
 0x1c3   : > { %v2205_v30 = vpop.f32.mrf.mxu0 }
 0x1c5   : > { %v5719_v63 = vpop.f32.mrf.mxu0 }
 0x1c6   : > { %2656 = vmatmul.mubr.bf16.gmra.mxu0 %v6589_v39  ;;  %2785 = vmatmul.mubr.bf16.gmra.mxu1 %v6590_v47 }
 0x1c7   : > { %2663 = vmatprep.mubr.bf16.mxu0 %v5452_v58  ;;  %2792 = vmatprep.mubr.bf16.mxu1 %v5454_v34  ;;  %v5725_v10 = vpop.f32.mrf.mxu0  ;;  %v4481_v58 = vld [vmem:[%s6541_s6 + $0xa8] sm:$0xff]  }
 0x1c8   : > { %4202 = vmatprep.subr.bf16.mxu1 %v4481_v58 }
 0x1c9   : > { %v5727_v62 = vpop.f32.mrf.mxu0  ;;  %4203 = vmatpush3.bf16.msra.mxu1 %v4481_v58 }
 0x1cb   : > { %v5729_v13 = vpop.f32.mrf.mxu0 }
 0x1ce   : > { %v5731_v31 = vpop.f32.mrf.mxu0  ;;  %2664 = vmatmul.mubr.bf16.gmra.mxu0 %v5447_v8  ;;  %2793 = vmatmul.mubr.bf16.gmra.mxu1 %v5459_v27 }
 0x1cf   : > { %2671 = vmatprep.mubr.bf16.mxu0 %v5476_v56  ;;  %2800 = vmatprep.mubr.bf16.mxu1 %v5482_v26 }
 0x1d0   : > { %v5737_v24 = vpop.f32.mrf.mxu0 }
 0x1d2   : > { %v5742_v34 = vpop.f32.mrf.mxu0 }
 0x1d4   : > { %v5744_v46 = vpop.f32.mrf.mxu0 }
 0x1d6   : > { %v5746_v33 = vpop.f32.mrf.mxu0  ;;  %2672 = vmatmul.mubr.bf16.gmra.mxu0 %v5478_v42  ;;  %2801 = vmatmul.mubr.bf16.gmra.mxu1 %v5488_v54  ;;  %v4482_v42 = vld [vmem:[%s6541_s6 + $0xa0] sm:$0xff]  }
 0x1d7   : > { %2679 = vmatprep.mubr.bf16.mxu0 %v5492_v61  ;;  %2808 = vmatprep.mubr.bf16.mxu1 %v5505_v20 }
 0x1d8   : > { %v5752_v8 = vpop.f32.mrf.mxu0  ;;  %4204 = vmatprep.subr.bf16.mxu1 %v4482_v42 }
 0x1d9   : > { %4205 = vmatpush3.bf16.msra.mxu1 %v4482_v42 }
 0x1da   : > { %v5754_v27 = vpop.f32.mrf.mxu0 }
 0x1dc   : > { %v5756_v56 = vpop.f32.mrf.mxu0 }
 0x1de   : > { %v5758_v26 = vpop.f32.mrf.mxu0  ;;  %v5760_v32 = vpop.f32.mrf.mxu1  ;;  %2680 = vmatmul.mubr.bf16.gmra.mxu0 %v5070_v36  ;;  %2809 = vmatmul.mubr.bf16.gmra.mxu1 %v5509_v38  ;;  %v4483_v36 = vld [vmem:[%s6541_s6 + $0x98] sm:$0xff]   ;;  %v5779_v38 = vld [vmem:[%s6540_s5] sm:$0x7] }
 0x1df   : > { %2687 = vmatprep.mubr.bf16.mxu0 %v5519_v52  ;;  %2816 = vmatprep.mubr.bf16.mxu1 %v5532_v2  ;;  %v5791_v37 = vrot.slane %v5779_v38, %v6591_v45  ;;  %v5812_v28 = vrot.slane %v5779_v38, %v6592_v44 }
 0x1e0   : > { %v5769_v54 = vpop.f32.mrf.mxu0  ;;  %v2394_v61 = vpop.f32.mrf.mxu1  ;;  %4206 = vmatprep.subr.bf16.mxu1 %v4483_v36 }
 0x1e1   : > { %4207 = vmatpush3.bf16.msra.mxu1 %v4483_v36  ;;  %v2206_v50 = vadd.f32 %v2205_v30, %v5791_v37  ;;  %v2202_v15 = vadd.f32 %v5715_v5, %v5791_v37  ;;  %v2200_v58 = vadd.f32 %v5706_v40, %v5812_v28 }
 0x1e2   : > { %v5771_v20 = vpop.f32.mrf.mxu0  ;;  %v2396_v21 = vpop.f32.mrf.mxu1  ;;  %4208 = vmatprep.subr.bf16.mxu1 %v4484_v55 }
 0x1e3   : > { %v2395_v23 = vadd.f32 %v2394_v61, %v2202_v15 }
 0x1e4   : > { %v5781_v52 = vpop.f32.mrf.mxu0  ;;  %v2398_v2 = vpop.f32.mrf.mxu1 }
 0x1e5   : > { %4209 = vmatpush3.bf16.msra.mxu1 %v4484_v55  ;;  %v2399_v16 = vadd.f32 %v2398_v2, %v2206_v50  ;;  %v2212_v2 = vadd.f32 %v5725_v10, %v5791_v37  ;;  %v2393_v55 = vadd.f32 %v5760_v32, %v2200_v58  ;;  %v2214_v32 = vadd.f32 %v5727_v62, %v5812_v28 }
 0x1e6   : > { %v5783_v43 = vpop.f32.mrf.mxu0  ;;  %v5785_v6 = vpop.f32.mrf.mxu1  ;;  %2688 = vmatmul.mubr.bf16.gmra.mxu0 %v5107_v14  ;;  %2817 = vmatmul.mubr.bf16.gmra.mxu1 %v5536_v19 }
 0x1e7   : > { %2695 = vmatprep.mubr.bf16.mxu0 %v5543_v18  ;;  %2824 = vmatprep.mubr.bf16.mxu1 %v5554_v22  ;;  %v4485_v18 = vld [vmem:[%s6541_s6 + $0x88] sm:$0xff]   ;;  %v2877_v39 = vmax.f32 %v2399_v16, 0.0  ;;  %v2873_v15 = vmax.f32 %v2393_v55, 0.0 }
 0x1e8   : > { %v5798_v60 = vpop.f32.mrf.mxu0  ;;  %v2404_v11 = vpop.f32.mrf.mxu1  ;;  %4210 = vmatprep.subr.bf16.mxu1 %v4485_v18 }
 0x1e9   : > { %4211 = vmatpush3.bf16.msra.mxu1 %v4485_v18  ;;  %v2405_v40 = vadd.f32 %v2404_v11, %v2212_v2 }
 0x1ea   : > { %v5800_v14 = vpop.f32.mrf.mxu0  ;;  %v2406_v19 = vpop.f32.mrf.mxu1  ;;  %4212 = vmatprep.subr.bf16.mxu1 %v4486_v9 }
 0x1ec   : > { %v5806_v3 = vpop.f32.mrf.mxu0  ;;  %v2408_v22 = vpop.f32.mrf.mxu1 }
 0x1ed   : > { %4213 = vmatpush3.bf16.msra.mxu1 %v4486_v9 }
 0x1ee   : > { %v5814_v7 = vpop.f32.mrf.mxu0  ;;  %v5816_v17 = vpop.f32.mrf.mxu1  ;;  %2696 = vmatmul.mubr.bf16.gmra.mxu0 %v5146_v41  ;;  %2825 = vmatmul.mubr.bf16.gmra.mxu1 %v5556_v4  ;;  %v2204_v41 = vadd.f32 %v5717_v35, %v5812_v28 }
 0x1ef   : > { %2703 = vmatprep.mubr.bf16.mxu0 %v5562_v48  ;;  %2832 = vmatprep.mubr.bf16.mxu1 %v5572_v59  ;;  %v2216_v48 = vadd.f32 %v5729_v13, %v5791_v37  ;;  %v2874_v59 = vmax.f32 %v2395_v23, 0.0  ;;  %v2407_v23 = vadd.f32 %v2406_v19, %v2214_v32 }
 0x1f0   : > { %v5825_v5 = vpop.f32.mrf.mxu0  ;;  %v2414_v30 = vpop.f32.mrf.mxu1  ;;  %v2397_v42 = vadd.f32 %v2396_v21, %v2204_v41  ;;  %v2222_v41 = vadd.f32 %v5737_v24, %v5791_v37 }
 0x1f1   : > { %v2409_v45 = vadd.f32 %v2408_v22, %v2216_v48  ;;  %v2970_v35 = vpack.c.bf16 %v2877_v39, %v2874_v59  ;;  %v2882_v19 = vmax.f32 %v2407_v23, 0.0 }
 0x1f2   : > { %v5829_v47 = vpop.f32.mrf.mxu0  ;;  %v2416_v4 = vpop.f32.mrf.mxu1  ;;  %v2876_v13 = vmax.f32 %v2397_v42, 0.0 }
 0x1f3   : > { %v2883_v22 = vmax.f32 %v2409_v45, 0.0 }
 0x1f4   : > { %v5835_v61 = vpop.f32.mrf.mxu0  ;;  %v2418_v36 = vpop.f32.mrf.mxu1  ;;  %v2969_v11 = vpack.c.bf16 %v2876_v13, %v2873_v15 }
 0x1f6   : > { %v5840_v50 = vpop.f32.mrf.mxu0  ;;  %v5842_v18 = vpop.f32.mrf.mxu1  ;;  %2704 = vmatmul.mubr.bf16.gmra.mxu0 %v5196_v53  ;;  %2833 = vmatmul.mubr.bf16.gmra.mxu1 %v5574_v12  ;;  %v2226_v53 = vadd.f32 %v5744_v46, %v5791_v37  ;;  %v2880_v12 = vmax.f32 %v2405_v40, 0.0  ;;  %v6593_v46 = vld [vmem:[#allocation18_spill] sm:$0xff]  ;;  %v2236_v40 = vadd.f32 %v5756_v56, %v5791_v37 }
 0x1f7   : > { %2840 = vmatprep.mubr.bf16.mxu1 %v5588_v25  ;;  %3248 = vmatprep.mubr.bf16.mxu0 %v2970_v35  ;;  %v2210_v25 = vadd.f32 %v5719_v63, %v5812_v28  ;;  %v2415_v63 = vadd.f32 %v2414_v30, %v2222_v41 }
 0x1f8   : > { %v5847_v21 = vpop.f32.mrf.mxu0  ;;  %v2424_v10 = vpop.f32.mrf.mxu1  ;;  %v2419_v62 = vadd.f32 %v2418_v36, %v2226_v53  ;;  %v2973_v48 = vpack.c.bf16 %v2883_v22, %v2880_v12  ;;  %v2224_v36 = vadd.f32 %v5742_v34, %v5812_v28  ;;  %v2232_v53 = vadd.f32 %v5752_v8, %v5791_v37 }
 0x1f9   : > { %v2403_v59 = vadd.f32 %v5785_v6, %v2210_v25  ;;  %v2886_v13 = vmax.f32 %v2415_v63, 0.0 }
 0x1fa   : > { %v5851_v16 = vpop.f32.mrf.mxu0  ;;  %v2426_v44 = vpop.f32.mrf.mxu1  ;;  %v2889_v24 = vmax.f32 %v2419_v62, 0.0  ;;  %v2417_v22 = vadd.f32 %v2416_v4, %v2224_v36 }
 0x1fb   : > { %v2879_v6 = vmax.f32 %v2403_v59, 0.0 }
 0x1fc   : > { %v5857_v9 = vpop.f32.mrf.mxu0  ;;  %v2428_v39 = vpop.f32.mrf.mxu1  ;;  %v2976_v12 = vpack.c.bf16 %v2889_v24, %v2886_v13  ;;  %v2888_v56 = vmax.f32 %v2417_v22, 0.0  ;;  %v2242_v24 = vadd.f32 %v5769_v54, %v5791_v37 }
 0x1fd   : > { %v2972_v30 = vpack.c.bf16 %v2882_v19, %v2879_v6  ;;  %v2429_v34 = vadd.f32 %v2428_v39, %v2236_v40  ;;  %v2234_v39 = vadd.f32 %v5754_v27, %v5812_v28 }
 0x1fe   : > { %v5862_v58 = vpop.f32.mrf.mxu0  ;;  %v5864_v42 = vpop.f32.mrf.mxu1  ;;  %2841 = vmatmul.mubr.bf16.gmra.mxu1 %v6593_v46  ;;  %3249 = vmatmul.mubr.bf16.vlgmr.msra.gmra.mxu0 %v2969_v11 }
 0x1ff   : > { %2848 = vmatprep.mubr.bf16.mxu1 %v5616_v1  ;;  %3256 = vmatprep.mubr.bf16.mxu0 %v2973_v48  ;;  %v2220_v1 = vadd.f32 %v5731_v31, %v5812_v28  ;;  %v2425_v31 = vadd.f32 %v2424_v10, %v2232_v53  ;;  %v2895_v8 = vmax.f32 %v2429_v34, 0.0  ;;  %v2427_v46 = vadd.f32 %v2426_v44, %v2234_v39 }
 0x200   : > { %v5868_v2 = vpop.f32.mrf.mxu0  ;;  %v2434_v45 = vpop.f32.mrf.mxu1 }
 0x201   : > { %v2413_v25 = vadd.f32 %v5816_v17, %v2220_v1  ;;  %v2892_v59 = vmax.f32 %v2425_v31, 0.0  ;;  %v2252_v31 = vadd.f32 %v5798_v60, %v5791_v37  ;;  %v2254_v60 = vadd.f32 %v5800_v14, %v5812_v28 }
 0x202   : > { %v5872_v35 = vpop.f32.mrf.mxu0  ;;  %v2436_v55 = vpop.f32.mrf.mxu1 }
 0x203   : > { %v2885_v17 = vmax.f32 %v2413_v25, 0.0  ;;  %v2979_v36 = vpack.c.bf16 %v2895_v8, %v2892_v59 }
 0x204   : > { %v5878_v32 = vpop.f32.mrf.mxu0  ;;  %v2438_v15 = vpop.f32.mrf.mxu1 }
 0x205   : > { %v2975_v10 = vpack.c.bf16 %v2888_v56, %v2885_v17 }
 0x206   : > { %v5883_v11 = vpop.f32.mrf.mxu0  ;;  %v5885_v23 = vpop.f32.mrf.mxu1  ;;  %2849 = vmatmul.mubr.bf16.gmra.mxu1 %v5618_v51  ;;  %3257 = vmatmul.mubr.bf16.gmra.mxu0 %v2972_v30  ;;  %v2246_v51 = vadd.f32 %v5781_v52, %v5791_v37  ;;  %v2894_v52 = vmax.f32 %v2427_v46, 0.0  ;;  %v2244_v30 = vadd.f32 %v5771_v20, %v5812_v28  ;;  %v2266_v46 = vadd.f32 %v5835_v61, %v5791_v37 }
 0x207   : > { %2856 = vmatprep.mubr.bf16.mxu1 %v5644_v57  ;;  %3264 = vmatprep.mubr.bf16.mxu0 %v2976_v12  ;;  %v2230_v57 = vadd.f32 %v5746_v33, %v5812_v28  ;;  %v2435_v33 = vadd.f32 %v2434_v45, %v2242_v24 }
 0x208   : > { %v5889_v4 = vpop.f32.mrf.mxu0  ;;  %v2444_v41 = vpop.f32.mrf.mxu1  ;;  %v2439_v27 = vadd.f32 %v2438_v15, %v2246_v51  ;;  %v2437_v34 = vadd.f32 %v2436_v55, %v2244_v30 }
 0x209   : > { %v2423_v6 = vadd.f32 %v5842_v18, %v2230_v57  ;;  %v2898_v53 = vmax.f32 %v2435_v33, 0.0 }
 0x20a   : > { %v5893_v62 = vpop.f32.mrf.mxu0  ;;  %v2446_v48 = vpop.f32.mrf.mxu1  ;;  %v2901_v54 = vmax.f32 %v2439_v27, 0.0 }
 0x20b   : > { %v2891_v18 = vmax.f32 %v2423_v6, 0.0  ;;  %v2447_v24 = vadd.f32 %v2446_v48, %v2254_v60  ;;  %v2262_v6 = vadd.f32 %v5825_v5, %v5791_v37 }
 0x20c   : > { %v5899_v63 = vpop.f32.mrf.mxu0  ;;  %v2448_v19 = vpop.f32.mrf.mxu1  ;;  %v2982_v56 = vpack.c.bf16 %v2901_v54, %v2898_v53  ;;  %v2264_v53 = vadd.f32 %v5829_v47, %v5812_v28 }
 0x20d   : > { %v2978_v45 = vpack.c.bf16 %v2894_v52, %v2891_v18 }
 0x20e   : > { %v5904_v40 = vpop.f32.mrf.mxu0  ;;  %v5906_v13 = vpop.f32.mrf.mxu1  ;;  %2857 = vmatmul.mubr.bf16.gmra.mxu1 %v5646_v49  ;;  %3265 = vmatmul.mubr.bf16.gmra.mxu0 %v2975_v10  ;;  %v2256_v49 = vadd.f32 %v5806_v3, %v5791_v37  ;;  %v2900_v3 = vmax.f32 %v2437_v34, 0.0 }
 0x20f   : > { %2864 = vmatprep.mubr.bf16.mxu1 %v5669_v29  ;;  %3272 = vmatprep.mubr.bf16.mxu0 %v2979_v36  ;;  %v2240_v29 = vadd.f32 %v5758_v26, %v5812_v28  ;;  %v2445_v26 = vadd.f32 %v2444_v41, %v2252_v31 }
 0x210   : > { %v5910_v44 = vpop.f32.mrf.mxu0  ;;  %v2454_v1 = vpop.f32.mrf.mxu1  ;;  %v2449_v20 = vadd.f32 %v2448_v19, %v2256_v49 }
 0x211   : > { %v2433_v8 = vadd.f32 %v5864_v42, %v2240_v29  ;;  %v2904_v19 = vmax.f32 %v2445_v26, 0.0  ;;  %v2455_v61 = vadd.f32 %v2454_v1, %v2262_v6  ;;  %v2260_v1 = vadd.f32 %v5814_v7, %v5812_v28 }
 0x212   : > { %v5914_v22 = vpop.f32.mrf.mxu0  ;;  %v2456_v15 = vpop.f32.mrf.mxu1  ;;  %v2907_v59 = vmax.f32 %v2449_v20, 0.0 }
 0x213   : > { %v2897_v57 = vmax.f32 %v2433_v8, 0.0  ;;  %v2910_v34 = vmax.f32 %v2455_v61, 0.0  ;;  %v2457_v31 = vadd.f32 %v2456_v15, %v2264_v53  ;;  %v2272_v8 = vadd.f32 %v5847_v21, %v5791_v37 }
 0x214   : > { %v5920_v12 = vpop.f32.mrf.mxu0  ;;  %v2458_v25 = vpop.f32.mrf.mxu1  ;;  %v2985_v33 = vpack.c.bf16 %v2907_v59, %v2904_v19  ;;  %v2274_v19 = vadd.f32 %v5851_v16, %v5812_v28 }
 0x215   : > { %v2981_v41 = vpack.c.bf16 %v2900_v3, %v2897_v57  ;;  %v2459_v14 = vadd.f32 %v2458_v25, %v2266_v46  ;;  %v2453_v3 = vadd.f32 %v5906_v13, %v2260_v1  ;;  %v2912_v7 = vmax.f32 %v2457_v31, 0.0 }
 0x216   : > { %v5925_v39 = vpop.f32.mrf.mxu0  ;;  %v5927_v17 = vpop.f32.mrf.mxu1  ;;  %2865 = vmatmul.mubr.bf16.gmra.mxu1 %v5671_v0  ;;  %3273 = vmatmul.mubr.bf16.gmra.mxu0 %v2978_v45  ;;  %v2250_v0 = vadd.f32 %v5783_v43, %v5812_v28  ;;  %v2906_v43 = vmax.f32 %v2447_v24, 0.0  ;;  %v2286_v13 = vadd.f32 %v5878_v32, %v5791_v37 }
 0x217   : > { %3280 = vmatprep.mubr.bf16.mxu0 %v2982_v56  ;;  %v2913_v49 = vmax.f32 %v2459_v14, 0.0  ;;  %v2909_v21 = vmax.f32 %v2453_v3, 0.0  ;;  %v2292_v3 = vadd.f32 %v5889_v4, %v5791_v37 }
 0x218   : > { %v5930_v55 = vpop.f32.mrf.mxu0  ;;  %v2464_v51 = vpop.f32.mrf.mxu1  ;;  %v2443_v52 = vadd.f32 %v5885_v23, %v2250_v0  ;;  %v2276_v23 = vadd.f32 %v5857_v9, %v5791_v37 }
 0x219   : > { %v2988_v26 = vpack.c.bf16 %v2913_v49, %v2910_v34  ;;  %v2465_v9 = vadd.f32 %v2464_v51, %v2272_v8  ;;  %v2270_v51 = vadd.f32 %v5840_v50, %v5812_v28  ;;  %v2284_v34 = vadd.f32 %v5872_v35, %v5812_v28 }
 0x21a   : > { %v5934_v10 = vpop.f32.mrf.mxu0  ;;  %v2466_v42 = vpop.f32.mrf.mxu1  ;;  %v2903_v5 = vmax.f32 %v2443_v52, 0.0  ;;  %v2282_v52 = vadd.f32 %v5868_v2, %v5791_v37 }
 0x21b   : > { %v2916_v24 = vmax.f32 %v2465_v9, 0.0  ;;  %v2467_v6 = vadd.f32 %v2466_v42, %v2274_v19 }
 0x21c   : > { %v5940_v27 = vpop.f32.mrf.mxu0  ;;  %v2468_v36 = vpop.f32.mrf.mxu1  ;;  %v2984_v25 = vpack.c.bf16 %v2906_v43, %v2903_v5  ;;  %v2463_v43 = vadd.f32 %v5927_v17, %v2270_v51  ;;  %v2296_v17 = vadd.f32 %v5899_v63, %v5791_v37 }
 0x21d   : > { %v2469_v47 = vadd.f32 %v2468_v36, %v2276_v23  ;;  %v2987_v36 = vpack.c.bf16 %v2912_v7, %v2909_v21  ;;  %v2918_v50 = vmax.f32 %v2467_v6, 0.0 }
 0x21e   : > { %v5945_v54 = vpop.f32.mrf.mxu0  ;;  %v5947_v30 = vpop.f32.mrf.mxu1  ;;  %3281 = vmatmul.mubr.bf16.gmra.mxu0 %v2981_v41  ;;  %v2915_v2 = vmax.f32 %v2463_v43, 0.0  ;;  %v2302_v43 = vadd.f32 %v5910_v44, %v5791_v37 }
 0x21f   : > { %3288 = vmatprep.mubr.bf16.mxu0 %v2985_v33  ;;  %v2919_v46 = vmax.f32 %v2469_v47, 0.0 }
 0x220   : > { %v5949_v18 = vpop.f32.mrf.mxu0  ;;  %v2474_v48 = vpop.f32.mrf.mxu1 }
 0x221   : > { %v2991_v61 = vpack.c.bf16 %v2919_v46, %v2916_v24  ;;  %v2475_v32 = vadd.f32 %v2474_v48, %v2282_v52  ;;  %v2280_v48 = vadd.f32 %v5862_v58, %v5812_v28  ;;  %v2294_v24 = vadd.f32 %v5893_v62, %v5812_v28 }
 0x222   : > { %v5953_v29 = vpop.f32.mrf.mxu0  ;;  %v2476_v45 = vpop.f32.mrf.mxu1 }
 0x223   : > { %v2922_v31 = vmax.f32 %v2475_v32, 0.0  ;;  %v2477_v8 = vadd.f32 %v2476_v45, %v2284_v34  ;;  %v2473_v7 = vadd.f32 %v5947_v30, %v2280_v48  ;;  %v2306_v30 = vadd.f32 %v5920_v12, %v5791_v37 }
 0x224   : > { %v5959_v20 = vpop.f32.mrf.mxu0  ;;  %v2478_v56 = vpop.f32.mrf.mxu1 }
 0x225   : > { %v2479_v16 = vadd.f32 %v2478_v56, %v2286_v13  ;;  %v2990_v56 = vpack.c.bf16 %v2918_v50, %v2915_v2  ;;  %v2924_v58 = vmax.f32 %v2477_v8, 0.0  ;;  %v2921_v4 = vmax.f32 %v2473_v7, 0.0 }
 0x226   : > { %v5964_v59 = vpop.f32.mrf.mxu0  ;;  %v5966_v60 = vpop.f32.mrf.mxu1  ;;  %3289 = vmatmul.mubr.bf16.gmra.mxu0 %v2984_v25  ;;  %v2312_v7 = vadd.f32 %v5930_v55, %v5791_v37 }
 0x227   : > { %3296 = vmatprep.mubr.bf16.mxu0 %v2988_v26  ;;  %v2925_v23 = vmax.f32 %v2479_v16, 0.0 }
 0x228   : > { %v5968_v57 = vpop.f32.mrf.mxu0  ;;  %v2484_v15 = vpop.f32.mrf.mxu1 }
 0x229   : > { %v2994_v9 = vpack.c.bf16 %v2925_v23, %v2922_v31  ;;  %v2485_v63 = vadd.f32 %v2484_v15, %v2292_v3  ;;  %v2290_v15 = vadd.f32 %v5883_v11, %v5812_v28  ;;  %v2304_v31 = vadd.f32 %v5914_v22, %v5812_v28 }
 0x22a   : > { %v5972_v0 = vpop.f32.mrf.mxu0  ;;  %v2486_v41 = vpop.f32.mrf.mxu1 }
 0x22b   : > { %v2928_v6 = vmax.f32 %v2485_v63, 0.0  ;;  %v2487_v52 = vadd.f32 %v2486_v41, %v2294_v24  ;;  %v2483_v50 = vadd.f32 %v5966_v60, %v2290_v15  ;;  %v2316_v60 = vadd.f32 %v5940_v27, %v5791_v37 }
 0x22c   : > { %v5978_v14 = vpop.f32.mrf.mxu0  ;;  %v2488_v33 = vpop.f32.mrf.mxu1 }
 0x22d   : > { %v2489_v35 = vadd.f32 %v2488_v33, %v2296_v17  ;;  %v2993_v33 = vpack.c.bf16 %v2924_v58, %v2921_v4  ;;  %v2930_v11 = vmax.f32 %v2487_v52, 0.0  ;;  %v2927_v44 = vmax.f32 %v2483_v50, 0.0 }
 0x22e   : > { %v5983_v49 = vpop.f32.mrf.mxu0  ;;  %v5985_v53 = vpop.f32.mrf.mxu1  ;;  %3297 = vmatmul.mubr.bf16.gmra.mxu0 %v2987_v36  ;;  %v2322_v50 = vadd.f32 %v5949_v18, %v5791_v37 }
 0x22f   : > { %3304 = vmatprep.mubr.bf16.mxu0 %v2991_v61  ;;  %v2931_v13 = vmax.f32 %v2489_v35, 0.0 }
 0x230   : > { %v5987_v5 = vpop.f32.mrf.mxu0  ;;  %v2494_v42 = vpop.f32.mrf.mxu1 }
 0x231   : > { %v2997_v32 = vpack.c.bf16 %v2931_v13, %v2928_v6  ;;  %v2495_v12 = vadd.f32 %v2494_v42, %v2302_v43  ;;  %v2300_v42 = vadd.f32 %v5904_v40, %v5812_v28  ;;  %v2314_v6 = vadd.f32 %v5934_v10, %v5812_v28 }
 0x232   : > { %v5991_v1 = vpop.f32.mrf.mxu0  ;;  %v2496_v25 = vpop.f32.mrf.mxu1 }
 0x233   : > { %v2934_v8 = vmax.f32 %v2495_v12, 0.0  ;;  %v2497_v3 = vadd.f32 %v2496_v25, %v2304_v31  ;;  %v2493_v58 = vadd.f32 %v5985_v53, %v2300_v42  ;;  %v2326_v53 = vadd.f32 %v5959_v20, %v5791_v37 }
 0x234   : > { %v5997_v47 = vpop.f32.mrf.mxu0  ;;  %v2498_v26 = vpop.f32.mrf.mxu1 }
 0x235   : > { %v2499_v62 = vadd.f32 %v2498_v26, %v2306_v30  ;;  %v2996_v26 = vpack.c.bf16 %v2930_v11, %v2927_v44  ;;  %v2936_v40 = vmax.f32 %v2497_v3, 0.0  ;;  %v2933_v55 = vmax.f32 %v2493_v58, 0.0 }
 0x236   : > { %v6002_v46 = vpop.f32.mrf.mxu0  ;;  %v6004_v19 = vpop.f32.mrf.mxu1  ;;  %3305 = vmatmul.mubr.bf16.gmra.mxu0 %v2990_v56  ;;  %v2332_v58 = vadd.f32 %v5968_v57, %v5791_v37 }
 0x237   : > { %3312 = vmatprep.mubr.bf16.mxu0 %v2994_v9  ;;  %v2937_v17 = vmax.f32 %v2499_v62, 0.0 }
 0x238   : > { %v6006_v21 = vpop.f32.mrf.mxu0  ;;  %v2504_v45 = vpop.f32.mrf.mxu1 }
 0x239   : > { %v3000_v63 = vpack.c.bf16 %v2937_v17, %v2934_v8  ;;  %v2505_v27 = vadd.f32 %v2504_v45, %v2312_v7  ;;  %v2310_v45 = vadd.f32 %v5925_v39, %v5812_v28  ;;  %v2324_v8 = vadd.f32 %v5953_v29, %v5812_v28 }
 0x23a   : > { %v6010_v51 = vpop.f32.mrf.mxu0  ;;  %v2506_v36 = vpop.f32.mrf.mxu1 }
 0x23b   : > { %v2940_v52 = vmax.f32 %v2505_v27, 0.0  ;;  %v2507_v43 = vadd.f32 %v2506_v36, %v2314_v6  ;;  %v2503_v11 = vadd.f32 %v6004_v19, %v2310_v45  ;;  %v2336_v19 = vadd.f32 %v5978_v14, %v5791_v37 }
 0x23c   : > { %v6016_v16 = vpop.f32.mrf.mxu0  ;;  %v2508_v61 = vpop.f32.mrf.mxu1 }
 0x23d   : > { %v2509_v22 = vadd.f32 %v2508_v61, %v2316_v60  ;;  %v2999_v61 = vpack.c.bf16 %v2936_v40, %v2933_v55  ;;  %v2942_v39 = vmax.f32 %v2507_v43, 0.0  ;;  %v2939_v18 = vmax.f32 %v2503_v11, 0.0 }
 0x23e   : > { %v6021_v23 = vpop.f32.mrf.mxu1  ;;  %v6023_v34 = vpop.f32.mrf.mxu0  ;;  %3313 = vmatmul.mubr.bf16.gmra.mxu0 %v2993_v33 }
 0x23f   : > { %3320 = vmatprep.mubr.bf16.mxu0 %v2997_v32  ;;  %v2943_v30 = vmax.f32 %v2509_v22, 0.0 }
 0x240   : > { %v2514_v2 = vpop.f32.mrf.mxu1  ;;  %v6025_v41 = vpop.f32.mrf.mxu0 }
 0x241   : > { %v3003_v12 = vpack.c.bf16 %v2943_v30, %v2940_v52  ;;  %v2515_v20 = vadd.f32 %v2514_v2, %v2322_v50  ;;  %v2320_v2 = vadd.f32 %v5945_v54, %v5812_v28  ;;  %v2334_v52 = vadd.f32 %v5972_v0, %v5812_v28 }
 0x242   : > { %v2516_v48 = vpop.f32.mrf.mxu1  ;;  %v6029_v56 = vpop.f32.mrf.mxu0  ;;  %v2342_v0 = vadd.f32 %v5987_v5, %v5791_v37 }
 0x243   : > { %v2946_v3 = vmax.f32 %v2515_v20, 0.0  ;;  %v2517_v7 = vadd.f32 %v2516_v48, %v2324_v8  ;;  %v2513_v40 = vadd.f32 %v6021_v23, %v2320_v2  ;;  %v2346_v23 = vadd.f32 %v5997_v47, %v5791_v37  ;;  %v6594_v47 = vld [vmem:[#allocation4_spill] sm:$0xff] }
 0x244   : > { %v2518_v35 = vpop.f32.mrf.mxu1  ;;  %v6035_v9 = vpop.f32.mrf.mxu0 }
 0x245   : > { %v2519_v10 = vadd.f32 %v2518_v35, %v2326_v53  ;;  %v3002_v35 = vpack.c.bf16 %v2942_v39, %v2939_v18  ;;  %v2948_v54 = vmax.f32 %v2517_v7, 0.0  ;;  %v2945_v57 = vmax.f32 %v2513_v40, 0.0 }
 0x246   : > { %v6040_v13 = vpop.f32.mrf.mxu1  ;;  %v6042_v24 = vpop.f32.mrf.mxu0  ;;  %3321 = vmatmul.mubr.bf16.gmra.mxu0 %v2996_v26  ;;  %v6103_v18 = vrot.slane %v5779_v38, %v6594_v47  ;;  %v3859_v5 = vadd.f32 %v6035_v9, %v6029_v56  ;;  %v2344_v7 = vadd.f32 %v5991_v1, %v5812_v28 }
 0x247   : > { %3328 = vmatprep.mubr.bf16.mxu0 %v3000_v63  ;;  %v2949_v60 = vmax.f32 %v2519_v10, 0.0 }
 0x248   : > { %v2524_v4 = vpop.f32.mrf.mxu1  ;;  %v6044_v25 = vpop.f32.mrf.mxu0 }
 0x249   : > { %v3006_v29 = vpack.c.bf16 %v2949_v60, %v2946_v3  ;;  %v2525_v14 = vadd.f32 %v2524_v4, %v2332_v58  ;;  %v2330_v4 = vadd.f32 %v5964_v59, %v5812_v28  ;;  %v3856_v59 = vadd.f32 %v6025_v41, %v6023_v34 }
 0x24a   : > { %v2526_v15 = vpop.f32.mrf.mxu1  ;;  %v6048_v33 = vpop.f32.mrf.mxu0  ;;  %v2340_v34 = vadd.f32 %v5983_v49, %v5812_v28  ;;  %v2356_v41 = vadd.f32 %v6016_v16, %v5791_v37 }
 0x24b   : > { %v2952_v43 = vmax.f32 %v2525_v14, 0.0  ;;  %v2527_v50 = vadd.f32 %v2526_v15, %v2334_v52  ;;  %v2523_v39 = vadd.f32 %v6040_v13, %v2330_v4  ;;  %v2586_v56 = vadd.f32 %v3856_v59, %v6103_v18 }
 0x24c   : > { %v2528_v62 = vpop.f32.mrf.mxu1  ;;  %v6054_v32 = vpop.f32.mrf.mxu0 }
 0x24d   : > { %v2529_v27 = vadd.f32 %v2528_v62, %v2336_v19  ;;  %v3005_v62 = vpack.c.bf16 %v2948_v54, %v2945_v57  ;;  %v2954_v19 = vmax.f32 %v2527_v50, 0.0 }
 0x24e   : > { %v6059_v17 = vpop.f32.mrf.mxu1  ;;  %v6061_v31 = vpop.f32.mrf.mxu0  ;;  %3329 = vmatmul.mubr.bf16.gmra.mxu0 %v2999_v61 }
 0x24f   : > { %3336 = vmatprep.mubr.bf16.mxu0 %v3003_v12  ;;  %v2955_v53 = vmax.f32 %v2529_v27, 0.0  ;;  %v2533_v57 = vadd.f32 %v6059_v17, %v2340_v34 }
 0x250   : > { %v2534_v44 = vpop.f32.mrf.mxu1  ;;  %v6063_v36 = vpop.f32.mrf.mxu0 }
 0x251   : > { %v3009_v11 = vpack.c.bf16 %v2955_v53, %v2952_v43  ;;  %v2535_v15 = vadd.f32 %v2534_v44, %v2342_v0  ;;  %v2352_v44 = vadd.f32 %v6006_v21, %v5791_v37  ;;  %v3862_v37 = vadd.f32 %v6044_v25, %v6042_v24 }
 0x252   : > { %v2536_v42 = vpop.f32.mrf.mxu1  ;;  %v6067_v26 = vpop.f32.mrf.mxu0 }
 0x253   : > { %v2958_v9 = vmax.f32 %v2535_v15, 0.0  ;;  %v2537_v1 = vadd.f32 %v2536_v42, %v2344_v7  ;;  %v3865_v42 = vadd.f32 %v6054_v32, %v6048_v33  ;;  %v2594_v25 = vadd.f32 %v3862_v37, %v6103_v18 }
 0x254   : > { %v2538_v22 = vpop.f32.mrf.mxu1  ;;  %v6073_v63 = vpop.f32.mrf.mxu0  ;;  %v2350_v33 = vadd.f32 %v6002_v46, %v5812_v28 }
 0x255   : > { %v2539_v20 = vadd.f32 %v2538_v22, %v2346_v23  ;;  %v2951_v22 = vmax.f32 %v2523_v39, 0.0  ;;  %v2960_v4 = vmax.f32 %v2537_v1, 0.0  ;;  %v2957_v39 = vmax.f32 %v2533_v57, 0.0 }
 0x256   : > { %v6078_v30 = vpop.f32.mrf.mxu1  ;;  %v6080_v6 = vpop.f32.mrf.mxu0  ;;  %3337 = vmatmul.mubr.bf16.gmra.mxu0 %v3002_v35 }
 0x257   : > { %3344 = vmatprep.mubr.bf16.mxu0 %v3006_v29  ;;  %v2961_v2 = vmax.f32 %v2539_v20, 0.0  ;;  %v2589_v29 = vadd.f32 %v3859_v5, %v6103_v18  ;;  %v3008_v27 = vpack.c.bf16 %v2954_v19, %v2951_v22  ;;  %v2354_v20 = vadd.f32 %v6010_v51, %v5812_v28 }
 0x258   : > { %v2544_v55 = vpop.f32.mrf.mxu1  ;;  %v6082_v48 = vpop.f32.mrf.mxu0  ;;  %v3011_v32 = vpack.c.bf16 %v2960_v4, %v2957_v39  ;;  %v2597_v19 = vadd.f32 %v3865_v42, %v6103_v18  ;;  %v3868_v28 = vadd.f32 %v6063_v36, %v6061_v31 }
 0x259   : > { %v3012_v54 = vpack.c.bf16 %v2961_v2, %v2958_v9  ;;  %v2545_v21 = vadd.f32 %v2544_v55, %v2352_v44  ;;  %v3874_v57 = vadd.f32 %v6082_v48, %v6080_v6 }
 0x25a   : > { %v6086_v45 = vpop.f32.mrf.mxu1  ;;  %v6088_v61 = vpop.f32.mrf.mxu0  ;;  %v2602_v1 = vadd.f32 %v3868_v28, %v6103_v18 }
 0x25b   : > { %v2964_v55 = vmax.f32 %v2545_v21, 0.0  ;;  %v2547_v59 = vadd.f32 %v6086_v45, %v2354_v20 }
 0x25c   : > { %v2548_v10 = vpop.f32.mrf.mxu1  ;;  %v6094_v12 = vpop.f32.mrf.mxu0 }
 0x25d   : > { %v2549_v53 = vadd.f32 %v2548_v10, %v2356_v41  ;;  %v2966_v45 = vmax.f32 %v2547_v59, 0.0  ;;  %v3871_v41 = vadd.f32 %v6073_v63, %v6067_v26 }
 0x25e   : > { %v6099_v60 = vpop.f32.mrf.mxu0  ;;  %v3966_v8 = vpop.f32.mrf.mxu1  ;;  %3345 = vmatmul.mubr.bf16.gmra.mxu0 %v3005_v62 }
 0x25f   : > { %3352 = vmatprep.mubr.bf16.mxu0 %v3009_v11  ;;  %v2967_v10 = vmax.f32 %v2549_v53, 0.0  ;;  %v2605_v53 = vadd.f32 %v3871_v41, %v6103_v18 }
 0x260   : > { %v6109_v3 = vpop.f32.mrf.mxu0  ;;  %v3967_v13 = vpop.f32.mrf.mxu1 }
 0x261   : > { %v3968_v35 = vadd.f32 %v3967_v13, %v3966_v8  ;;  %v3015_v51 = vpack.c.bf16 %v2967_v10, %v2964_v55 }
 0x262   : > { %v6113_v38 = vpop.f32.mrf.mxu0  ;;  %v3969_v58 = vpop.f32.mrf.mxu1 }
 0x263   : > { %v2747_v52 = vadd.f32 %v3968_v35, %v2586_v56  ;;  %v2543_v35 = vadd.f32 %v6078_v30, %v2350_v33 }
 0x264   : > { %v6123_v40 = vpop.f32.mrf.mxu0  ;;  %v3970_v14 = vpop.f32.mrf.mxu1 }
 0x265   : > { %v3971_v49 = vadd.f32 %v3970_v14, %v3969_v58  ;;  %v2875_v0 = vmax.f32 %v2747_v52, 0.0  ;;  %v2963_v30 = vmax.f32 %v2543_v35, 0.0 }
 0x266   : > { %v6126_v16 = vpop.f32.mrf.mxu0  ;;  %v3972_v23 = vpop.f32.mrf.mxu1  ;;  %3353 = vmatmul.mubr.bf16.gmra.mxu0 %v3008_v27 }
 0x267   : > { %v2750_v43 = vadd.f32 %v3971_v49, %v2589_v29  ;;  %3360 = vmatprep.mubr.bf16.mxu0 %v3012_v54  ;;  %v3014_v31 = vpack.c.bf16 %v2966_v45, %v2963_v30 }
 0x268   : > { %v6132_v62 = vpop.f32.mrf.mxu0  ;;  %v3973_v50 = vpop.f32.mrf.mxu1 }
 0x269   : > { %v2878_v17 = vmax.f32 %v2750_v43, 0.0  ;;  %v3974_v11 = vadd.f32 %v3973_v50, %v3972_v23  ;;  %v3877_v43 = vadd.f32 %v6094_v12, %v6088_v61  ;;  %v3880_v12 = vadd.f32 %v6109_v3, %v6099_v60 }
 0x26a   : > { %v6136_v8 = vpop.f32.mrf.mxu0  ;;  %v3975_v24 = vpop.f32.mrf.mxu1 }
 0x26b   : > { %v2971_v47 = vpack.c.bf16 %v2878_v17, %v2875_v0  ;;  %v2755_v13 = vadd.f32 %v3974_v11, %v2594_v25  ;;  %v2610_v17 = vadd.f32 %v3874_v57, %v6103_v18  ;;  %v2613_v6 = vadd.f32 %v3877_v43, %v6103_v18 }
 0x26c   : > { %v6142_v15 = vpop.f32.mrf.mxu0  ;;  %v3976_v5 = vpop.f32.mrf.mxu1 }
 0x26d   : > { %v3977_v2 = vadd.f32 %v3976_v5, %v3975_v24  ;;  %4214 = vmatprep.mubr.bf16.mxu1 %v2971_v47  ;;  %v2881_v56 = vmax.f32 %v2755_v13, 0.0 }
 0x26e   : > { %v6146_v7 = vpop.f32.mrf.mxu0  ;;  %v3978_v22 = vpop.f32.mrf.mxu1  ;;  %3361 = vmatmul.mubr.bf16.gmra.mxu0 %v3011_v32  ;;  %v3883_v32 = vadd.f32 %v6123_v40, %v6113_v38  ;;  %v3886_v40 = vadd.f32 %v6132_v62, %v6126_v16 }
 0x26f   : > { %v2758_v46 = vadd.f32 %v3977_v2, %v2597_v19  ;;  %3368 = vmatprep.mubr.bf16.mxu0 %v3015_v51  ;;  %v2618_v2 = vadd.f32 %v3880_v12, %v6103_v18 }
 0x270   : > { %v6150_v58 = vpop.f32.mrf.mxu0  ;;  %v3979_v34 = vpop.f32.mrf.mxu1  ;;  %v2621_v60 = vadd.f32 %v3883_v32, %v6103_v18 }
 0x271   : > { %v2884_v9 = vmax.f32 %v2758_v46, 0.0  ;;  %v3980_v44 = vadd.f32 %v3979_v34, %v3978_v22 }
 0x272   : > { %v6154_v29 = vpop.f32.mrf.mxu0  ;;  %v3981_v27 = vpop.f32.mrf.mxu1 }
 0x273   : > { %v2974_v14 = vpack.c.bf16 %v2884_v9, %v2881_v56  ;;  %v2763_v52 = vadd.f32 %v3980_v44, %v2602_v1  ;;  %v3889_v9 = vadd.f32 %v6142_v15, %v6136_v8  ;;  %v3892_v15 = vadd.f32 %v6150_v58, %v6146_v7 }
 0x274   : > { %v6157_v36 = vpop.f32.mrf.mxu0  ;;  %v3982_v54 = vpop.f32.mrf.mxu1 }
 0x275   : > { %v3983_v49 = vadd.f32 %v3982_v54, %v3981_v27  ;;  %4215 = vmatmul.mubr.bf16.vlgmr.msra.gmra.mxu1 %v2974_v14  ;;  %v2887_v42 = vmax.f32 %v2763_v52, 0.0  ;;  %v2629_v16 = vadd.f32 %v3889_v9, %v6103_v18  ;;  %v3895_v43 = vadd.f32 %v6157_v36, %v6154_v29 }
 0x276   : > { %v6160_v26 = vpop.f32.mrf.mxu0  ;;  %v3984_v63 = vpop.f32.mrf.mxu1  ;;  %3369 = vmatmul.mubr.bf16.gmra.mxu0 %v3014_v31  ;;  %v2626_v31 = vadd.f32 %v3886_v40, %v6103_v18 }
 0x277   : > { %v2766_v23 = vadd.f32 %v3983_v49, %v2605_v53  ;;  %v2637_v7 = vadd.f32 %v3895_v43, %v6103_v18 }
 0x278   : > { %v6164_v37 = vpop.f32.mrf.mxu0  ;;  %v3985_v21 = vpop.f32.mrf.mxu1 }
 0x279   : > { %v2890_v4 = vmax.f32 %v2766_v23, 0.0  ;;  %v3986_v50 = vadd.f32 %v3985_v21, %v3984_v63  ;;  %v3898_v36 = vadd.f32 %v6164_v37, %v6160_v26 }
 0x27a   : > { %v6168_v10 = vpop.f32.mrf.mxu0  ;;  %v3987_v0 = vpop.f32.mrf.mxu1 }
 0x27b   : > { %v2977_v11 = vpack.c.bf16 %v2890_v4, %v2887_v42  ;;  %v2771_v48 = vadd.f32 %v3986_v50, %v2610_v17 }
 0x27c   : > { %v6171_v20 = vpop.f32.mrf.mxu0  ;;  %v3988_v39 = vpop.f32.mrf.mxu1 }
 0x27d   : > { %v3989_v24 = vadd.f32 %v3988_v39, %v3987_v0  ;;  %4218 = vmatprep.mubr.bf16.mxu1 %v2977_v11  ;;  %v2893_v59 = vmax.f32 %v2771_v48, 0.0  ;;  %v2634_v11 = vadd.f32 %v3892_v15, %v6103_v18  ;;  %v3901_v32 = vadd.f32 %v6171_v20, %v6168_v10 }
 0x27e   : > { %v6174_v25 = vpop.f32.mrf.mxu0  ;;  %v3990_v61 = vpop.f32.mrf.mxu1 }
 0x27f   : > { %v2774_v55 = vadd.f32 %v3989_v24, %v2613_v6  ;;  %v2645_v26 = vadd.f32 %v3901_v32, %v6103_v18 }
 0x280   : > { %v6178_v47 = vpop.f32.mrf.mxu0  ;;  %v3991_v33 = vpop.f32.mrf.mxu1 }
 0x281   : > { %v2896_v5 = vmax.f32 %v2774_v55, 0.0  ;;  %v3992_v19 = vadd.f32 %v3991_v33, %v3990_v61  ;;  %v3904_v20 = vadd.f32 %v6178_v47, %v6174_v25 }
 0x282   : > { %v6182_v51 = vpop.f32.mrf.mxu0  ;;  %v3993_v13 = vpop.f32.mrf.mxu1 }
 0x283   : > { %v2980_v35 = vpack.c.bf16 %v2896_v5, %v2893_v59  ;;  %v2779_v3 = vadd.f32 %v3992_v19, %v2618_v2 }
 0x284   : > { %v6185_v22 = vpop.f32.mrf.mxu0  ;;  %v3994_v28 = vpop.f32.mrf.mxu1 }
 0x285   : > { %v3995_v46 = vadd.f32 %v3994_v28, %v3993_v13  ;;  %4219 = vmatmul.mubr.bf16.gmra.mxu1 %v2980_v35  ;;  %v2899_v44 = vmax.f32 %v2779_v3, 0.0  ;;  %v2642_v35 = vadd.f32 %v3898_v36, %v6103_v18  ;;  %v3907_v9 = vadd.f32 %v6185_v22, %v6182_v51 }
 0x286   : > { %v6188_v45 = vpop.f32.mrf.mxu0  ;;  %v3996_v38 = vpop.f32.mrf.mxu1 }
 0x287   : > { %v2782_v34 = vadd.f32 %v3995_v46, %v2621_v60  ;;  %v2653_v25 = vadd.f32 %v3907_v9, %v6103_v18 }
 0x288   : > { %v6192_v41 = vpop.f32.mrf.mxu0  ;;  %v3997_v56 = vpop.f32.mrf.mxu1 }
 0x289   : > { %v2902_v30 = vmax.f32 %v2782_v34, 0.0  ;;  %v3998_v27 = vadd.f32 %v3997_v56, %v3996_v38  ;;  %v3910_v22 = vadd.f32 %v6192_v41, %v6188_v45 }
 0x28a   : > { %v6196_v1 = vpop.f32.mrf.mxu0  ;;  %v3999_v14 = vpop.f32.mrf.mxu1 }
 0x28b   : > { %v2983_v54 = vpack.c.bf16 %v2902_v30, %v2899_v44  ;;  %v2787_v62 = vadd.f32 %v3998_v27, %v2626_v31 }
 0x28c   : > { %v6199_v53 = vpop.f32.mrf.mxu0  ;;  %v4000_v52 = vpop.f32.mrf.mxu1 }
 0x28d   : > { %v4001_v49 = vadd.f32 %v4000_v52, %v3999_v14  ;;  %4222 = vmatprep.mubr.bf16.mxu1 %v2983_v54  ;;  %v2905_v42 = vmax.f32 %v2787_v62, 0.0  ;;  %v2650_v54 = vadd.f32 %v3904_v20, %v6103_v18  ;;  %v3913_v43 = vadd.f32 %v6199_v53, %v6196_v1 }
 0x28e   : > { %v6202_v63 = vpop.f32.mrf.mxu0  ;;  %v4002_v8 = vpop.f32.mrf.mxu1 }
 0x28f   : > { %v2790_v57 = vadd.f32 %v4001_v49, %v2629_v16  ;;  %v2661_v45 = vadd.f32 %v3913_v43, %v6103_v18 }
 0x290   : > { %v6206_v23 = vpop.f32.mrf.mxu0  ;;  %v4003_v21 = vpop.f32.mrf.mxu1 }
 0x291   : > { %v2908_v4 = vmax.f32 %v2790_v57, 0.0  ;;  %v4004_v50 = vadd.f32 %v4003_v21, %v4002_v8  ;;  %v3916_v53 = vadd.f32 %v6206_v23, %v6202_v63 }
 0x292   : > { %v6210_v0 = vpop.f32.mrf.mxu0  ;;  %v4005_v17 = vpop.f32.mrf.mxu1 }
 0x293   : > { %v2986_v39 = vpack.c.bf16 %v2908_v4, %v2905_v42  ;;  %v2795_v58 = vadd.f32 %v4004_v50, %v2634_v11 }
 0x294   : > { %v6213_v6 = vpop.f32.mrf.mxu0  ;;  %v4006_v48 = vpop.f32.mrf.mxu1 }
 0x295   : > { %v4007_v24 = vadd.f32 %v4006_v48, %v4005_v17  ;;  %4223 = vmatmul.mubr.bf16.gmra.mxu1 %v2986_v39  ;;  %v2911_v59 = vmax.f32 %v2795_v58, 0.0  ;;  %v2658_v39 = vadd.f32 %v3910_v22, %v6103_v18  ;;  %v3919_v32 = vadd.f32 %v6213_v6, %v6210_v0 }
 0x296   : > { %v6216_v61 = vpop.f32.mrf.mxu0  ;;  %v4008_v29 = vpop.f32.mrf.mxu1 }
 0x297   : > { %v2798_v12 = vadd.f32 %v4007_v24, %v2637_v7  ;;  %v2669_v63 = vadd.f32 %v3919_v32, %v6103_v18 }
 0x298   : > { %v6220_v55 = vpop.f32.mrf.mxu0  ;;  %v4009_v33 = vpop.f32.mrf.mxu1 }
 0x299   : > { %v2914_v5 = vmax.f32 %v2798_v12, 0.0  ;;  %v4010_v19 = vadd.f32 %v4009_v33, %v4008_v29  ;;  %v3922_v6 = vadd.f32 %v6220_v55, %v6216_v61 }
 0x29a   : > { %v6224_v13 = vpop.f32.mrf.mxu0  ;;  %v4011_v2 = vpop.f32.mrf.mxu1 }
 0x29b   : > { %v2989_v28 = vpack.c.bf16 %v2914_v5, %v2911_v59  ;;  %v2803_v37 = vadd.f32 %v4010_v19, %v2642_v35 }
 0x29c   : > { %v6227_v60 = vpop.f32.mrf.mxu0  ;;  %v4012_v3 = vpop.f32.mrf.mxu1 }
 0x29d   : > { %v4013_v46 = vadd.f32 %v4012_v3, %v4011_v2  ;;  %4226 = vmatprep.mubr.bf16.mxu1 %v2989_v28  ;;  %v2917_v44 = vmax.f32 %v2803_v37, 0.0  ;;  %v2666_v28 = vadd.f32 %v3916_v53, %v6103_v18  ;;  %v3925_v9 = vadd.f32 %v6227_v60, %v6224_v13 }
 0x29e   : > { %v6230_v38 = vpop.f32.mrf.mxu0  ;;  %v4014_v10 = vpop.f32.mrf.mxu1 }
 0x29f   : > { %v2806_v40 = vadd.f32 %v4013_v46, %v2645_v26  ;;  %v2677_v61 = vadd.f32 %v3925_v9, %v6103_v18 }
 0x2a0   : > { %v6234_v34 = vpop.f32.mrf.mxu0  ;;  %v4015_v56 = vpop.f32.mrf.mxu1 }
 0x2a1   : > { %v2920_v30 = vmax.f32 %v2806_v40, 0.0  ;;  %v4016_v27 = vadd.f32 %v4015_v56, %v4014_v10  ;;  %v3928_v13 = vadd.f32 %v6234_v34, %v6230_v38 }
 0x2a2   : > { %v6238_v14 = vpop.f32.mrf.mxu0  ;;  %v4017_v31 = vpop.f32.mrf.mxu1 }
 0x2a3   : > { %v2992_v52 = vpack.c.bf16 %v2920_v30, %v2917_v44  ;;  %v2811_v47 = vadd.f32 %v4016_v27, %v2650_v54 }
 0x2a4   : > { %v6241_v16 = vpop.f32.mrf.mxu0  ;;  %v4018_v62 = vpop.f32.mrf.mxu1 }
 0x2a5   : > { %v4019_v49 = vadd.f32 %v4018_v62, %v4017_v31  ;;  %4227 = vmatmul.mubr.bf16.gmra.mxu1 %v2992_v52  ;;  %v2923_v42 = vmax.f32 %v2811_v47, 0.0  ;;  %v2674_v52 = vadd.f32 %v3922_v6, %v6103_v18  ;;  %v3931_v43 = vadd.f32 %v6241_v16, %v6238_v14 }
 0x2a6   : > { %v6244_v8 = vpop.f32.mrf.mxu0  ;;  %v4020_v51 = vpop.f32.mrf.mxu1 }
 0x2a7   : > { %v2814_v15 = vadd.f32 %v4019_v49, %v2653_v25  ;;  %v2685_v38 = vadd.f32 %v3931_v43, %v6103_v18 }
 0x2a8   : > { %v6248_v57 = vpop.f32.mrf.mxu0  ;;  %v4021_v21 = vpop.f32.mrf.mxu1 }
 0x2a9   : > { %v2926_v4 = vmax.f32 %v2814_v15, 0.0  ;;  %v4022_v50 = vadd.f32 %v4021_v21, %v4020_v51  ;;  %v3934_v14 = vadd.f32 %v6248_v57, %v6244_v8 }
 0x2aa   : > { %v6252_v17 = vpop.f32.mrf.mxu0  ;;  %v4023_v11 = vpop.f32.mrf.mxu1 }
 0x2ab   : > { %v2995_v48 = vpack.c.bf16 %v2926_v4, %v2923_v42  ;;  %v2819_v41 = vadd.f32 %v4022_v50, %v2658_v39 }
 0x2ac   : > { %v6255_v7 = vpop.f32.mrf.mxu0  ;;  %v4024_v58 = vpop.f32.mrf.mxu1 }
 0x2ad   : > { %v4025_v24 = vadd.f32 %v4024_v58, %v4023_v11  ;;  %4230 = vmatprep.mubr.bf16.mxu1 %v2995_v48  ;;  %v2929_v59 = vmax.f32 %v2819_v41, 0.0  ;;  %v2682_v48 = vadd.f32 %v3928_v13, %v6103_v18  ;;  %v3937_v32 = vadd.f32 %v6255_v7, %v6252_v17 }
 0x2ae   : > { %v6258_v29 = vpop.f32.mrf.mxu0  ;;  %v4026_v1 = vpop.f32.mrf.mxu1 }
 0x2af   : > { %v2822_v36 = vadd.f32 %v4025_v24, %v2661_v45  ;;  %v2693_v8 = vadd.f32 %v3937_v32, %v6103_v18 }
 0x2b0   : > { %v6262_v12 = vpop.f32.mrf.mxu0  ;;  %v4027_v33 = vpop.f32.mrf.mxu1 }
 0x2b1   : > { %v2932_v5 = vmax.f32 %v2822_v36, 0.0  ;;  %v4028_v19 = vadd.f32 %v4027_v33, %v4026_v1  ;;  %v3940_v17 = vadd.f32 %v6262_v12, %v6258_v29 }
 0x2b2   : > { %v6266_v2 = vpop.f32.mrf.mxu0  ;;  %v4029_v35 = vpop.f32.mrf.mxu1 }
 0x2b3   : > { %v2998_v3 = vpack.c.bf16 %v2932_v5, %v2929_v59  ;;  %v2827_v23 = vadd.f32 %v4028_v19, %v2666_v28 }
 0x2b4   : > { %v6269_v26 = vpop.f32.mrf.mxu0  ;;  %v4030_v37 = vpop.f32.mrf.mxu1 }
 0x2b5   : > { %v4031_v46 = vadd.f32 %v4030_v37, %v4029_v35  ;;  %4231 = vmatmul.mubr.bf16.gmra.mxu1 %v2998_v3  ;;  %v2935_v44 = vmax.f32 %v2827_v23, 0.0  ;;  %v2690_v3 = vadd.f32 %v3934_v14, %v6103_v18  ;;  %v3943_v9 = vadd.f32 %v6269_v26, %v6266_v2 }
 0x2b6   : > { %v6272_v10 = vpop.f32.mrf.mxu0  ;;  %v4032_v0 = vpop.f32.mrf.mxu1 }
 0x2b7   : > { %v2830_v20 = vadd.f32 %v4031_v46, %v2669_v63  ;;  %v2701_v29 = vadd.f32 %v3943_v9, %v6103_v18 }
 0x2b8   : > { %v6276_v40 = vpop.f32.mrf.mxu0  ;;  %v4033_v56 = vpop.f32.mrf.mxu1 }
 0x2b9   : > { %v2938_v30 = vmax.f32 %v2830_v20, 0.0  ;;  %v4034_v27 = vadd.f32 %v4033_v56, %v4032_v0  ;;  %v3946_v2 = vadd.f32 %v6276_v40, %v6272_v10 }
 0x2ba   : > { %v6280_v31 = vpop.f32.mrf.mxu0  ;;  %v4035_v54 = vpop.f32.mrf.mxu1 }
 0x2bb   : > { %v3001_v62 = vpack.c.bf16 %v2938_v30, %v2935_v44  ;;  %v2835_v55 = vadd.f32 %v4034_v27, %v2674_v52 }
 0x2bc   : > { %v6283_v25 = vpop.f32.mrf.mxu0  ;;  %v4036_v47 = vpop.f32.mrf.mxu1 }
 0x2bd   : > { %v4037_v49 = vadd.f32 %v4036_v47, %v4035_v54  ;;  %4234 = vmatprep.mubr.bf16.mxu1 %v3001_v62  ;;  %v2941_v42 = vmax.f32 %v2835_v55, 0.0  ;;  %v2698_v62 = vadd.f32 %v3940_v17, %v6103_v18 }
 0x2be   : > { %v4038_v51 = vpop.f32.mrf.mxu1  ;;  %v6286_v22 = vpop.f32.mrf.mxu0 }
 0x2bf   : > { %v2838_v60 = vadd.f32 %v4037_v49, %v2677_v61 }
 0x2c0   : > { %v4039_v15 = vpop.f32.mrf.mxu1  ;;  %v6290_v21 = vpop.f32.mrf.mxu0 }
 0x2c1   : > { %v2944_v4 = vmax.f32 %v2838_v60, 0.0  ;;  %v4040_v50 = vadd.f32 %v4039_v15, %v4038_v51  ;;  %v3949_v15 = vadd.f32 %v6283_v25, %v6280_v31 }
 0x2c2   : > { %v4041_v11 = vpop.f32.mrf.mxu1  ;;  %v6294_v39 = vpop.f32.mrf.mxu0 }
 0x2c3   : > { %v3004_v58 = vpack.c.bf16 %v2944_v4, %v2941_v42  ;;  %v2843_v34 = vadd.f32 %v4040_v50, %v2682_v48  ;;  %v2706_v48 = vadd.f32 %v3946_v2, %v6103_v18 }
 0x2c4   : > { %v4042_v45 = vpop.f32.mrf.mxu1  ;;  %v6297_v41 = vpop.f32.mrf.mxu0 }
 0x2c5   : > { %v4043_v24 = vadd.f32 %v4042_v45, %v4041_v11  ;;  %4235 = vmatmul.mubr.bf16.gmra.mxu1 %v3004_v58  ;;  %v2947_v59 = vmax.f32 %v2843_v34, 0.0 }
 0x2c6   : > { %v4044_v1 = vpop.f32.mrf.mxu1  ;;  %v6300_v53 = vpop.f32.mrf.mxu0 }
 0x2c7   : > { %v2846_v16 = vadd.f32 %v4043_v24, %v2685_v38  ;;  %v2709_v38 = vadd.f32 %v3949_v15, %v6103_v18 }
 0x2c8   : > { %v4045_v36 = vpop.f32.mrf.mxu1  ;;  %v6304_v33 = vpop.f32.mrf.mxu0 }
 0x2c9   : > { %v2950_v5 = vmax.f32 %v2846_v16, 0.0  ;;  %v4046_v19 = vadd.f32 %v4045_v36, %v4044_v1 }
 0x2ca   : > { %v4047_v35 = vpop.f32.mrf.mxu1  ;;  %v6308_v28 = vpop.f32.mrf.mxu0 }
 0x2cb   : > { %v3007_v37 = vpack.c.bf16 %v2950_v5, %v2947_v59  ;;  %v2851_v57 = vadd.f32 %v4046_v19, %v2690_v3 }
 0x2cc   : > { %v4048_v63 = vpop.f32.mrf.mxu1  ;;  %v6311_v23 = vpop.f32.mrf.mxu0 }
 0x2cd   : > { %v4049_v46 = vadd.f32 %v4048_v63, %v4047_v35  ;;  %4238 = vmatprep.mubr.bf16.mxu1 %v3007_v37  ;;  %v2953_v44 = vmax.f32 %v2851_v57, 0.0 }
 0x2ce   : > { %v4050_v0 = vpop.f32.mrf.mxu1  ;;  %v6314_v6 = vpop.f32.mrf.mxu0 }
 0x2cf   : > { %v2854_v7 = vadd.f32 %v4049_v46, %v2693_v8 }
 0x2d0   : > { %v4051_v20 = vpop.f32.mrf.mxu1  ;;  %v6318_v56 = vpop.f32.mrf.mxu0 }
 0x2d1   : > { %v2956_v30 = vmax.f32 %v2854_v7, 0.0  ;;  %v4052_v27 = vadd.f32 %v4051_v20, %v4050_v0 }
 0x2d2   : > { %v4053_v54 = vpop.f32.mrf.mxu1  ;;  %v6322_v52 = vpop.f32.mrf.mxu0 }
 0x2d3   : > { %v3010_v47 = vpack.c.bf16 %v2956_v30, %v2953_v44  ;;  %v2859_v12 = vadd.f32 %v4052_v27, %v2698_v62  ;;  %v4086_v44 = vadd.f32 %v6304_v33, %v6300_v53  ;;  %v4080_v27 = vadd.f32 %v6290_v21, %v6286_v22 }
 0x2d4   : > { %v4054_v61 = vpop.f32.mrf.mxu1  ;;  %v6325_v55 = vpop.f32.mrf.mxu0  ;;  %v4089_v62 = vadd.f32 %v6311_v23, %v6308_v28  ;;  %v4083_v53 = vadd.f32 %v6297_v41, %v6294_v39 }
 0x2d5   : > { %v4055_v49 = vadd.f32 %v4054_v61, %v4053_v54  ;;  %4239 = vmatmul.mubr.bf16.gmra.mxu1 %v3010_v47  ;;  %v2959_v43 = vmax.f32 %v2859_v12, 0.0  ;;  %v6383_v54 = vld [vmem:[%s6542_s7] ss:$0 sm:$0xff] }
 0x2d6   : > { %v4056_v51 = vpop.f32.mrf.mxu1  ;;  %v6328_v13 = vpop.f32.mrf.mxu0  ;;  %v3259_v47 = vadd.f32 %v4086_v44, %v6383_v54  ;;  %v3251_v22 = vadd.f32 %v4080_v27, %v6383_v54  ;;  %v3254_v2 = vadd.f32 %v4083_v53, %v6383_v54 }
 0x2d7   : > { %v2862_v26 = vadd.f32 %v4055_v49, %v2701_v29  ;;  %v3262_v49 = vadd.f32 %v4089_v62, %v6383_v54 }
 0x2d8   : > { %v4057_v60 = vpop.f32.mrf.mxu1  ;;  %v4097_v50 = vpop.f32.mrf.mxu0 }
 0x2d9   : > { %v2962_v42 = vmax.f32 %v2862_v26, 0.0  ;;  %v4058_v4 = vadd.f32 %v4057_v60, %v4056_v51  ;;  %v4098_v41 = vadd.f32 %v4097_v50, %v6328_v13  ;;  %v4095_v50 = vadd.f32 %v6325_v55, %v6322_v52 }
 0x2da   : > { %v4059_v11 = vpop.f32.mrf.mxu1  ;;  %v4099_v24 = vpop.f32.mrf.mxu0 }
 0x2db   : > { %v3013_v58 = vpack.c.bf16 %v2962_v42, %v2959_v43  ;;  %v2867_v34 = vadd.f32 %v4058_v4, %v2706_v48  ;;  %v4092_v43 = vadd.f32 %v6318_v56, %v6314_v6  ;;  %v3275_v4 = vadd.f32 %v4098_v41, %v6383_v54 }
 0x2dc   : > { %v4060_v45 = vpop.f32.mrf.mxu1  ;;  %v4100_v16 = vpop.f32.mrf.mxu0  ;;  %v3270_v52 = vadd.f32 %v4095_v50, %v6383_v54 }
 0x2dd   : > { %v4061_v1 = vadd.f32 %v4060_v45, %v4059_v11  ;;  %4242 = vmatprep.mubr.bf16.mxu1 %v3013_v58  ;;  %v2965_v40 = vmax.f32 %v2867_v34, 0.0  ;;  %v4101_v42 = vadd.f32 %v4100_v16, %v4099_v24  ;;  %v3267_v56 = vadd.f32 %v4092_v43, %v6383_v54 }
 0x2de   : > { %v6336_v25 = vpop.f32.mrf.mxu0 }
 0x2df   : > { %v2870_v10 = vadd.f32 %v4061_v1, %v2709_v38  ;;  %v3278_v34 = vadd.f32 %v4101_v42, %v6383_v54 }
 0x2e0   : > { %v6338_v36 = vpop.f32.mrf.mxu0 }
 0x2e1   : > { %v2968_v14 = vmax.f32 %v2870_v10, 0.0  ;;  %v4104_v62 = vadd.f32 %v6338_v36, %v6336_v25 }
 0x2e2   : > { %v6340_v32 = vpop.f32.mrf.mxu0 }
 0x2e3   : > { %v3016_v31 = vpack.c.bf16 %v2968_v14, %v2965_v40 }
 0x2e4   : > { %v6342_v59 = vpop.f32.mrf.mxu0 }
 0x2e5   : > { %4243 = vmatmul.mubr.bf16.gmra.mxu1 %v3016_v31 }
 0x2e6   : > { %v6344_v5 = vpop.f32.mrf.mxu0 }
 0x2e8   : > { %v6346_v18 = vpop.f32.mrf.mxu0 }
 0x2e9   : > { %v4110_v44 = vadd.f32 %v6346_v18, %v6344_v5  ;;  %v3283_v18 = vadd.f32 %v4104_v62, %v6383_v54 }
 0x2ea   : > { %v6348_v19 = vpop.f32.mrf.mxu0 }
 0x2ec   : > { %v6350_v35 = vpop.f32.mrf.mxu0 }
 0x2ee   : > { %v6352_v3 = vpop.f32.mrf.mxu0 }
 0x2f0   : > { %v6354_v37 = vpop.f32.mrf.mxu0 }
 0x2f1   : > { %v4116_v42 = vadd.f32 %v6354_v37, %v6352_v3 }
 0x2f2   : > { %v6356_v63 = vpop.f32.mrf.mxu0 }
 0x2f4   : > { %v6358_v8 = vpop.f32.mrf.mxu0 }
 0x2f6   : > { %v6360_v57 = vpop.f32.mrf.mxu0 }
 0x2f8   : > { %v6362_v46 = vpop.f32.mrf.mxu0 }
 0x2f9   : > { %v4122_v41 = vadd.f32 %v6362_v46, %v6360_v57  ;;  %v3299_v46 = vadd.f32 %v4116_v42, %v6383_v54 }
 0x2fa   : > { %v6364_v0 = vpop.f32.mrf.mxu0 }
 0x2fc   : > { %v6366_v17 = vpop.f32.mrf.mxu0 }
 0x2fe   : > { %v6368_v7 = vpop.f32.mrf.mxu0 }
 0x300   : > { %v6370_v20 = vpop.f32.mrf.mxu0 }
 0x302   : > { %v6372_v9 = vpop.f32.mrf.mxu0 }
 0x304   : > { %v6376_v30 = vpop.f32.mrf.mxu0 }
 0x306   : > { %v6388_v61 = vpop.f32.mrf.mxu0 }
 0x308   : > { %v6394_v51 = vpop.f32.mrf.mxu0 }
 0x30a   : > { %v6397_v39 = vpop.f32.mrf.mxu0 }
 0x30c   : > { %v6401_v15 = vpop.f32.mrf.mxu0 }
 0x30e   : > { %v6411_v48 = vpop.f32.mrf.mxu0 }
 0x310   : > { %v6419_v1 = vpop.f32.mrf.mxu0 }
 0x312   : > { %v6424_v31 = vpop.f32.mrf.mxu0 }
 0x314   : > { %v6428_v27 = vpop.f32.mrf.mxu0 }
 0x335   : > { %v4216_v29 = vpop.f32.mrf.mxu1 }
 0x336   : > { %v3420_v33 = vadd.f32 %v4216_v29, %v3259_v47  ;;  %v4113_v47 = vadd.f32 %v6350_v35, %v6348_v19  ;;  %v3291_v29 = vadd.f32 %v4110_v44, %v6383_v54 }
 0x337   : > { %v3411_v21 = vpop.f32.mrf.mxu1 }
 0x338   : > { %4487 = vtanh.f32 %v3420_v33  ;;  %v3412_v12 = vadd.f32 %v3411_v21, %v3251_v22  ;;  %v6435_v33 = vpop.f32.mrf.mxu0  ;;  %v4107_v21 = vadd.f32 %v6342_v59, %v6340_v32  ;;  %v3294_v19 = vadd.f32 %v4113_v47, %v6383_v54 }
 0x339   : > { %v4217_v28 = vpop.f32.mrf.mxu1 }
 0x33a   : > { %4489 = vtanh.f32 %v3412_v12  ;;  %v3423_v23 = vadd.f32 %v4217_v28, %v3262_v49  ;;  %v6443_v49 = vpop.f32.mrf.mxu0  ;;  %v3286_v32 = vadd.f32 %v4107_v21, %v6383_v54 }
 0x33b   : > { %v3414_v26 = vpop.f32.mrf.mxu1 }
 0x33c   : > { %4491 = vtanh.f32 %v3423_v23  ;;  %v3415_v60 = vadd.f32 %v3414_v26, %v3254_v2 }
 0x33e   : > { %4493 = vtanh.f32 %v3415_v60  ;;  %v6448_v60 = vpop.f32.mrf.mxu0 }
 0x340   : > { %v6452_v43 = vpop.f32.mrf.mxu0 }
 0x342   : > { %v6459_v50 = vpop.f32.mrf.mxu0 }
 0x345   : > { %v4488_v11 = vpop.eup %4487  ;;  %v4220_v13 = vpop.f32.mrf.mxu1 }
 0x346   : > { %3572 = vst [vmem:[%s6408_s15 + $0x10] sm:$0xff] %v4488_v11  ;;  %v3436_v6 = vadd.f32 %v4220_v13, %v3275_v4  ;;  %v4125_v4 = vadd.f32 %v6366_v17, %v6364_v0  ;;  %v3307_v11 = vadd.f32 %v4122_v41, %v6383_v54  ;;  %v4143_v41 = vadd.f32 %v6428_v27, %v6424_v31 }
 0x347   : > { %v4490_v58 = vpop.eup %4489  ;;  %v3427_v45 = vpop.f32.mrf.mxu1 }
 0x348   : > { %3570 = vst [vmem:[%s6408_s15] sm:$0xff] %v4490_v58  ;;  %4495 = vtanh.f32 %v3436_v6  ;;  %v3428_v38 = vadd.f32 %v3427_v45, %v3267_v56  ;;  %v4119_v56 = vadd.f32 %v6358_v8, %v6356_v63  ;;  %v3310_v0 = vadd.f32 %v4125_v4, %v6383_v54  ;;  %v6467_v45 = vpop.f32.mrf.mxu0 }
 0x349   : > { %v4492_v24 = vpop.eup %4491  ;;  %v4221_v10 = vpop.f32.mrf.mxu1  ;;  %v3334_v31 = vadd.f32 %v4143_v41, %v6383_v54 }
 0x34a   : > { %3573 = vst [vmem:[%s6408_s15 + $0x18] sm:$0xff] %v4492_v24  ;;  %4497 = vtanh.f32 %v3428_v38  ;;  %v3439_v40 = vadd.f32 %v4221_v10, %v3278_v34  ;;  %v3302_v63 = vadd.f32 %v4119_v56, %v6383_v54 }
 0x34b   : > { %v4494_v55 = vpop.eup %4493  ;;  %v3430_v14 = vpop.f32.mrf.mxu1 }
 0x34c   : > { %3571 = vst [vmem:[%s6408_s15 + $0x8] sm:$0xff] %v4494_v55  ;;  %4499 = vtanh.f32 %v3439_v40  ;;  %v3431_v16 = vadd.f32 %v3430_v14, %v3270_v52  ;;  %v6472_v40 = vpop.f32.mrf.mxu0  ;;  %v4134_v52 = vadd.f32 %v6394_v51, %v6388_v61  ;;  %v4128_v14 = vadd.f32 %v6370_v20, %v6368_v7 }
 0x34e   : > { %4501 = vtanh.f32 %v3431_v16  ;;  %v6476_v55 = vpop.f32.mrf.mxu0  ;;  %v4137_v16 = vadd.f32 %v6401_v15, %v6397_v39  ;;  %v3323_v44 = vadd.f32 %v4134_v52, %v6383_v54  ;;  %v3315_v61 = vadd.f32 %v4128_v14, %v6383_v54 }
 0x350   : > { %v4156_v47 = vpop.f32.mrf.mxu0  ;;  %v3326_v20 = vadd.f32 %v4137_v16, %v6383_v54 }
 0x352   : > { %v4157_v15 = vpop.f32.mrf.mxu0 }
 0x355   : > { %v4496_v53 = vpop.eup %4495  ;;  %v4224_v22 = vpop.f32.mrf.mxu1 }
 0x356   : > { %3576 = vst [vmem:[%s6408_s15 + $0x30] sm:$0xff] %v4496_v53  ;;  %v3452_v5 = vadd.f32 %v4224_v22, %v3291_v29  ;;  %v4131_v53 = vadd.f32 %v6376_v30, %v6372_v9 }
 0x357   : > { %v4498_v12 = vpop.eup %4497  ;;  %v3443_v25 = vpop.f32.mrf.mxu1 }
 0x358   : > { %3574 = vst [vmem:[%s6408_s15 + $0x20] sm:$0xff] %v4498_v12  ;;  %4503 = vtanh.f32 %v3452_v5  ;;  %v3444_v36 = vadd.f32 %v3443_v25, %v3283_v18  ;;  %v3318_v9 = vadd.f32 %v4131_v53, %v6383_v54 }
 0x359   : > { %v4500_v35 = vpop.eup %4499  ;;  %v4225_v28 = vpop.f32.mrf.mxu1 }
 0x35a   : > { %3577 = vst [vmem:[%s6408_s15 + $0x38] sm:$0xff] %v4500_v35  ;;  %4505 = vtanh.f32 %v3444_v36  ;;  %v3455_v23 = vadd.f32 %v4225_v28, %v3294_v19  ;;  %v4159_v36 = vpop.f32.mrf.mxu0  ;;  %v4146_v19 = vadd.f32 %v6443_v49, %v6435_v33  ;;  %v4140_v28 = vadd.f32 %v6419_v1, %v6411_v48 }
 0x35b   : > { %v4502_v59 = vpop.eup %4501  ;;  %v3446_v2 = vpop.f32.mrf.mxu1 }
 0x35c   : > { %3575 = vst [vmem:[%s6408_s15 + $0x28] sm:$0xff] %v4502_v59  ;;  %4507 = vtanh.f32 %v3455_v23  ;;  %v3447_v26 = vadd.f32 %v3446_v2, %v3286_v32  ;;  %v4160_v35 = vpop.f32.mrf.mxu0  ;;  %v4149_v23 = vadd.f32 %v6452_v43, %v6448_v60  ;;  %v3339_v32 = vadd.f32 %v4146_v19, %v6383_v54 }
 0x35d   : > { %v3331_v33 = vadd.f32 %v4140_v28, %v6383_v54 }
 0x35e   : > { %4509 = vtanh.f32 %v3447_v26  ;;  %v4162_v2 = vpop.f32.mrf.mxu0  ;;  %v3342_v1 = vadd.f32 %v4149_v23, %v6383_v54 }
 0x360   : > { %v4163_v43 = vpop.f32.mrf.mxu0 }
 0x365   : > { %v4504_v13 = vpop.eup %4503  ;;  %v4228_v6 = vpop.f32.mrf.mxu1 }
 0x366   : > { %3580 = vst [vmem:[%s6408_s15 + $0x50] sm:$0xff] %v4504_v13  ;;  %v3468_v57 = vadd.f32 %v4228_v6, %v3307_v11 }
 0x367   : > { %v4506_v58 = vpop.eup %4505  ;;  %v3459_v3 = vpop.f32.mrf.mxu1 }
 0x368   : > { %3578 = vst [vmem:[%s6408_s15 + $0x40] sm:$0xff] %v4506_v58  ;;  %4511 = vtanh.f32 %v3468_v57  ;;  %v3460_v37 = vadd.f32 %v3459_v3, %v3299_v46  ;;  %v4165_v57 = vpop.f32.mrf.mxu0  ;;  %v4158_v46 = vadd.f32 %v4157_v15, %v4156_v47  ;;  %v4152_v3 = vadd.f32 %v6467_v45, %v6459_v50 }
 0x369   : > { %v4508_v17 = vpop.eup %4507  ;;  %v4229_v38 = vpop.f32.mrf.mxu1 }
 0x36a   : > { %3581 = vst [vmem:[%s6408_s15 + $0x58] sm:$0xff] %v4508_v17  ;;  %4513 = vtanh.f32 %v3460_v37  ;;  %v3471_v34 = vadd.f32 %v4229_v38, %v3310_v0  ;;  %v4166_v58 = vpop.f32.mrf.mxu0  ;;  %v4161_v37 = vadd.f32 %v4160_v35, %v4159_v36  ;;  %v3355_v0 = vadd.f32 %v4158_v46, %v6383_v54 }
 0x36b   : > { %v4510_v8 = vpop.eup %4509  ;;  %v3462_v24 = vpop.f32.mrf.mxu1  ;;  %v4167_v15 = vadd.f32 %v4166_v58, %v4165_v57 }
 0x36c   : > { %3579 = vst [vmem:[%s6408_s15 + $0x48] sm:$0xff] %v4510_v8  ;;  %4515 = vtanh.f32 %v3471_v34  ;;  %v3463_v10 = vadd.f32 %v3462_v24, %v3302_v63  ;;  %v4168_v38 = vpop.f32.mrf.mxu0  ;;  %v4155_v63 = vadd.f32 %v6476_v55, %v6472_v40  ;;  %v3347_v24 = vadd.f32 %v4152_v3, %v6383_v54 }
 0x36d   : > { %v3358_v45 = vadd.f32 %v4161_v37, %v6383_v54  ;;  %v3366_v28 = vadd.f32 %v4167_v15, %v6383_v54 }
 0x36e   : > { %4517 = vtanh.f32 %v3463_v10  ;;  %v4169_v16 = vpop.f32.mrf.mxu0  ;;  %v3350_v40 = vadd.f32 %v4155_v63, %v6383_v54 }
 0x370   : > { %v4171_v53 = vpop.f32.mrf.mxu0 }
 0x375   : > { %v4512_v62 = vpop.eup %4511  ;;  %v4232_v29 = vpop.f32.mrf.mxu1 }
 0x376   : > { %3584 = vst [vmem:[%s6408_s15 + $0x70] sm:$0xff] %v4512_v62  ;;  %v3484_v22 = vadd.f32 %v4232_v29, %v3323_v44 }
 0x377   : > { %v4514_v51 = vpop.eup %4513  ;;  %v3475_v21 = vpop.f32.mrf.mxu1 }
 0x378   : > { %3582 = vst [vmem:[%s6408_s15 + $0x60] sm:$0xff] %v4514_v51  ;;  %4519 = vtanh.f32 %v3484_v22  ;;  %v3476_v7 = vadd.f32 %v3475_v21, %v3315_v61  ;;  %v4170_v22 = vadd.f32 %v4169_v16, %v4168_v38  ;;  %v4172_v61 = vpop.f32.mrf.mxu0  ;;  %v4164_v51 = vadd.f32 %v4163_v43, %v4162_v2 }
 0x379   : > { %v4516_v39 = vpop.eup %4515  ;;  %v4233_v5 = vpop.f32.mrf.mxu1  ;;  %v4173_v21 = vadd.f32 %v4172_v61, %v4171_v53 }
 0x37a   : > { %3585 = vst [vmem:[%s6408_s15 + $0x78] sm:$0xff] %v4516_v39  ;;  %4521 = vtanh.f32 %v3476_v7  ;;  %v3487_v18 = vadd.f32 %v4233_v5, %v3326_v20  ;;  %v3371_v7 = vadd.f32 %v4170_v22, %v6383_v54 }
 0x37b   : > { %v4518_v30 = vpop.eup %4517  ;;  %v3478_v12 = vpop.f32.mrf.mxu1 }
 0x37c   : > { %3583 = vst [vmem:[%s6408_s15 + $0x68] sm:$0xff] %v4518_v30  ;;  %4523 = vtanh.f32 %v3487_v18  ;;  %v3479_v25 = vadd.f32 %v3478_v12, %v3318_v9  ;;  %v3363_v18 = vadd.f32 %v4164_v51, %v6383_v54 }
 0x37e   : > { %4525 = vtanh.f32 %v3479_v25  ;;  %v3374_v25 = vadd.f32 %v4173_v21, %v6383_v54 }
 0x385   : > { %v4520_v59 = vpop.eup %4519  ;;  %v4236_v26 = vpop.f32.mrf.mxu1 }
 0x386   : > { %3588 = vst [vmem:[%s6408_s15 + $0x90] sm:$0xff] %v4520_v59  ;;  %v3500_v42 = vadd.f32 %v4236_v26, %v3339_v32 }
 0x387   : > { %v4522_v49 = vpop.eup %4521  ;;  %v3491_v4 = vpop.f32.mrf.mxu1 }
 0x388   : > { %3586 = vst [vmem:[%s6408_s15 + $0x80] sm:$0xff] %v4522_v49  ;;  %4527 = vtanh.f32 %v3500_v42  ;;  %v3492_v48 = vadd.f32 %v3491_v4, %v3331_v33 }
 0x389   : > { %v4524_v60 = vpop.eup %4523  ;;  %v4237_v11 = vpop.f32.mrf.mxu1 }
 0x38a   : > { %3589 = vst [vmem:[%s6408_s15 + $0x98] sm:$0xff] %v4524_v60  ;;  %4529 = vtanh.f32 %v3492_v48  ;;  %v3503_v13 = vadd.f32 %v4237_v11, %v3342_v1 }
 0x38b   : > { %v4526_v27 = vpop.eup %4525  ;;  %v3494_v6 = vpop.f32.mrf.mxu1 }
 0x38c   : > { %3587 = vst [vmem:[%s6408_s15 + $0x88] sm:$0xff] %v4526_v27  ;;  %4531 = vtanh.f32 %v3503_v13  ;;  %v3495_v56 = vadd.f32 %v3494_v6, %v3334_v31 }
 0x38e   : > { %4533 = vtanh.f32 %v3495_v56 }
 0x395   : > { %v4528_v17 = vpop.eup %4527  ;;  %v4240_v34 = vpop.f32.mrf.mxu1 }
 0x396   : > { %3592 = vst [vmem:[%s6408_s15 + $0xb0] sm:$0xff] %v4528_v17  ;;  %v3516_v8 = vadd.f32 %v4240_v34, %v3355_v0 }
 0x397   : > { %v4530_v10 = vpop.eup %4529  ;;  %v3507_v52 = vpop.f32.mrf.mxu1 }
 0x398   : > { %3590 = vst [vmem:[%s6408_s15 + $0xa0] sm:$0xff] %v4530_v10  ;;  %4535 = vtanh.f32 %v3516_v8  ;;  %v3508_v50 = vadd.f32 %v3507_v52, %v3347_v24 }
 0x399   : > { %v4532_v14 = vpop.eup %4531  ;;  %v4241_v44 = vpop.f32.mrf.mxu1 }
 0x39a   : > { %3593 = vst [vmem:[%s6408_s15 + $0xb8] sm:$0xff] %v4532_v14  ;;  %4537 = vtanh.f32 %v3508_v50  ;;  %v3519_v62 = vadd.f32 %v4241_v44, %v3358_v45 }
 0x39b   : > { %v4534_v55 = vpop.eup %4533  ;;  %v3510_v47 = vpop.f32.mrf.mxu1 }
 0x39c   : > { %3591 = vst [vmem:[%s6408_s15 + $0xa8] sm:$0xff] %v4534_v55  ;;  %4539 = vtanh.f32 %v3519_v62  ;;  %v3511_v29 = vadd.f32 %v3510_v47, %v3350_v40 }
 0x39e   : > { %4541 = vtanh.f32 %v3511_v29 }
 0x3a5   : > { %v4536_v20 = vpop.eup %4535  ;;  %v4244_v39 = vpop.f32.mrf.mxu1 }
 0x3a6   : > { %3596 = vst [vmem:[%s6408_s15 + $0xd0] sm:$0xff] %v4536_v20  ;;  %v3532_v5 = vadd.f32 %v4244_v39, %v3371_v7 }
 0x3a7   : > { %v4538_v9 = vpop.eup %4537  ;;  %v3523_v30 = vpop.f32.mrf.mxu1 }
 0x3a8   : > { %3594 = vst [vmem:[%s6408_s15 + $0xc0] sm:$0xff] %v4538_v9  ;;  %4543 = vtanh.f32 %v3532_v5  ;;  %v3524_v12 = vadd.f32 %v3523_v30, %v3363_v18 }
 0x3a9   : > { %v4540_v36 = vpop.eup %4539  ;;  %v4245_v19 = vpop.f32.mrf.mxu1 }
 0x3aa   : > { %3597 = vst [vmem:[%s6408_s15 + $0xd8] sm:$0xff] %v4540_v36  ;;  %4545 = vtanh.f32 %v3524_v12  ;;  %v3535_v35 = vadd.f32 %v4245_v19, %v3374_v25 }
 0x3ab   : > { %v4542_v23 = vpop.eup %4541  ;;  %v3526_v32 = vpop.f32.mrf.mxu1 }
 0x3ac   : > { %3595 = vst [vmem:[%s6408_s15 + $0xc8] sm:$0xff] %v4542_v23  ;;  %4547 = vtanh.f32 %v3535_v35  ;;  %v3527_v59 = vadd.f32 %v3526_v32, %v3366_v28 }
 0x3ae   : > { %4549 = vtanh.f32 %v3527_v59 }
 0x3b5   : > { %v4544_v2 = vpop.eup %4543 }
 0x3b6   : > { %3600 = vst [vmem:[%s6408_s15 + $0xf0] sm:$0xff] %v4544_v2 }
 0x3b7   : > { %v4546_v26 = vpop.eup %4545 }
 0x3b8   : > { %3598 = vst [vmem:[%s6408_s15 + $0xe0] sm:$0xff] %v4546_v26 }
 0x3b9   : > { %v4548_v41 = vpop.eup %4547 }
 0x3ba   : > { %3601 = vst [vmem:[%s6408_s15 + $0xf8] sm:$0xff] %v4548_v41 }
 0x3bb   : > { %v4550_v42 = vpop.eup %4549 }
 0x3bc   : > { %3599 = vst [vmem:[%s6408_s15 + $0xe8] sm:$0xff] %v4550_v42 }
 0x3bd PF: > { %s18_s27 = sadd.s32 1, %s4557_s27  }
 0x3be   : > { %p15_p4 = scmp.ge.s32.totalorder %s18_s27, 4  }
 0x3c0   :  { %17 = sbr.rel (!%p15_p4) target bundleno = 1 (0x1), region = 82 }

</bundles_post_ra>
